<compile_context>
chip_gen: v5e
topology: v5e:2x2
jax: 0.10.0
libtpu: 0.0.40
codegen_flags: <defaults>
</compile_context>

<pallas_src>
import functools

import jax
import jax.numpy as jnp
from jax import lax
from jax.experimental import pallas as pl
from jax.experimental.pallas import tpu as pltpu


# ----------------------------------------------------------------------------
# Shared per-batch-element encoder math.  Used by BOTH the Pallas kernel body
# and the mirrored pure-JAX reference so the two paths are numerically
# identical.
#   x      : (L, D) float32           one batch element
#   wq/wk  : (S, D, H*d_k)            S = n_layers*2 MHA slots, head-fused
#   wv     : (S, D, H*d_v)
#   wo     : (S, H*d_v, D)
#   gamma  : (S, 1, D) float32
#   beta   : (S, 1, D) float32
# ----------------------------------------------------------------------------
def _encoder_single(x, wq, wk, wv, wo, gamma, beta, *, L, D, n_layers, n_head,
                    d_k, d_v, scale_emb, d_model, compute_dtype,
                    attn_sink=None, eps=1e-6):
    x = x.astype(jnp.float32)
    if scale_emb:
        x = x * (d_model ** 0.5)
    inv_temp = 1.0 / (d_k ** 0.5)

    def mha(q, kv, slot, Lq, Lk, want_attn):
        # q: (Lq, D) f32; kv: (Lk, D) f32 (k and v are the same tensor).
        residual = q
        qc = q.astype(compute_dtype)
        kc = kv.astype(compute_dtype)
        # Head-fused projections: ONE wide matmul each (f32 accumulation).
        qp = jnp.dot(qc, wq[slot], preferred_element_type=jnp.float32) * inv_temp
        kp = jnp.dot(kc, wk[slot], preferred_element_type=jnp.float32)
        vp = jnp.dot(kc, wv[slot], preferred_element_type=jnp.float32)
        qh = qp.reshape(Lq, n_head, d_k).astype(compute_dtype)
        kh = kp.reshape(Lk, n_head, d_k).astype(compute_dtype)
        vh = vp.reshape(Lk, n_head, d_v).astype(compute_dtype)
        # Per-head scores, exact f32 softmax, context.
        s = jnp.einsum("qhd,khd->hqk", qh, kh,
                       preferred_element_type=jnp.float32)          # (H,Lq,Lk)
        s = s - jnp.max(s, axis=-1, keepdims=True)
        e = jnp.exp(s)
        p = e / jnp.sum(e, axis=-1, keepdims=True)                  # exact softmax
        ctx = jnp.einsum("hqk,khd->qhd", p.astype(compute_dtype), vh,
                         preferred_element_type=jnp.float32)        # (Lq,H,dv)
        # Head-fused output projection, residual, LayerNorm (all f32).
        o = jnp.dot(ctx.reshape(Lq, n_head * d_v).astype(compute_dtype),
                    wo[slot], preferred_element_type=jnp.float32)
        o = o + residual
        mean = jnp.mean(o, axis=-1, keepdims=True)
        var = jnp.mean(jnp.square(o - mean), axis=-1, keepdims=True)
        o = (o - mean) * lax.rsqrt(var + eps)
        o = o * gamma[slot] + beta[slot]
        return o, (p if want_attn else None)

    for l in range(n_layers):
        # F.max_pool2d(x, [2,1]) / [4,1] on (B, L, D): pool along the sequence.
        x1 = jnp.max(x.reshape(L // 2, 2, D), axis=1)       # maxpool(x, 2)
        x2 = jnp.max(x1.reshape(L // 4, 2, D), axis=1)      # == maxpool(x, 4)
        o1, _ = mha(x2, x1, 2 * l + 0, L // 4, L // 2, False)
        x, p = mha(x, o1, 2 * l + 1, L, L // 4, attn_sink is not None)
        if attn_sink is not None:
            attn_sink(l, p)          # store per layer: bounds live ranges
    return x


# ----------------------------------------------------------------------------
# Pallas kernel: one batch element per grid step; all layers fused.
# ----------------------------------------------------------------------------
def _encoder_kernel(x_ref, wq_ref, wk_ref, wv_ref, wo_ref, g_ref, b_ref,
                    *out_refs, L, D, n_layers, n_head, d_k, d_v, scale_emb,
                    d_model, compute_dtype, return_attns):
    out_ref = out_refs[0]
    attn_ref = out_refs[1] if return_attns else None

    def attn_sink(l, p):
        attn_ref[0, l * n_head:(l + 1) * n_head] = p.astype(attn_ref.dtype)

    out = _encoder_single(
        x_ref[0], wq_ref[...], wk_ref[...], wv_ref[...], wo_ref[...],
        g_ref[...], b_ref[...],
        L=L, D=D, n_layers=n_layers, n_head=n_head, d_k=d_k, d_v=d_v,
        scale_emb=scale_emb, d_model=d_model, compute_dtype=compute_dtype,
        attn_sink=attn_sink if return_attns else None)
    out_ref[0] = out.astype(out_ref.dtype)


# ----------------------------------------------------------------------------
# Wrapper-side parameter packing (head-fused, lane-dense; done once).
# torch nn.Linear convention: y = x @ W.T, output features are head-major.
# ----------------------------------------------------------------------------
def prepare_params(params, *, compute_dtype):
    wq, wk, wv, wo, g, b = [], [], [], [], [], []
    for layer in params:
        for name in ("attn1", "attn2"):
            p = layer[name]
            wq.append(p["wq"].T)      # (D, H*d_k)
            wk.append(p["wk"].T)      # (D, H*d_k)
            wv.append(p["wv"].T)      # (D, H*d_v)
            wo.append(p["wo"].T)      # (H*d_v, D)
            g.append(p["gamma"])      # (1, D)
            b.append(p["beta"])       # (1, D)
    return {
        "wq": jnp.stack(wq).astype(compute_dtype),     # (S, D, H*d_k)
        "wk": jnp.stack(wk).astype(compute_dtype),
        "wv": jnp.stack(wv).astype(compute_dtype),
        "wo": jnp.stack(wo).astype(compute_dtype),     # (S, H*d_v, D)
        "gamma": jnp.stack(g).astype(jnp.float32),     # (S, 1, D)
        "beta": jnp.stack(b).astype(jnp.float32),
    }


def encoder_forward(x, src_mask, params, *, n_head, d_k, d_v, d_model,
                    scale_emb=False, return_attns=False,
                    compute_dtype=jnp.bfloat16):
    del src_mask  # the reference EncoderLayer.forward never forwards it to MHA
    B, L, D = x.shape
    # TODO(synk): F.max_pool2d floor-truncates odd lengths; here we require L%4==0.
    assert L % 4 == 0, "sequence length must be divisible by 4"
    n_layers = len(params)
    prep = prepare_params(params, compute_dtype=compute_dtype)

    kernel = functools.partial(
        _encoder_kernel, L=L, D=D, n_layers=n_layers, n_head=n_head,
        d_k=d_k, d_v=d_v, scale_emb=scale_emb, d_model=d_model,
        compute_dtype=compute_dtype, return_attns=return_attns)

    out_shape = [jax.ShapeDtypeStruct((B, L, D), x.dtype)]
    out_specs = [pl.BlockSpec((1, L, D), lambda b: (b, 0, 0))]
    if return_attns:
        # TODO(synk): store lane-dense (Lq*Lk on lanes) when L//4 < 128.
        out_shape.append(jax.ShapeDtypeStruct((B, n_layers * n_head, L, L // 4),
                                              jnp.float32))
        out_specs.append(pl.BlockSpec((1, n_layers * n_head, L, L // 4),
                                      lambda b: (b, 0, 0, 0)))

    def full_spec(shape):
        return pl.BlockSpec(shape, lambda b, _s=shape: (0,) * len(_s))

    in_specs = [
        pl.BlockSpec((1, L, D), lambda b: (b, 0, 0)),   # one batch element/step
        full_spec(prep["wq"].shape),                    # weights stay resident
        full_spec(prep["wk"].shape),
        full_spec(prep["wv"].shape),
        full_spec(prep["wo"].shape),
        full_spec(prep["gamma"].shape),
        full_spec(prep["beta"].shape),
    ]

    # VMEM budget from actual sizes (weights resident + per-batch activations).
    w_bytes = sum(int(prep[k].size) * prep[k].dtype.itemsize
                  for k in ("wq", "wk", "wv", "wo", "gamma", "beta"))
    act_bytes = 16 * L * D * 4
    attn_bytes = (n_layers * n_head * L * (L // 4) * 4) if return_attns else 0
    vmem_limit = int(min(100 * 2 ** 20,
                         max(32 * 2 ** 20,
                             4 * (w_bytes + act_bytes + attn_bytes))))

    outs = pl.pallas_call(
        kernel,
        grid=(B,),
        out_shape=tuple(out_shape),
        in_specs=in_specs,
        out_specs=tuple(out_specs),
        compiler_params=pltpu.CompilerParams(
            dimension_semantics=("parallel",),   # batch grid -> megacore on v7x
            vmem_limit_bytes=vmem_limit),
    )(x, prep["wq"], prep["wk"], prep["wv"], prep["wo"],
      prep["gamma"], prep["beta"])

    out = outs[0]
    if return_attns:
        attn = outs[1]   # (B, n_layers*H, L, L//4)
        attn_list = [attn[:, l * n_head:(l + 1) * n_head] for l in range(n_layers)]
        return out, attn_list
    return out


# ----------------------------------------------------------------------------
# Pure-JAX references (for correctness checks)
# ----------------------------------------------------------------------------
def _encoder_ref_mirror(x, prep, *, n_head, d_k, d_v, d_model, n_layers,
                        scale_emb, compute_dtype):
    """Runs the exact same math as the kernel body (same packed weights/casts)."""
    B, L, D = x.shape
    outs = []
    for b in range(B):
        outs.append(_encoder_single(
            x[b], prep["wq"], prep["wk"], prep["wv"], prep["wo"],
            prep["gamma"], prep["beta"],
            L=L, D=D, n_layers=n_layers, n_head=n_head, d_k=d_k, d_v=d_v,
            scale_emb=scale_emb, d_model=d_model, compute_dtype=compute_dtype))
    return jnp.stack(outs, axis=0)


def _mha_ref_f32(q, k, v, p, n_head, d_k, d_v):
    """Independent torch-convention reference (full f32)."""
    B, Lq, D = q.shape
    Lk = k.shape[1]
    qp = (q @ p["wq"].T).reshape(B, Lq, n_head, d_k).transpose(0, 2, 1, 3)
    kp = (k @ p["wk"].T).reshape(B, Lk, n_head, d_k).transpose(0, 2, 1, 3)
    vp = (v @ p["wv"].T).reshape(B, Lk, n_head, d_v).transpose(0, 2, 1, 3)
    attn = jax.nn.softmax(jnp.einsum("bhqd,bhkd->bhqk", qp / (d_k ** 0.5), kp), -1)
    o = jnp.einsum("bhqk,bhkd->bhqd", attn, vp)
    o = o.transpose(0, 2, 1, 3).reshape(B, Lq, n_head * d_v) @ p["wo"].T + q
    mean = o.mean(-1, keepdims=True)
    var = ((o - mean) ** 2).mean(-1, keepdims=True)
    o = (o - mean) / jnp.sqrt(var + 1e-6) * p["gamma"][0] + p["beta"][0]
    return o, attn


def _encoder_ref_f32(x, params, n_head, d_k, d_v, d_model, scale_emb=False):
    if scale_emb:
        x = x * (d_model ** 0.5)
    attns = []
    for lp in params:
        B, L, D = x.shape
        x1 = jnp.max(x.reshape(B, L // 2, 2, D), axis=2)
        x2 = jnp.max(x.reshape(B, L // 4, 4, D), axis=2)
        o1, _ = _mha_ref_f32(x2, x1, x1, lp["attn1"], n_head, d_k, d_v)
        x, a = _mha_ref_f32(x, o1, o1, lp["attn2"], n_head, d_k, d_v)
        attns.append(a)
    return x, attns


# ----------------------------------------------------------------------------
# Deterministic parameter construction (torch nn.Linear weight convention)
# ----------------------------------------------------------------------------
def make_params(key, n_layers, n_head, d_k, d_v, d_model):
    params = []
    scale = 1.0 / (d_model ** 0.5)
    for _ in range(n_layers):
        layer = {}
        for name in ("attn1", "attn2"):
            key, k1, k2, k3, k4 = jax.random.split(key, 5)
            layer[name] = {
                "wq": jax.random.normal(k1, (n_head * d_k, d_model), jnp.float32) * scale,
                "wk": jax.random.normal(k2, (n_head * d_k, d_model), jnp.float32) * scale,
                "wv": jax.random.normal(k3, (n_head * d_v, d_model), jnp.float32) * scale,
                "wo": jax.random.normal(k4, (d_model, n_head * d_v), jnp.float32) * scale,
                "gamma": jnp.ones((1, d_model), jnp.float32),
                "beta": jnp.zeros((1, d_model), jnp.float32),
            }
        params.append(layer)
    return params


# ----------------------------------------------------------------------------
if __name__ == "__main__":
    n_layers, n_head, d_k, d_v, d_model, d_inner = 2, 2, 16, 16, 32, 64
    B, L = 2, 16                                     # L must be divisible by 4

    key = jax.random.PRNGKey(0)
    kx, kp = jax.random.split(key)
    x = jax.random.normal(kx, (B, L, d_model), jnp.float32)
    src_mask = jnp.ones((B, L, L), jnp.float32)      # accepted, never forwarded
    params = make_params(kp, n_layers, n_head, d_k, d_v, d_model)

    # 1) Production path: bf16 matmul operands, f32 accumulation/softmax/LN.
    out = encoder_forward(x, src_mask, params, n_head=n_head, d_k=d_k, d_v=d_v,
                          d_model=d_model, scale_emb=False,
                          compute_dtype=jnp.bfloat16)
    out = jax.block_until_ready(out)
    assert out.shape == (B, L, d_model)

    prep = prepare_params(params, compute_dtype=jnp.bfloat16)
    ref_mirror = _encoder_ref_mirror(x, prep, n_head=n_head, d_k=d_k, d_v=d_v,
                                     d_model=d_model, n_layers=n_layers,
                                     scale_emb=False,
                                     compute_dtype=jnp.bfloat16)
    assert jnp.allclose(out, ref_mirror, atol=2e-2, rtol=2e-2), \
        "mismatch vs mirrored bf16 JAX reference"

    # 2) f32-compute path (incl. return_attns) vs an independent f32 reference.
    out32, attn_list = encoder_forward(
        x, src_mask, params, n_head=n_head, d_k=d_k, d_v=d_v, d_model=d_model,
        scale_emb=False, return_attns=True, compute_dtype=jnp.float32)
    out32 = jax.block_until_ready(out32)
    ref32, ref_attns = _encoder_ref_f32(x, params, n_head, d_k, d_v, d_model)
    assert jnp.allclose(out32, ref32, atol=2e-2, rtol=2e-2), \
        "mismatch vs float32 JAX reference"
    assert len(attn_list) == n_layers
    for l in range(n_layers):
        assert attn_list[l].shape == (B, n_head, L, L // 4)
        assert jnp.allclose(attn_list[l], ref_attns[l], atol=2e-2, rtol=2e-2), \
            f"attention mismatch at layer {l}"

    print("KERNEL_OK")
</pallas_src>

<mosaic_0001>
module attributes {stable_mosaic.version = 11 : i64} {
  func.func @_encoder_kernel(%arg0: i32, %arg1: memref<1x16x32xf32, #tpu.memory_space<vmem>>, %arg2: memref<4x32x32xbf16, #tpu.memory_space<vmem>>, %arg3: memref<4x32x32xbf16, #tpu.memory_space<vmem>>, %arg4: memref<4x32x32xbf16, #tpu.memory_space<vmem>>, %arg5: memref<4x32x32xbf16, #tpu.memory_space<vmem>>, %arg6: memref<4x1x32xf32, #tpu.memory_space<vmem>>, %arg7: memref<4x1x32xf32, #tpu.memory_space<vmem>>, %arg8: memref<1x16x32xf32, #tpu.memory_space<vmem>>) attributes {dimension_semantics = [#tpu.dimension_semantics<parallel>], iteration_bounds = array<i64: 2>, scalar_prefetch = 0 : i64, scratch_operands = 0 : i64, tpu.core_type = #tpu.core_type<tc>, window_params = [{transform_indices = @transform_0, window_bounds = array<i64: 1, 16, 32>}, {pipeline_mode = #tpu.pipeline_mode<synchronous>, transform_indices = @transform_1, window_bounds = array<i64: 4, 32, 32>}, {pipeline_mode = #tpu.pipeline_mode<synchronous>, transform_indices = @transform_2, window_bounds = array<i64: 4, 32, 32>}, {pipeline_mode = #tpu.pipeline_mode<synchronous>, transform_indices = @transform_3, window_bounds = array<i64: 4, 32, 32>}, {pipeline_mode = #tpu.pipeline_mode<synchronous>, transform_indices = @transform_4, window_bounds = array<i64: 4, 32, 32>}, {pipeline_mode = #tpu.pipeline_mode<synchronous>, transform_indices = @transform_5, window_bounds = array<i64: 4, 1, 32>}, {pipeline_mode = #tpu.pipeline_mode<synchronous>, transform_indices = @transform_6, window_bounds = array<i64: 4, 1, 32>}, {transform_indices = @transform_7, window_bounds = array<i64: 1, 16, 32>}]} {
    %c0 = arith.constant 0 : index
    %c0_0 = arith.constant 0 : index
    %c0_1 = arith.constant 0 : index
    %0 = vector.load %arg1[%c0, %c0_0, %c0_1] : memref<1x16x32xf32, #tpu.memory_space<vmem>>, vector<1x16x32xf32>
    %1 = vector.shape_cast %0 : vector<1x16x32xf32> to vector<16x32xf32>
    %c0_2 = arith.constant 0 : index
    %c0_3 = arith.constant 0 : index
    %c0_4 = arith.constant 0 : index
    %2 = vector.load %arg2[%c0_2, %c0_3, %c0_4] : memref<4x32x32xbf16, #tpu.memory_space<vmem>>, vector<4x32x32xbf16>
    %c0_5 = arith.constant 0 : index
    %c0_6 = arith.constant 0 : index
    %c0_7 = arith.constant 0 : index
    %3 = vector.load %arg3[%c0_5, %c0_6, %c0_7] : memref<4x32x32xbf16, #tpu.memory_space<vmem>>, vector<4x32x32xbf16>
    %c0_8 = arith.constant 0 : index
    %c0_9 = arith.constant 0 : index
    %c0_10 = arith.constant 0 : index
    %4 = vector.load %arg4[%c0_8, %c0_9, %c0_10] : memref<4x32x32xbf16, #tpu.memory_space<vmem>>, vector<4x32x32xbf16>
    %c0_11 = arith.constant 0 : index
    %c0_12 = arith.constant 0 : index
    %c0_13 = arith.constant 0 : index
    %5 = vector.load %arg5[%c0_11, %c0_12, %c0_13] : memref<4x32x32xbf16, #tpu.memory_space<vmem>>, vector<4x32x32xbf16>
    %c0_14 = arith.constant 0 : index
    %c0_15 = arith.constant 0 : index
    %c0_16 = arith.constant 0 : index
    %6 = vector.load %arg6[%c0_14, %c0_15, %c0_16] : memref<4x1x32xf32, #tpu.memory_space<vmem>>, vector<4x1x32xf32>
    %c0_17 = arith.constant 0 : index
    %c0_18 = arith.constant 0 : index
    %c0_19 = arith.constant 0 : index
    %7 = vector.load %arg7[%c0_17, %c0_18, %c0_19] : memref<4x1x32xf32, #tpu.memory_space<vmem>>, vector<4x1x32xf32>
    %8 = vector.shape_cast %1 : vector<16x32xf32> to vector<8x2x32xf32>
    %cst = arith.constant dense<0xFF800000> : vector<8x32xf32>
    %9 = vector.multi_reduction <maximumf>, %8, %cst [1] : vector<8x2x32xf32> to vector<8x32xf32>
    %10 = vector.shape_cast %9 : vector<8x32xf32> to vector<4x2x32xf32>
    %cst_20 = arith.constant dense<0xFF800000> : vector<4x32xf32>
    %11 = vector.multi_reduction <maximumf>, %10, %cst_20 [1] : vector<4x2x32xf32> to vector<4x32xf32>
    %12 = arith.truncf %11 : vector<4x32xf32> to vector<4x32xbf16>
    %13 = arith.truncf %9 : vector<8x32xf32> to vector<8x32xbf16>
    %14 = vector.extract_strided_slice %2 {offsets = [0, 0, 0], sizes = [1, 32, 32], strides = [1, 1, 1]} : vector<4x32x32xbf16> to vector<1x32x32xbf16>
    %15 = vector.shape_cast %14 : vector<1x32x32xbf16> to vector<32x32xbf16>
    %cst_21 = arith.constant dense<0.000000e+00> : vector<4x32xf32>
    %16 = tpu.matmul %12, %15, %cst_21 {dimension_numbers = #tpu.dot_dimension_numbers<[1], [0], [0], [1], [0, 0, 1, 1], [], []>} : vector<4x32xbf16>, vector<32x32xbf16>, vector<4x32xf32> -> vector<4x32xf32>
    %cst_22 = arith.constant 2.500000e-01 : f32
    %17 = vector.broadcast %cst_22 : f32 to vector<4x32xf32>
    %18 = arith.mulf %16, %17 : vector<4x32xf32>
    %19 = vector.extract_strided_slice %3 {offsets = [0, 0, 0], sizes = [1, 32, 32], strides = [1, 1, 1]} : vector<4x32x32xbf16> to vector<1x32x32xbf16>
    %20 = vector.shape_cast %19 : vector<1x32x32xbf16> to vector<32x32xbf16>
    %cst_23 = arith.constant dense<0.000000e+00> : vector<8x32xf32>
    %21 = tpu.matmul %13, %20, %cst_23 {dimension_numbers = #tpu.dot_dimension_numbers<[1], [0], [0], [1], [0, 0, 1, 1], [], []>} : vector<8x32xbf16>, vector<32x32xbf16>, vector<8x32xf32> -> vector<8x32xf32>
    %22 = vector.extract_strided_slice %4 {offsets = [0, 0, 0], sizes = [1, 32, 32], strides = [1, 1, 1]} : vector<4x32x32xbf16> to vector<1x32x32xbf16>
    %23 = vector.shape_cast %22 : vector<1x32x32xbf16> to vector<32x32xbf16>
    %cst_24 = arith.constant dense<0.000000e+00> : vector<8x32xf32>
    %24 = tpu.matmul %13, %23, %cst_24 {dimension_numbers = #tpu.dot_dimension_numbers<[1], [0], [0], [1], [0, 0, 1, 1], [], []>} : vector<8x32xbf16>, vector<32x32xbf16>, vector<8x32xf32> -> vector<8x32xf32>
    %25 = vector.shape_cast %18 : vector<4x32xf32> to vector<4x2x16xf32>
    %26 = arith.truncf %25 : vector<4x2x16xf32> to vector<4x2x16xbf16>
    %27 = vector.shape_cast %21 : vector<8x32xf32> to vector<8x2x16xf32>
    %28 = arith.truncf %27 : vector<8x2x16xf32> to vector<8x2x16xbf16>
    %29 = vector.shape_cast %24 : vector<8x32xf32> to vector<8x2x16xf32>
    %30 = arith.truncf %29 : vector<8x2x16xf32> to vector<8x2x16xbf16>
    "tpu.trace_start"() <{level = 10 : i32, message = "qhd,khd->hqk"}> : () -> ()
    %cst_25 = arith.constant dense<0.000000e+00> : vector<2x4x8xf32>
    %31 = tpu.matmul %26, %28, %cst_25 {dimension_numbers = #tpu.dot_dimension_numbers<[2], [2], [0], [0], [0, 1, 0, 0, 1, 0], [1], [1]>} : vector<4x2x16xbf16>, vector<8x2x16xbf16>, vector<2x4x8xf32> -> vector<2x4x8xf32>
    "tpu.trace_stop"() : () -> ()
    %cst_26 = arith.constant dense<0xFF800000> : vector<2x4xf32>
    %32 = vector.multi_reduction <maximumf>, %31, %cst_26 [2] : vector<2x4x8xf32> to vector<2x4xf32>
    %33 = vector.shape_cast %32 : vector<2x4xf32> to vector<2x4x1xf32>
    %34 = vector.broadcast %33 : vector<2x4x1xf32> to vector<2x4x8xf32>
    %35 = arith.subf %31, %34 : vector<2x4x8xf32>
    %36 = math.exp %35 : vector<2x4x8xf32>
    %cst_27 = arith.constant dense<0.000000e+00> : vector<2x4xf32>
    %37 = vector.multi_reduction <add>, %36, %cst_27 [2] : vector<2x4x8xf32> to vector<2x4xf32>
    %38 = vector.shape_cast %37 : vector<2x4xf32> to vector<2x4x1xf32>
    %39 = vector.broadcast %38 : vector<2x4x1xf32> to vector<2x4x8xf32>
    %40 = arith.divf %36, %39 : vector<2x4x8xf32>
    %41 = arith.truncf %40 : vector<2x4x8xf32> to vector<2x4x8xbf16>
    "tpu.trace_start"() <{level = 10 : i32, message = "hqk,khd->qhd"}> : () -> ()
    %cst_28 = arith.constant dense<0.000000e+00> : vector<2x16x4xf32>
    %42 = tpu.matmul %30, %41, %cst_28 {dimension_numbers = #tpu.dot_dimension_numbers<[0], [2], [2], [1], [0, 1, 0, 2, 1, 1], [1], [0]>} : vector<8x2x16xbf16>, vector<2x4x8xbf16>, vector<2x16x4xf32> -> vector<2x16x4xf32>
    %43 = tpu.transpose %42, [2, 0, 1] : vector<2x16x4xf32> -> vector<4x2x16xf32>
    "tpu.trace_stop"() : () -> ()
    %44 = vector.shape_cast %43 : vector<4x2x16xf32> to vector<4x32xf32>
    %45 = arith.truncf %44 : vector<4x32xf32> to vector<4x32xbf16>
    %46 = vector.extract_strided_slice %5 {offsets = [0, 0, 0], sizes = [1, 32, 32], strides = [1, 1, 1]} : vector<4x32x32xbf16> to vector<1x32x32xbf16>
    %47 = vector.shape_cast %46 : vector<1x32x32xbf16> to vector<32x32xbf16>
    %cst_29 = arith.constant dense<0.000000e+00> : vector<4x32xf32>
    %48 = tpu.matmul %45, %47, %cst_29 {dimension_numbers = #tpu.dot_dimension_numbers<[1], [0], [0], [1], [0, 0, 1, 1], [], []>} : vector<4x32xbf16>, vector<32x32xbf16>, vector<4x32xf32> -> vector<4x32xf32>
    %49 = arith.addf %48, %11 : vector<4x32xf32>
    %cst_30 = arith.constant dense<0.000000e+00> : vector<4xf32>
    %50 = vector.multi_reduction <add>, %49, %cst_30 [1] : vector<4x32xf32> to vector<4xf32>
    %51 = vector.shape_cast %50 : vector<4xf32> to vector<4x1xf32>
    %cst_31 = arith.constant 3.200000e+01 : f32
    %52 = vector.broadcast %cst_31 : f32 to vector<4x1xf32>
    %53 = arith.divf %51, %52 : vector<4x1xf32>
    %54 = vector.broadcast %53 : vector<4x1xf32> to vector<4x32xf32>
    %55 = arith.subf %49, %54 : vector<4x32xf32>
    %56 = arith.mulf %55, %55 : vector<4x32xf32>
    %cst_32 = arith.constant dense<0.000000e+00> : vector<4xf32>
    %57 = vector.multi_reduction <add>, %56, %cst_32 [1] : vector<4x32xf32> to vector<4xf32>
    %58 = vector.shape_cast %57 : vector<4xf32> to vector<4x1xf32>
    %cst_33 = arith.constant 3.200000e+01 : f32
    %59 = vector.broadcast %cst_33 : f32 to vector<4x1xf32>
    %60 = arith.divf %58, %59 : vector<4x1xf32>
    %61 = vector.broadcast %53 : vector<4x1xf32> to vector<4x32xf32>
    %62 = arith.subf %49, %61 : vector<4x32xf32>
    %cst_34 = arith.constant 9.99999997E-7 : f32
    %63 = vector.broadcast %cst_34 : f32 to vector<4x1xf32>
    %64 = arith.addf %60, %63 : vector<4x1xf32>
    %65 = math.rsqrt %64 : vector<4x1xf32>
    %66 = vector.broadcast %65 : vector<4x1xf32> to vector<4x32xf32>
    %67 = arith.mulf %62, %66 : vector<4x32xf32>
    %68 = vector.extract_strided_slice %6 {offsets = [0, 0, 0], sizes = [1, 1, 32], strides = [1, 1, 1]} : vector<4x1x32xf32> to vector<1x1x32xf32>
    %69 = vector.shape_cast %68 : vector<1x1x32xf32> to vector<1x32xf32>
    %70 = vector.broadcast %69 : vector<1x32xf32> to vector<4x32xf32>
    %71 = arith.mulf %67, %70 : vector<4x32xf32>
    %72 = vector.extract_strided_slice %7 {offsets = [0, 0, 0], sizes = [1, 1, 32], strides = [1, 1, 1]} : vector<4x1x32xf32> to vector<1x1x32xf32>
    %73 = vector.shape_cast %72 : vector<1x1x32xf32> to vector<1x32xf32>
    %74 = vector.broadcast %73 : vector<1x32xf32> to vector<4x32xf32>
    %75 = arith.addf %71, %74 : vector<4x32xf32>
    %76 = arith.truncf %1 : vector<16x32xf32> to vector<16x32xbf16>
    %77 = arith.truncf %75 : vector<4x32xf32> to vector<4x32xbf16>
    %78 = vector.extract_strided_slice %2 {offsets = [1, 0, 0], sizes = [1, 32, 32], strides = [1, 1, 1]} : vector<4x32x32xbf16> to vector<1x32x32xbf16>
    %79 = vector.shape_cast %78 : vector<1x32x32xbf16> to vector<32x32xbf16>
    %cst_35 = arith.constant dense<0.000000e+00> : vector<16x32xf32>
    %80 = tpu.matmul %76, %79, %cst_35 {dimension_numbers = #tpu.dot_dimension_numbers<[1], [0], [0], [1], [0, 0, 1, 1], [], []>} : vector<16x32xbf16>, vector<32x32xbf16>, vector<16x32xf32> -> vector<16x32xf32>
    %cst_36 = arith.constant 2.500000e-01 : f32
    %81 = vector.broadcast %cst_36 : f32 to vector<16x32xf32>
    %82 = arith.mulf %80, %81 : vector<16x32xf32>
    %83 = vector.extract_strided_slice %3 {offsets = [1, 0, 0], sizes = [1, 32, 32], strides = [1, 1, 1]} : vector<4x32x32xbf16> to vector<1x32x32xbf16>
    %84 = vector.shape_cast %83 : vector<1x32x32xbf16> to vector<32x32xbf16>
    %cst_37 = arith.constant dense<0.000000e+00> : vector<4x32xf32>
    %85 = tpu.matmul %77, %84, %cst_37 {dimension_numbers = #tpu.dot_dimension_numbers<[1], [0], [0], [1], [0, 0, 1, 1], [], []>} : vector<4x32xbf16>, vector<32x32xbf16>, vector<4x32xf32> -> vector<4x32xf32>
    %86 = vector.extract_strided_slice %4 {offsets = [1, 0, 0], sizes = [1, 32, 32], strides = [1, 1, 1]} : vector<4x32x32xbf16> to vector<1x32x32xbf16>
    %87 = vector.shape_cast %86 : vector<1x32x32xbf16> to vector<32x32xbf16>
    %cst_38 = arith.constant dense<0.000000e+00> : vector<4x32xf32>
    %88 = tpu.matmul %77, %87, %cst_38 {dimension_numbers = #tpu.dot_dimension_numbers<[1], [0], [0], [1], [0, 0, 1, 1], [], []>} : vector<4x32xbf16>, vector<32x32xbf16>, vector<4x32xf32> -> vector<4x32xf32>
    %89 = vector.shape_cast %82 : vector<16x32xf32> to vector<16x2x16xf32>
    %90 = arith.truncf %89 : vector<16x2x16xf32> to vector<16x2x16xbf16>
    %91 = vector.shape_cast %85 : vector<4x32xf32> to vector<4x2x16xf32>
    %92 = arith.truncf %91 : vector<4x2x16xf32> to vector<4x2x16xbf16>
    %93 = vector.shape_cast %88 : vector<4x32xf32> to vector<4x2x16xf32>
    %94 = arith.truncf %93 : vector<4x2x16xf32> to vector<4x2x16xbf16>
    "tpu.trace_start"() <{level = 10 : i32, message = "qhd,khd->hqk"}> : () -> ()
    %cst_39 = arith.constant dense<0.000000e+00> : vector<2x16x4xf32>
    %95 = tpu.matmul %90, %92, %cst_39 {dimension_numbers = #tpu.dot_dimension_numbers<[2], [2], [0], [0], [0, 1, 0, 0, 1, 0], [1], [1]>} : vector<16x2x16xbf16>, vector<4x2x16xbf16>, vector<2x16x4xf32> -> vector<2x16x4xf32>
    "tpu.trace_stop"() : () -> ()
    %cst_40 = arith.constant dense<0xFF800000> : vector<2x16xf32>
    %96 = vector.multi_reduction <maximumf>, %95, %cst_40 [2] : vector<2x16x4xf32> to vector<2x16xf32>
    %97 = vector.shape_cast %96 : vector<2x16xf32> to vector<2x16x1xf32>
    %98 = vector.broadcast %97 : vector<2x16x1xf32> to vector<2x16x4xf32>
    %99 = arith.subf %95, %98 : vector<2x16x4xf32>
    %100 = math.exp %99 : vector<2x16x4xf32>
    %cst_41 = arith.constant dense<0.000000e+00> : vector<2x16xf32>
    %101 = vector.multi_reduction <add>, %100, %cst_41 [2] : vector<2x16x4xf32> to vector<2x16xf32>
    %102 = vector.shape_cast %101 : vector<2x16xf32> to vector<2x16x1xf32>
    %103 = vector.broadcast %102 : vector<2x16x1xf32> to vector<2x16x4xf32>
    %104 = arith.divf %100, %103 : vector<2x16x4xf32>
    %105 = arith.truncf %104 : vector<2x16x4xf32> to vector<2x16x4xbf16>
    "tpu.trace_start"() <{level = 10 : i32, message = "hqk,khd->qhd"}> : () -> ()
    %cst_42 = arith.constant dense<0.000000e+00> : vector<2x16x16xf32>
    %106 = tpu.matmul %94, %105, %cst_42 {dimension_numbers = #tpu.dot_dimension_numbers<[0], [2], [2], [1], [0, 1, 0, 2, 1, 1], [1], [0]>} : vector<4x2x16xbf16>, vector<2x16x4xbf16>, vector<2x16x16xf32> -> vector<2x16x16xf32>
    %107 = tpu.transpose %106, [2, 0, 1] : vector<2x16x16xf32> -> vector<16x2x16xf32>
    "tpu.trace_stop"() : () -> ()
    %108 = vector.shape_cast %107 : vector<16x2x16xf32> to vector<16x32xf32>
    %109 = arith.truncf %108 : vector<16x32xf32> to vector<16x32xbf16>
    %110 = vector.extract_strided_slice %5 {offsets = [1, 0, 0], sizes = [1, 32, 32], strides = [1, 1, 1]} : vector<4x32x32xbf16> to vector<1x32x32xbf16>
    %111 = vector.shape_cast %110 : vector<1x32x32xbf16> to vector<32x32xbf16>
    %cst_43 = arith.constant dense<0.000000e+00> : vector<16x32xf32>
    %112 = tpu.matmul %109, %111, %cst_43 {dimension_numbers = #tpu.dot_dimension_numbers<[1], [0], [0], [1], [0, 0, 1, 1], [], []>} : vector<16x32xbf16>, vector<32x32xbf16>, vector<16x32xf32> -> vector<16x32xf32>
    %113 = arith.addf %112, %1 : vector<16x32xf32>
    %cst_44 = arith.constant dense<0.000000e+00> : vector<16xf32>
    %114 = vector.multi_reduction <add>, %113, %cst_44 [1] : vector<16x32xf32> to vector<16xf32>
    %115 = vector.shape_cast %114 : vector<16xf32> to vector<16x1xf32>
    %cst_45 = arith.constant 3.200000e+01 : f32
    %116 = vector.broadcast %cst_45 : f32 to vector<16x1xf32>
    %117 = arith.divf %115, %116 : vector<16x1xf32>
    %118 = vector.broadcast %117 : vector<16x1xf32> to vector<16x32xf32>
    %119 = arith.subf %113, %118 : vector<16x32xf32>
    %120 = arith.mulf %119, %119 : vector<16x32xf32>
    %cst_46 = arith.constant dense<0.000000e+00> : vector<16xf32>
    %121 = vector.multi_reduction <add>, %120, %cst_46 [1] : vector<16x32xf32> to vector<16xf32>
    %122 = vector.shape_cast %121 : vector<16xf32> to vector<16x1xf32>
    %cst_47 = arith.constant 3.200000e+01 : f32
    %123 = vector.broadcast %cst_47 : f32 to vector<16x1xf32>
    %124 = arith.divf %122, %123 : vector<16x1xf32>
    %125 = vector.broadcast %117 : vector<16x1xf32> to vector<16x32xf32>
    %126 = arith.subf %113, %125 : vector<16x32xf32>
    %cst_48 = arith.constant 9.99999997E-7 : f32
    %127 = vector.broadcast %cst_48 : f32 to vector<16x1xf32>
    %128 = arith.addf %124, %127 : vector<16x1xf32>
    %129 = math.rsqrt %128 : vector<16x1xf32>
    %130 = vector.broadcast %129 : vector<16x1xf32> to vector<16x32xf32>
    %131 = arith.mulf %126, %130 : vector<16x32xf32>
    %132 = vector.extract_strided_slice %6 {offsets = [1, 0, 0], sizes = [1, 1, 32], strides = [1, 1, 1]} : vector<4x1x32xf32> to vector<1x1x32xf32>
    %133 = vector.shape_cast %132 : vector<1x1x32xf32> to vector<1x32xf32>
    %134 = vector.broadcast %133 : vector<1x32xf32> to vector<16x32xf32>
    %135 = arith.mulf %131, %134 : vector<16x32xf32>
    %136 = vector.extract_strided_slice %7 {offsets = [1, 0, 0], sizes = [1, 1, 32], strides = [1, 1, 1]} : vector<4x1x32xf32> to vector<1x1x32xf32>
    %137 = vector.shape_cast %136 : vector<1x1x32xf32> to vector<1x32xf32>
    %138 = vector.broadcast %137 : vector<1x32xf32> to vector<16x32xf32>
    %139 = arith.addf %135, %138 : vector<16x32xf32>
    %140 = vector.shape_cast %139 : vector<16x32xf32> to vector<8x2x32xf32>
    %cst_49 = arith.constant dense<0xFF800000> : vector<8x32xf32>
    %141 = vector.multi_reduction <maximumf>, %140, %cst_49 [1] : vector<8x2x32xf32> to vector<8x32xf32>
    %142 = vector.shape_cast %141 : vector<8x32xf32> to vector<4x2x32xf32>
    %cst_50 = arith.constant dense<0xFF800000> : vector<4x32xf32>
    %143 = vector.multi_reduction <maximumf>, %142, %cst_50 [1] : vector<4x2x32xf32> to vector<4x32xf32>
    %144 = arith.truncf %143 : vector<4x32xf32> to vector<4x32xbf16>
    %145 = arith.truncf %141 : vector<8x32xf32> to vector<8x32xbf16>
    %146 = vector.extract_strided_slice %2 {offsets = [2, 0, 0], sizes = [1, 32, 32], strides = [1, 1, 1]} : vector<4x32x32xbf16> to vector<1x32x32xbf16>
    %147 = vector.shape_cast %146 : vector<1x32x32xbf16> to vector<32x32xbf16>
    %cst_51 = arith.constant dense<0.000000e+00> : vector<4x32xf32>
    %148 = tpu.matmul %144, %147, %cst_51 {dimension_numbers = #tpu.dot_dimension_numbers<[1], [0], [0], [1], [0, 0, 1, 1], [], []>} : vector<4x32xbf16>, vector<32x32xbf16>, vector<4x32xf32> -> vector<4x32xf32>
    %cst_52 = arith.constant 2.500000e-01 : f32
    %149 = vector.broadcast %cst_52 : f32 to vector<4x32xf32>
    %150 = arith.mulf %148, %149 : vector<4x32xf32>
    %151 = vector.extract_strided_slice %3 {offsets = [2, 0, 0], sizes = [1, 32, 32], strides = [1, 1, 1]} : vector<4x32x32xbf16> to vector<1x32x32xbf16>
    %152 = vector.shape_cast %151 : vector<1x32x32xbf16> to vector<32x32xbf16>
    %cst_53 = arith.constant dense<0.000000e+00> : vector<8x32xf32>
    %153 = tpu.matmul %145, %152, %cst_53 {dimension_numbers = #tpu.dot_dimension_numbers<[1], [0], [0], [1], [0, 0, 1, 1], [], []>} : vector<8x32xbf16>, vector<32x32xbf16>, vector<8x32xf32> -> vector<8x32xf32>
    %154 = vector.extract_strided_slice %4 {offsets = [2, 0, 0], sizes = [1, 32, 32], strides = [1, 1, 1]} : vector<4x32x32xbf16> to vector<1x32x32xbf16>
    %155 = vector.shape_cast %154 : vector<1x32x32xbf16> to vector<32x32xbf16>
    %cst_54 = arith.constant dense<0.000000e+00> : vector<8x32xf32>
    %156 = tpu.matmul %145, %155, %cst_54 {dimension_numbers = #tpu.dot_dimension_numbers<[1], [0], [0], [1], [0, 0, 1, 1], [], []>} : vector<8x32xbf16>, vector<32x32xbf16>, vector<8x32xf32> -> vector<8x32xf32>
    %157 = vector.shape_cast %150 : vector<4x32xf32> to vector<4x2x16xf32>
    %158 = arith.truncf %157 : vector<4x2x16xf32> to vector<4x2x16xbf16>
    %159 = vector.shape_cast %153 : vector<8x32xf32> to vector<8x2x16xf32>
    %160 = arith.truncf %159 : vector<8x2x16xf32> to vector<8x2x16xbf16>
    %161 = vector.shape_cast %156 : vector<8x32xf32> to vector<8x2x16xf32>
    %162 = arith.truncf %161 : vector<8x2x16xf32> to vector<8x2x16xbf16>
    "tpu.trace_start"() <{level = 10 : i32, message = "qhd,khd->hqk"}> : () -> ()
    %cst_55 = arith.constant dense<0.000000e+00> : vector<2x4x8xf32>
    %163 = tpu.matmul %158, %160, %cst_55 {dimension_numbers = #tpu.dot_dimension_numbers<[2], [2], [0], [0], [0, 1, 0, 0, 1, 0], [1], [1]>} : vector<4x2x16xbf16>, vector<8x2x16xbf16>, vector<2x4x8xf32> -> vector<2x4x8xf32>
    "tpu.trace_stop"() : () -> ()
    %cst_56 = arith.constant dense<0xFF800000> : vector<2x4xf32>
    %164 = vector.multi_reduction <maximumf>, %163, %cst_56 [2] : vector<2x4x8xf32> to vector<2x4xf32>
    %165 = vector.shape_cast %164 : vector<2x4xf32> to vector<2x4x1xf32>
    %166 = vector.broadcast %165 : vector<2x4x1xf32> to vector<2x4x8xf32>
    %167 = arith.subf %163, %166 : vector<2x4x8xf32>
    %168 = math.exp %167 : vector<2x4x8xf32>
    %cst_57 = arith.constant dense<0.000000e+00> : vector<2x4xf32>
    %169 = vector.multi_reduction <add>, %168, %cst_57 [2] : vector<2x4x8xf32> to vector<2x4xf32>
    %170 = vector.shape_cast %169 : vector<2x4xf32> to vector<2x4x1xf32>
    %171 = vector.broadcast %170 : vector<2x4x1xf32> to vector<2x4x8xf32>
    %172 = arith.divf %168, %171 : vector<2x4x8xf32>
    %173 = arith.truncf %172 : vector<2x4x8xf32> to vector<2x4x8xbf16>
    "tpu.trace_start"() <{level = 10 : i32, message = "hqk,khd->qhd"}> : () -> ()
    %cst_58 = arith.constant dense<0.000000e+00> : vector<2x16x4xf32>
    %174 = tpu.matmul %162, %173, %cst_58 {dimension_numbers = #tpu.dot_dimension_numbers<[0], [2], [2], [1], [0, 1, 0, 2, 1, 1], [1], [0]>} : vector<8x2x16xbf16>, vector<2x4x8xbf16>, vector<2x16x4xf32> -> vector<2x16x4xf32>
    %175 = tpu.transpose %174, [2, 0, 1] : vector<2x16x4xf32> -> vector<4x2x16xf32>
    "tpu.trace_stop"() : () -> ()
    %176 = vector.shape_cast %175 : vector<4x2x16xf32> to vector<4x32xf32>
    %177 = arith.truncf %176 : vector<4x32xf32> to vector<4x32xbf16>
    %178 = vector.extract_strided_slice %5 {offsets = [2, 0, 0], sizes = [1, 32, 32], strides = [1, 1, 1]} : vector<4x32x32xbf16> to vector<1x32x32xbf16>
    %179 = vector.shape_cast %178 : vector<1x32x32xbf16> to vector<32x32xbf16>
    %cst_59 = arith.constant dense<0.000000e+00> : vector<4x32xf32>
    %180 = tpu.matmul %177, %179, %cst_59 {dimension_numbers = #tpu.dot_dimension_numbers<[1], [0], [0], [1], [0, 0, 1, 1], [], []>} : vector<4x32xbf16>, vector<32x32xbf16>, vector<4x32xf32> -> vector<4x32xf32>
    %181 = arith.addf %180, %143 : vector<4x32xf32>
    %cst_60 = arith.constant dense<0.000000e+00> : vector<4xf32>
    %182 = vector.multi_reduction <add>, %181, %cst_60 [1] : vector<4x32xf32> to vector<4xf32>
    %183 = vector.shape_cast %182 : vector<4xf32> to vector<4x1xf32>
    %cst_61 = arith.constant 3.200000e+01 : f32
    %184 = vector.broadcast %cst_61 : f32 to vector<4x1xf32>
    %185 = arith.divf %183, %184 : vector<4x1xf32>
    %186 = vector.broadcast %185 : vector<4x1xf32> to vector<4x32xf32>
    %187 = arith.subf %181, %186 : vector<4x32xf32>
    %188 = arith.mulf %187, %187 : vector<4x32xf32>
    %cst_62 = arith.constant dense<0.000000e+00> : vector<4xf32>
    %189 = vector.multi_reduction <add>, %188, %cst_62 [1] : vector<4x32xf32> to vector<4xf32>
    %190 = vector.shape_cast %189 : vector<4xf32> to vector<4x1xf32>
    %cst_63 = arith.constant 3.200000e+01 : f32
    %191 = vector.broadcast %cst_63 : f32 to vector<4x1xf32>
    %192 = arith.divf %190, %191 : vector<4x1xf32>
    %193 = vector.broadcast %185 : vector<4x1xf32> to vector<4x32xf32>
    %194 = arith.subf %181, %193 : vector<4x32xf32>
    %cst_64 = arith.constant 9.99999997E-7 : f32
    %195 = vector.broadcast %cst_64 : f32 to vector<4x1xf32>
    %196 = arith.addf %192, %195 : vector<4x1xf32>
    %197 = math.rsqrt %196 : vector<4x1xf32>
    %198 = vector.broadcast %197 : vector<4x1xf32> to vector<4x32xf32>
    %199 = arith.mulf %194, %198 : vector<4x32xf32>
    %200 = vector.extract_strided_slice %6 {offsets = [2, 0, 0], sizes = [1, 1, 32], strides = [1, 1, 1]} : vector<4x1x32xf32> to vector<1x1x32xf32>
    %201 = vector.shape_cast %200 : vector<1x1x32xf32> to vector<1x32xf32>
    %202 = vector.broadcast %201 : vector<1x32xf32> to vector<4x32xf32>
    %203 = arith.mulf %199, %202 : vector<4x32xf32>
    %204 = vector.extract_strided_slice %7 {offsets = [2, 0, 0], sizes = [1, 1, 32], strides = [1, 1, 1]} : vector<4x1x32xf32> to vector<1x1x32xf32>
    %205 = vector.shape_cast %204 : vector<1x1x32xf32> to vector<1x32xf32>
    %206 = vector.broadcast %205 : vector<1x32xf32> to vector<4x32xf32>
    %207 = arith.addf %203, %206 : vector<4x32xf32>
    %208 = arith.truncf %139 : vector<16x32xf32> to vector<16x32xbf16>
    %209 = arith.truncf %207 : vector<4x32xf32> to vector<4x32xbf16>
    %210 = vector.extract_strided_slice %2 {offsets = [3, 0, 0], sizes = [1, 32, 32], strides = [1, 1, 1]} : vector<4x32x32xbf16> to vector<1x32x32xbf16>
    %211 = vector.shape_cast %210 : vector<1x32x32xbf16> to vector<32x32xbf16>
    %cst_65 = arith.constant dense<0.000000e+00> : vector<16x32xf32>
    %212 = tpu.matmul %208, %211, %cst_65 {dimension_numbers = #tpu.dot_dimension_numbers<[1], [0], [0], [1], [0, 0, 1, 1], [], []>} : vector<16x32xbf16>, vector<32x32xbf16>, vector<16x32xf32> -> vector<16x32xf32>
    %cst_66 = arith.constant 2.500000e-01 : f32
    %213 = vector.broadcast %cst_66 : f32 to vector<16x32xf32>
    %214 = arith.mulf %212, %213 : vector<16x32xf32>
    %215 = vector.extract_strided_slice %3 {offsets = [3, 0, 0], sizes = [1, 32, 32], strides = [1, 1, 1]} : vector<4x32x32xbf16> to vector<1x32x32xbf16>
    %216 = vector.shape_cast %215 : vector<1x32x32xbf16> to vector<32x32xbf16>
    %cst_67 = arith.constant dense<0.000000e+00> : vector<4x32xf32>
    %217 = tpu.matmul %209, %216, %cst_67 {dimension_numbers = #tpu.dot_dimension_numbers<[1], [0], [0], [1], [0, 0, 1, 1], [], []>} : vector<4x32xbf16>, vector<32x32xbf16>, vector<4x32xf32> -> vector<4x32xf32>
    %218 = vector.extract_strided_slice %4 {offsets = [3, 0, 0], sizes = [1, 32, 32], strides = [1, 1, 1]} : vector<4x32x32xbf16> to vector<1x32x32xbf16>
    %219 = vector.shape_cast %218 : vector<1x32x32xbf16> to vector<32x32xbf16>
    %cst_68 = arith.constant dense<0.000000e+00> : vector<4x32xf32>
    %220 = tpu.matmul %209, %219, %cst_68 {dimension_numbers = #tpu.dot_dimension_numbers<[1], [0], [0], [1], [0, 0, 1, 1], [], []>} : vector<4x32xbf16>, vector<32x32xbf16>, vector<4x32xf32> -> vector<4x32xf32>
    %221 = vector.shape_cast %214 : vector<16x32xf32> to vector<16x2x16xf32>
    %222 = arith.truncf %221 : vector<16x2x16xf32> to vector<16x2x16xbf16>
    %223 = vector.shape_cast %217 : vector<4x32xf32> to vector<4x2x16xf32>
    %224 = arith.truncf %223 : vector<4x2x16xf32> to vector<4x2x16xbf16>
    %225 = vector.shape_cast %220 : vector<4x32xf32> to vector<4x2x16xf32>
    %226 = arith.truncf %225 : vector<4x2x16xf32> to vector<4x2x16xbf16>
    "tpu.trace_start"() <{level = 10 : i32, message = "qhd,khd->hqk"}> : () -> ()
    %cst_69 = arith.constant dense<0.000000e+00> : vector<2x16x4xf32>
    %227 = tpu.matmul %222, %224, %cst_69 {dimension_numbers = #tpu.dot_dimension_numbers<[2], [2], [0], [0], [0, 1, 0, 0, 1, 0], [1], [1]>} : vector<16x2x16xbf16>, vector<4x2x16xbf16>, vector<2x16x4xf32> -> vector<2x16x4xf32>
    "tpu.trace_stop"() : () -> ()
    %cst_70 = arith.constant dense<0xFF800000> : vector<2x16xf32>
    %228 = vector.multi_reduction <maximumf>, %227, %cst_70 [2] : vector<2x16x4xf32> to vector<2x16xf32>
    %229 = vector.shape_cast %228 : vector<2x16xf32> to vector<2x16x1xf32>
    %230 = vector.broadcast %229 : vector<2x16x1xf32> to vector<2x16x4xf32>
    %231 = arith.subf %227, %230 : vector<2x16x4xf32>
    %232 = math.exp %231 : vector<2x16x4xf32>
    %cst_71 = arith.constant dense<0.000000e+00> : vector<2x16xf32>
    %233 = vector.multi_reduction <add>, %232, %cst_71 [2] : vector<2x16x4xf32> to vector<2x16xf32>
    %234 = vector.shape_cast %233 : vector<2x16xf32> to vector<2x16x1xf32>
    %235 = vector.broadcast %234 : vector<2x16x1xf32> to vector<2x16x4xf32>
    %236 = arith.divf %232, %235 : vector<2x16x4xf32>
    %237 = arith.truncf %236 : vector<2x16x4xf32> to vector<2x16x4xbf16>
    "tpu.trace_start"() <{level = 10 : i32, message = "hqk,khd->qhd"}> : () -> ()
    %cst_72 = arith.constant dense<0.000000e+00> : vector<2x16x16xf32>
    %238 = tpu.matmul %226, %237, %cst_72 {dimension_numbers = #tpu.dot_dimension_numbers<[0], [2], [2], [1], [0, 1, 0, 2, 1, 1], [1], [0]>} : vector<4x2x16xbf16>, vector<2x16x4xbf16>, vector<2x16x16xf32> -> vector<2x16x16xf32>
    %239 = tpu.transpose %238, [2, 0, 1] : vector<2x16x16xf32> -> vector<16x2x16xf32>
    "tpu.trace_stop"() : () -> ()
    %240 = vector.shape_cast %239 : vector<16x2x16xf32> to vector<16x32xf32>
    %241 = arith.truncf %240 : vector<16x32xf32> to vector<16x32xbf16>
    %242 = vector.extract_strided_slice %5 {offsets = [3, 0, 0], sizes = [1, 32, 32], strides = [1, 1, 1]} : vector<4x32x32xbf16> to vector<1x32x32xbf16>
    %243 = vector.shape_cast %242 : vector<1x32x32xbf16> to vector<32x32xbf16>
    %cst_73 = arith.constant dense<0.000000e+00> : vector<16x32xf32>
    %244 = tpu.matmul %241, %243, %cst_73 {dimension_numbers = #tpu.dot_dimension_numbers<[1], [0], [0], [1], [0, 0, 1, 1], [], []>} : vector<16x32xbf16>, vector<32x32xbf16>, vector<16x32xf32> -> vector<16x32xf32>
    %245 = arith.addf %244, %139 : vector<16x32xf32>
    %cst_74 = arith.constant dense<0.000000e+00> : vector<16xf32>
    %246 = vector.multi_reduction <add>, %245, %cst_74 [1] : vector<16x32xf32> to vector<16xf32>
    %247 = vector.shape_cast %246 : vector<16xf32> to vector<16x1xf32>
    %cst_75 = arith.constant 3.200000e+01 : f32
    %248 = vector.broadcast %cst_75 : f32 to vector<16x1xf32>
    %249 = arith.divf %247, %248 : vector<16x1xf32>
    %250 = vector.broadcast %249 : vector<16x1xf32> to vector<16x32xf32>
    %251 = arith.subf %245, %250 : vector<16x32xf32>
    %252 = arith.mulf %251, %251 : vector<16x32xf32>
    %cst_76 = arith.constant dense<0.000000e+00> : vector<16xf32>
    %253 = vector.multi_reduction <add>, %252, %cst_76 [1] : vector<16x32xf32> to vector<16xf32>
    %254 = vector.shape_cast %253 : vector<16xf32> to vector<16x1xf32>
    %cst_77 = arith.constant 3.200000e+01 : f32
    %255 = vector.broadcast %cst_77 : f32 to vector<16x1xf32>
    %256 = arith.divf %254, %255 : vector<16x1xf32>
    %257 = vector.broadcast %249 : vector<16x1xf32> to vector<16x32xf32>
    %258 = arith.subf %245, %257 : vector<16x32xf32>
    %cst_78 = arith.constant 9.99999997E-7 : f32
    %259 = vector.broadcast %cst_78 : f32 to vector<16x1xf32>
    %260 = arith.addf %256, %259 : vector<16x1xf32>
    %261 = math.rsqrt %260 : vector<16x1xf32>
    %262 = vector.broadcast %261 : vector<16x1xf32> to vector<16x32xf32>
    %263 = arith.mulf %258, %262 : vector<16x32xf32>
    %264 = vector.extract_strided_slice %6 {offsets = [3, 0, 0], sizes = [1, 1, 32], strides = [1, 1, 1]} : vector<4x1x32xf32> to vector<1x1x32xf32>
    %265 = vector.shape_cast %264 : vector<1x1x32xf32> to vector<1x32xf32>
    %266 = vector.broadcast %265 : vector<1x32xf32> to vector<16x32xf32>
    %267 = arith.mulf %263, %266 : vector<16x32xf32>
    %268 = vector.extract_strided_slice %7 {offsets = [3, 0, 0], sizes = [1, 1, 32], strides = [1, 1, 1]} : vector<4x1x32xf32> to vector<1x1x32xf32>
    %269 = vector.shape_cast %268 : vector<1x1x32xf32> to vector<1x32xf32>
    %270 = vector.broadcast %269 : vector<1x32xf32> to vector<16x32xf32>
    %271 = arith.addf %267, %270 : vector<16x32xf32>
    %c0_79 = arith.constant 0 : index
    %c0_80 = arith.constant 0 : index
    %c0_81 = arith.constant 0 : index
    %272 = vector.load %arg8[%c0_79, %c0_80, %c0_81] : memref<1x16x32xf32, #tpu.memory_space<vmem>>, vector<1x16x32xf32>
    %273 = vector.shape_cast %272 : vector<1x16x32xf32> to vector<16x32xf32>
    %274 = vector.shape_cast %271 : vector<16x32xf32> to vector<1x16x32xf32>
    tpu.vector_store %arg8[%c0_79, %c0_80, %c0_81], %274 {strides = array<i32>} : memref<1x16x32xf32, #tpu.memory_space<vmem>>, vector<1x16x32xf32>,
    return
  }
  func.func @transform_0(%arg0: i32) -> (i32, i32, i32) {
    %c0_i32 = arith.constant 0 : i32
    %c0_i32_0 = arith.constant 0 : i32
    %c0_i32_1 = arith.constant 0 : i32
    return %arg0, %c0_i32, %c0_i32_0 : i32, i32, i32
  }
  func.func @transform_1(%arg0: i32) -> (i32, i32, i32) {
    %c0_i32 = arith.constant 0 : i32
    %c0_i32_0 = arith.constant 0 : i32
    %c0_i32_1 = arith.constant 0 : i32
    %c0_i32_2 = arith.constant 0 : i32
    return %c0_i32, %c0_i32_0, %c0_i32_1 : i32, i32, i32
  }
  func.func @transform_2(%arg0: i32) -> (i32, i32, i32) {
    %c0_i32 = arith.constant 0 : i32
    %c0_i32_0 = arith.constant 0 : i32
    %c0_i32_1 = arith.constant 0 : i32
    %c0_i32_2 = arith.constant 0 : i32
    return %c0_i32, %c0_i32_0, %c0_i32_1 : i32, i32, i32
  }
  func.func @transform_3(%arg0: i32) -> (i32, i32, i32) {
    %c0_i32 = arith.constant 0 : i32
    %c0_i32_0 = arith.constant 0 : i32
    %c0_i32_1 = arith.constant 0 : i32
    %c0_i32_2 = arith.constant 0 : i32
    return %c0_i32, %c0_i32_0, %c0_i32_1 : i32, i32, i32
  }
  func.func @transform_4(%arg0: i32) -> (i32, i32, i32) {
    %c0_i32 = arith.constant 0 : i32
    %c0_i32_0 = arith.constant 0 : i32
    %c0_i32_1 = arith.constant 0 : i32
    %c0_i32_2 = arith.constant 0 : i32
    return %c0_i32, %c0_i32_0, %c0_i32_1 : i32, i32, i32
  }
  func.func @transform_5(%arg0: i32) -> (i32, i32, i32) {
    %c0_i32 = arith.constant 0 : i32
    %c0_i32_0 = arith.constant 0 : i32
    %c0_i32_1 = arith.constant 0 : i32
    %c0_i32_2 = arith.constant 0 : i32
    return %c0_i32, %c0_i32_0, %c0_i32_1 : i32, i32, i32
  }
  func.func @transform_6(%arg0: i32) -> (i32, i32, i32) {
    %c0_i32 = arith.constant 0 : i32
    %c0_i32_0 = arith.constant 0 : i32
    %c0_i32_1 = arith.constant 0 : i32
    %c0_i32_2 = arith.constant 0 : i32
    return %c0_i32, %c0_i32_0, %c0_i32_1 : i32, i32, i32
  }
  func.func @transform_7(%arg0: i32) -> (i32, i32, i32) {
    %c0_i32 = arith.constant 0 : i32
    %c0_i32_0 = arith.constant 0 : i32
    %c0_i32_1 = arith.constant 0 : i32
    return %arg0, %c0_i32, %c0_i32_0 : i32, i32, i32
  }
}

</mosaic_0001>

<bundles_post_ra>
// kernel: tpu_custom_call.1
= control target key start
LH: loop header
LB: loop body
LE: loop exit
PB: predicated region body
PF: predicated region fallthrough
CT: control target
= control target key end

     0   :  { %s10996_s0 = inlined_call_operand.hbm [shape: f32[2,16,32], index: 0, kind: input, shape index: {}]   ;;  %s10997_s1 = inlined_call_operand.hbm [shape: bf16[4,32,32], index: 1, kind: input, shape index: {}]   ;;  %s10998_s2 = inlined_call_operand.hbm [shape: bf16[4,32,32], index: 2, kind: input, shape index: {}]   ;;  %s10999_s3 = inlined_call_operand.hbm [shape: bf16[4,32,32], index: 3, kind: input, shape index: {}]   ;;  %s11000_s4 = inlined_call_operand.hbm [shape: bf16[4,32,32], index: 4, kind: input, shape index: {}]   ;;  %s11001_s5 = inlined_call_operand.vmem [shape: f32[4,1,32], index: 5, kind: input, shape index: {}]   ;;  %s11002_s6 = inlined_call_operand.hbm [shape: f32[4,1,32], index: 6, kind: input, shape index: {}]   ;;  %s11003_s7 = inlined_call_operand.hbm [shape: f32[2,16,32], index: 7, kind: output, shape index: {}]  }
   0x1   :  { %11010 = sst [smem:[#allocation19_spill]] %s10997_s1 }
   0x2   :  { %11011 = sst [smem:[#allocation20_spill]] %s10998_s2 }
   0x3   :  { %12 = vsyncpa [#allocation3], 0 }
   0x4   :  { %14 = vsyncpa [#allocation3 + $0x1], 0 }
   0x5   :  { %15 = vsyncpa [#allocation6], 0 }
   0x6   :  { %16 = vsyncpa [#allocation9], 0 }
   0x7   :  { %17 = vsyncpa [#allocation12], 0 }
   0x8   :  { %18 = vsyncpa [#allocation4], 0 }
   0x9   :  { %20 = vsyncpa [#allocation4 + $0x1], 0  ;;  %s9386_s24 = smov 0   ;;  %s9388_s25 = smov 0  }
   0xa   :  { %s9390_s26 = smov 0   ;;  %s9392_s27 = smov 0  }
   0xb LB: > { %s11012_s1 = sld [smem:[#allocation19_spill]]  ;;  %s9410_s8 = sadd.s32 4294967295, %s9325_s27   ;;  %s9325_s27 = sphi %s9392_s27, %s11038_s27   ;;  %s9321_s26 = sphi %s9390_s26, %s11037_s26   ;;  %s9317_s25 = sphi %s9388_s25, %s11036_s25   ;;  %s9313_s24 = sphi %s9386_s24, %s11035_s24  }
   0xc   : > { %p8324_p0 = scmp.ge.s32.totalorder %s9325_s27, 1  ;;  %p47_p1 = scmp.eq.s32.totalorder %s9410_s8, 0 }
   0xd   : > { %p209_p2 = scmp.lt.s32.totalorder %s9325_s27, 3  ;;  %s9327_s10 = smov [#allocation5]  }
   0xe   : > { %s222_s11 = sshll.u32 %s9327_s10, 4  ;;  %s248_s14 = sshll.u32 %s10999_s3, 4  ;;  %s223_s11 = int_to_ptr.vmem [resolvable:$true] %s222_s11  ;;  %s249_s14 = int_to_ptr.hbm [resolvable:$true] %s248_s14 }
   0xf   : > { %p9415_p3 = pnand %p8324_p0, %p209_p2  ;;  %s11015_s2 = sld [smem:[#allocation20_spill]] }
  0x10   : > { %s9328_s19 = smov [#allocation8]   ;;  %s9329_s21 = smov 64  }
  0x11   : > { %s220_s30 = sshll.u32 %s11012_s1, 4  ;;  %p8565_p4 = pneg %p9415_p3  ;;  %s221_s30 = int_to_ptr.hbm [resolvable:$true] %s220_s30 }
  0x12   : > { %s250_s20 = sshll.u32 %s9328_s19, 4  ;;  %s9330_s22 = smov 4   ;;  %s251_s20 = int_to_ptr.vmem [resolvable:$true] %s250_s20 }
  0x13   : > { %p9427_p6 = pnand %p8565_p4, %p47_p1  ;;  %s262_s29 = sshll.u32 %s11000_s4, 4  ;;  %s263_s29 = int_to_ptr.hbm [resolvable:$true] %s262_s29 }
  0x14   : > { %s9331_s10 = smov [#allocation7]   ;;  %s279_s16 = sshll.u32 %s11002_s6, 4  ;;  %s280_s16 = int_to_ptr.hbm [resolvable:$true] %s279_s16 }
  0x15   : > { %s234_s18 = sshll.u32 %s11015_s2, 4  ;;  %s236_s12 = sshll.u32 %s9331_s10, 4  ;;  %s235_s18 = int_to_ptr.hbm [resolvable:$true] %s234_s18  ;;  %s237_s12 = int_to_ptr.vmem [resolvable:$true] %s236_s12 }
  0x16   : > { %8568 = dma.hbm_to_vmem [thread:$0]  (!%p9427_p6), %s221_s30, 1024, %s223_s11, [#allocation6], %s9329_s21, %s9329_s21, %s9330_s22  }
  0x17   : > { %8574 = dma.hbm_to_vmem [thread:$0]  (!%p9427_p6), %s249_s14, 1024, %s251_s20, [#allocation9], %s9329_s21, %s9329_s21, %s9330_s22  }
  0x18   : > { %8571 = dma.hbm_to_vmem [thread:$0]  (!%p9427_p6), %s235_s18, 1024, %s237_s12, [#allocation6], %s9329_s21, %s9329_s21, %s9330_s22  }
  0x19   : > { %s9332_s30 = smov [#allocation10]   ;;  %s9333_s17 = smov [#allocation11]  }
  0x1a   : > { %s264_s11 = sshll.u32 %s9332_s30, 4  ;;  %s281_s18 = sshll.u32 %s9333_s17, 4  ;;  %s265_s11 = int_to_ptr.vmem [resolvable:$true] %s264_s11  ;;  %s282_s18 = int_to_ptr.vmem [resolvable:$true] %s281_s18 }
  0x1b   : > { %8577 = dma.hbm_to_vmem [thread:$0]  (!%p9427_p6), %s263_s29, 1024, %s265_s11, [#allocation9], %s9329_s21, %s9329_s21, %s9330_s22  }
  0x1c   : > { %s9334_s19 = smov 16   ;;  %s9335_s20 = smov 1  }
  0x1d   : > { %8580 = dma.hbm_to_vmem [thread:$0]  (!%p9427_p6), %s280_s16, 64, %s282_s18, [#allocation12], %s9334_s19, %s9334_s19, %s9335_s20  }
  0x1e   : > { %s8323_s23 = sadd.s32 4294967294, %s9325_s27   ;;  %s9452_s28 = sadd.s32 1, %s9325_s27  }
  0x1f   : > { %s33_s10 = sadd.s32 1, %s9321_s26  ;;  %s30_s12 = ssub.s32 %s9325_s27, %s9452_s28 }
  0x20   : > { %p40_p7 = scmp.ne.s32.totalorder %s9321_s26, %s9317_s25  ;;  %p31_p8 = scmp.eq.s32.totalorder %s30_s12, 0 }
  0x21   : > { %p41_p9 = scmp.eq.s32.totalorder %s9325_s27, 0  ;;  %p46_p10 = scmp.ne.s32.totalorder %s9317_s25, %s9313_s24 }
  0x22   : > { %p196_p11 = scmp.eq.s32.totalorder %s9410_s8, 1  ;;  %p202_p2 = scmp.eq.s32.totalorder %s8323_s23, 1 }
  0x23   : > { %s9464_s21 = scalar_select %p31_p8, %s9321_s26, %s33_s10  }
  0x24   : > { %p9466_p12 = por %p41_p9, %p40_p7  ;;  %p9472_p13 = por %p47_p1, %p46_p10 }
  0x25   : > { %p9476_p0 = por %p196_p11, %p40_p7  ;;  %p8594_p4 = scmp.lt.s32.totalorder %s9325_s27, 2 }
  0x26   : > { %s295_s30 = sand.u32 1, %s9321_s26   ;;  %p9482_p6 = por %p202_p2, %p46_p10 }
  0x27   : > { %s8331_s13 = sshll.u32 %s295_s30, 4  ;;  %s8507_s14 = sshll.u32 %s9325_s27, 4 }
  0x28   : > { %s304_s18 = scalar_lea.hbm %s10996_s0, %s8507_s14  ;;  %s299_s20 = scalar_lea.vmem [#allocation2], %s8331_s13 }
  0x29   : > { %s305_s19 = sshll.u32 %s304_s18, 4  ;;  %s307_s10 = sshll.u32 %s299_s20, 4  ;;  %s306_s19 = int_to_ptr.hbm [resolvable:$true] %s305_s19  ;;  %s308_s10 = int_to_ptr.vmem [resolvable:$true] %s307_s10 }
  0x2a   : > { %p9492_p7 = pnand %p8594_p4, %p9466_p12  ;;  %s296_s12 = scalar_lea.sflag [#allocation3], %s295_s30 }
  0x2b   : > { %s9217_s1 = sshra.s32 %s306_s19, 4  ;;  %s9224_s16 = scalar_lea.hbm %s10996_s0, 32  ;;  %s9218_s1 = int_to_ptr.hbm [resolvable:$true] %s9217_s1 }
  0x2c   : > { %s9219_s2 = scalar_lea.hbm %s9218_s1, 16  ;;  %p9221_p9 = pneg %p9492_p7 }
  0x2d   : > { %p9220_p8 = scmp.ne.s32.totalorder %s9218_s1, %s9219_s2  ;;  %p9225_p12 = scmp.lt.s32.totalorder %s9218_s1, %s10996_s0 }
  0x2e   : > { %p9226_p2 = scmp.lt.s32.totalorder %s9224_s16, %s9219_s2 }
  0x2f   : > { %p9222_p10 = pnand %p9221_p9, %p9220_p8 }
  0x30   : > { %p9227_p4 = por %p9226_p2, %p9225_p12 }
  0x31   : > { %p9223_p11 = pneg %p9222_p10 }
  0x33   : > { %p9228_p5 = pnand %p9227_p4, %p9223_p11 }
  0x35   : > { %9231 = shalt.err (!%p9228_p5)
}
  0x36   : > { %s9336_s30 = smov 128   ;;  %s9337_s18 = smov 8  }
  0x37   : > { %8584 = dma.hbm_to_vmem [thread:$0]  (!%p9492_p7), %s306_s19, 256, %s308_s10, %s296_s12, %s9336_s30, %s9336_s30, %s9337_s18  }
  0x38   : > { %319 = sbr.rel (%p9415_p3) target bundleno = 8899 (0x22c3), region = 48  ;;  %s9509_s20 = sand.u32 (!%p9415_p3), 1, %s9317_s25  }
  0x39   : > { %s8335_s1 = sshll.u32 (!%p9415_p3), %s9509_s20, 4  ;;  %s322_s2 = scalar_lea.sflag (!%p9415_p3), [#allocation3], %s9509_s20 }
  0x3a   : > { %s9515_s14 = scalar_lea.vmem (!%p9415_p3), [#allocation2], %s8335_s1 }
  0x3d   : > { %9292 = dma.done.wait (%p9472_p13), %s322_s2, 256  }
  0x3e   : > { %9294 = vsyncadd (%p9472_p13), %s322_s2, 4294967040 }
  0x3f   : > { %9296 = dma.done.wait (%p47_p1), [#allocation6], 2048  }
  0x40   : > { %9298 = vsyncadd (%p47_p1), [#allocation6], 4294965248 }
  0x41   : > { %9300 = dma.done.wait (%p47_p1), [#allocation9], 2048  }
  0x42   : > { %9302 = vsyncadd (%p47_p1), [#allocation9], 4294965248 }
  0x43   : > { %9304 = dma.done.wait (%p47_p1), [#allocation12], 64  }
  0x44   : > { %9306 = vsyncadd (%p47_p1), [#allocation12], 4294967232  ;;  %v8509_v0 = vld [vmem:[#allocation5 + $0x8] sm:$0xff]  ;;  %v8508_v2 = vld [vmem:[#allocation5] sm:$0xff]  ;;  %vm471_vm0 = vcmask 254976   ;;  %vm528_vm1 = vcmask 261120  }
  0x45   : > { %v8517_v1 = vld [vmem:[#allocation7 + $0x8] sm:$0xff]  ;;  %v8516_v3 = vld [vmem:[#allocation7] sm:$0xff]  ;;  %589 = vmatpush.bf16.msra.mxu0 %v8509_v0  ;;  %vm561_vm2 = vcmask 1041409   ;;  %vm563_vm3 = vcmask 1042434   ;;  %vm565_vm4 = vcmask 1043459   ;;  %vm616_vm5 = vcmask 1044484  }
  0x46   : > { %v383_v4 = vld [vmem:[%s9515_s14] sm:$0xff]  ;;  %v384_v5 = vld [vmem:[%s9515_s14 + $0x8] sm:$0xff]  ;;  %646 = vmatpush.bf16.msra.mxu1 %v8517_v1  ;;  %vm11009_vm6 = vcmask 1045509   ;;  %vm11008_vm7 = vcmask 1046534   ;;  %vm11007_vm8 = vcmask 1047559   ;;  %s9338_s9 = smov 112  }
  0x47   : > { %v459_v6 = vrot.slane %v383_v4, 2  ;;  %v460_v7 = vrot.slane %v383_v4, 4  ;;  %v461_v8 = vrot.slane %v383_v4, 6  ;;  %v462_v9 = vrot.slane %v384_v5, 2  ;;  %s9341_s15 = smov 16   ;;  %s8540_s30 = sshll.u32 %s9410_s8, 4 }
  0x48   : > { %v463_v10 = vrot.slane %v384_v5, 4  ;;  %v464_v11 = vrot.slane %v384_v5, 6  ;;  %v472_v12 = vsel %vm471_vm0, %v383_v4, -inf  ;;  %v500_v13 = vsel %vm471_vm0, %v384_v5, -inf  ;;  %s8187_s19 = scalar_lea.sflag [#allocation4], %s9509_s20  ;;  %s9267_s13 = scalar_lea.hbm %s11003_s7, 32 }
  0x49   : > { %v473_v14 = vrot.slane %v472_v12, 4  ;;  %v479_v15 = vsel %vm471_vm0, %v459_v6, -inf  ;;  %v486_v16 = vsel %vm471_vm0, %v460_v7, -inf  ;;  %v493_v17 = vsel %vm471_vm0, %v461_v8, -inf  ;;  %590 = vmatpush.bf16.msra.mxu0 %v8508_v2 }
  0x4a   : > { %v480_v18 = vrot.slane %v479_v15, 4  ;;  %v487_v19 = vrot.slane %v486_v16, 4  ;;  %v494_v20 = vrot.slane %v493_v17, 4  ;;  %v501_v21 = vrot.slane %v500_v13, 4  ;;  %647 = vmatpush.bf16.msra.mxu1 %v8516_v3 }
  0x4b   : > { %v474_v22 = vmax.f32 %v472_v12, %v473_v14  ;;  %v507_v23 = vsel %vm471_vm0, %v462_v9, -inf  ;;  %v514_v24 = vsel %vm471_vm0, %v463_v10, -inf  ;;  %v521_v25 = vsel %vm471_vm0, %v464_v11, -inf }
  0x4c   : > { %v481_v26 = vmax.f32 %v479_v15, %v480_v18  ;;  %v488_v27 = vmax.f32 %v486_v16, %v487_v19  ;;  %v495_v28 = vmax.f32 %v493_v17, %v494_v20  ;;  %v502_v29 = vmax.f32 %v500_v13, %v501_v21 }
  0x4d   : > { %v475_v30 = vrot.slane %v474_v22, 2  ;;  %v508_v31 = vrot.slane %v507_v23, 4  ;;  %v515_v32 = vrot.slane %v514_v24, 4  ;;  %v522_v33 = vrot.slane %v521_v25, 4 }
  0x4e   : > { %v482_v34 = vrot.slane %v481_v26, 2  ;;  %v489_v35 = vrot.slane %v488_v27, 2  ;;  %v496_v36 = vrot.slane %v495_v28, 2  ;;  %v503_v37 = vrot.slane %v502_v29, 2 }
  0x4f   : > { %v476_v38 = vmax.f32 %v474_v22, %v475_v30  ;;  %v509_v39 = vmax.f32 %v507_v23, %v508_v31  ;;  %v516_v40 = vmax.f32 %v514_v24, %v515_v32  ;;  %v523_v41 = vmax.f32 %v521_v25, %v522_v33 }
  0x50   : > { %v483_v42 = vmax.f32 %v481_v26, %v482_v34  ;;  %v490_v43 = vmax.f32 %v488_v27, %v489_v35  ;;  %v497_v44 = vmax.f32 %v495_v28, %v496_v36  ;;  %v504_v45 = vmax.f32 %v502_v29, %v503_v37 }
  0x51   : > { %v477_v46 = vrot.slane %v476_v38, 1  ;;  %v510_v47 = vrot.slane %v509_v39, 2  ;;  %v517_v48 = vrot.slane %v516_v40, 2  ;;  %v524_v49 = vrot.slane %v523_v41, 2 }
  0x52   : > { %v484_v50 = vrot.slane %v483_v42, 1  ;;  %v491_v51 = vrot.slane %v490_v43, 1  ;;  %v498_v52 = vrot.slane %v497_v44, 1  ;;  %v505_v53 = vrot.slane %v504_v45, 1 }
  0x53   : > { %v478_v54 = vmax.f32 %v476_v38, %v477_v46  ;;  %v511_v55 = vmax.f32 %v509_v39, %v510_v47  ;;  %v518_v56 = vmax.f32 %v516_v40, %v517_v48  ;;  %v525_v57 = vmax.f32 %v523_v41, %v524_v49 }
  0x54   : > { %v485_v58 = vmax.f32 %v483_v42, %v484_v50  ;;  %v492_v59 = vmax.f32 %v490_v43, %v491_v51  ;;  %v499_v60 = vmax.f32 %v497_v44, %v498_v52  ;;  %v506_v61 = vmax.f32 %v504_v45, %v505_v53 }
  0x55   : > { %v512_v62 = vrot.slane %v511_v55, 1  ;;  %v519_v63 = vrot.slane %v518_v56, 1  ;;  %v526_v0 = vrot.slane %v525_v57, 1  ;;  %v529_v1 = vsel %vm528_vm1, %v478_v54, -inf }
  0x56   : > { %v530_v2 = vsel %vm528_vm1, %v485_v58, -inf  ;;  %v532_v3 = vsel %vm528_vm1, %v492_v59, -inf  ;;  %v533_v4 = vsel %vm528_vm1, %v499_v60, -inf  ;;  %v535_v5 = vsel %vm528_vm1, %v506_v61, -inf }
  0x57   : > { %v513_v6 = vmax.f32 %v511_v55, %v512_v62  ;;  %v520_v7 = vmax.f32 %v518_v56, %v519_v63  ;;  %v527_v8 = vmax.f32 %v525_v57, %v526_v0  ;;  %v9548_v9 = vmax.f32 %v529_v1, %v530_v2 }
  0x58   : > { %v9550_v10 = vmax.f32 %v532_v3, %v533_v4  ;;  %v545_v11 = vpack.c.bf16 %v478_v54, %v478_v54  ;;  %v546_v12 = vpack.c.bf16 %v485_v58, %v485_v58  ;;  %v547_v13 = vpack.c.bf16 %v492_v59, %v492_v59 }
  0x59   : > { %v536_v14 = vsel %vm528_vm1, %v513_v6, -inf  ;;  %v538_v15 = vsel %vm528_vm1, %v520_v7, -inf  ;;  %v539_v16 = vsel %vm528_vm1, %v527_v8, -inf  ;;  %v541_v17 = vpack.c.bf16 %v9548_v9, %v9548_v9 }
  0x5a   : > { %v9557_v18 = vmax.f32 %v535_v5, %v536_v14  ;;  %v9559_v19 = vmax.f32 %v538_v15, %v539_v16  ;;  %v542_v20 = vpack.c.bf16 %v9550_v10, %v9550_v10  ;;  %v605_v21 = vunpack.c.l.b16 %v545_v11 }
  0x5b   : > { %v557_v22 = vunpack.c.l.b16 %v541_v17  ;;  %v606_v23 = vunpack.c.l.b16 %v546_v12  ;;  %v548_v24 = vpack.c.bf16 %v499_v60, %v499_v60  ;;  %v549_v25 = vpack.c.bf16 %v506_v61, %v506_v61 }
  0x5c   : > { %v543_v26 = vpack.c.bf16 %v9557_v18, %v9557_v18  ;;  %v544_v27 = vpack.c.bf16 %v9559_v19, %v9559_v19  ;;  %v558_v28 = vunpack.c.l.b16 %v542_v20  ;;  %v550_v29 = vpack.c.bf16 %v513_v6, %v513_v6 }
  0x5d   : > { %v551_v30 = vpack.c.bf16 %v520_v7, %v520_v7  ;;  %v552_v31 = vpack.c.bf16 %v527_v8, %v527_v8  ;;  %v607_v32 = vunpack.c.l.b16 %v547_v13  ;;  %v608_v33 = vunpack.c.l.b16 %v548_v24 }
  0x5e   : > { %v559_v34 = vunpack.c.l.b16 %v543_v26  ;;  %v560_v35 = vunpack.c.l.b16 %v544_v27  ;;  %v562_v36 = vsel %vm561_vm2, %v558_v28, %v557_v22  ;;  %v609_v37 = vunpack.c.l.b16 %v549_v25 }
  0x5f   : > { %v610_v38 = vunpack.c.l.b16 %v550_v29  ;;  %v613_v39 = vsel %vm561_vm2, %v606_v23, %v605_v21  ;;  %v611_v41 = vunpack.c.l.b16 %v551_v30  ;;  %v612_v44 = vunpack.c.l.b16 %v552_v31 }
  0x60   : > { %v564_v40 = vsel %vm563_vm3, %v559_v34, %v562_v36  ;;  %v614_v42 = vsel %vm563_vm3, %v607_v32, %v613_v39  ;;  %v9339_v58 = vmov 1983009808   ;;  %vm691_vm9 = vcmask 1047556  }
  0x61   : > { %v566_v43 = vsel %vm565_vm4, %v560_v35, %v564_v40  ;;  %v615_v45 = vsel %vm565_vm4, %v608_v33, %v614_v42  ;;  %v682_v59 = vunpack.c.l.s4 %v9339_v58  ;;  %v9340_v62 = vmov 1934713408   ;;  %v8525_v42 = vld [vmem:[#allocation8 + $0x8] sm:$0xff] }
  0x62   : > { %v567_v46 = vpack.c.b16 %v566_v43, %v566_v43  ;;  %v617_v47 = vsel %vm616_vm5, %v609_v37, %v615_v45  ;;  %v696_v63 = vunpack.c.l.s4 %v9340_v62  ;;  %671 = vmatpush.bf16.msra.mxu2 %v8525_v42  ;;  %v8524_v45 = vld [vmem:[#allocation8] sm:$0xff]  ;;  %vm1470_vm10 = vcmask 130048  }
  0x63   : > { %v619_v48 = vsel %vm11009_vm6, %v610_v38, %v617_v47  ;;  %v9586_v60 = vunpack.c.0.s8 %v682_v59  ;;  %vm11004_vm11 = vcmask 60416  }
  0x64   : > { %8350 = vmatmul.msk.bf16.vlgmr.msra.gmra.mxu0 %vm528_vm1, %v567_v46  ;;  %v621_v49 = vsel %vm11008_vm7, %v611_v41, %v619_v48  ;;  %v9594_v5 = vunpack.c.0.s8 %v696_v63 }
  0x65   : > { %v623_v50 = vsel %vm11007_vm8, %v612_v44, %v621_v49 }
  0x66   : > { %v9578_v51 = vpack.c.b16 %v623_v50, %v623_v50  ;;  %672 = vmatpush.bf16.msra.mxu2 %v8524_v45 }
  0x68   : > { %8359 = vmatmul.msk.bf16.vlgmr.msra.gmra.mxu1 %vm528_vm1, %v9578_v51 }
  0x69   : > { %8368 = vmatmul.msk.bf16.vlgmr.msra.gmra.mxu2 %vm528_vm1, %v9578_v51 }
  0xe1   : > { %v592_v52 = vpop.f32.mrf.mxu0 }
  0xe2   : > { %v9582_v53 = vmul.f32 0.25, %v592_v52 }
  0xe5   : > { %v649_v54 = vpop.f32.mrf.mxu1 }
  0xe6   : > { %v8653_v55 = vpack.i.bf16 %v9582_v53, %v649_v54  ;;  %v711_v61 = vrot.slane %v649_v54, 4  ;;  %v716_v1 = vperm.slane %v649_v54, %v9586_v60 }
  0xe8   : > { %8654 = vrot.lane.b32.xlu0 %v8653_v55, %s9338_s9  ;;  %v712_v0 = vsel %vm691_vm9, 0.0, %v711_v61  ;;  %v733_v8 = vrot.slane %v716_v1, 4 }
  0xe9   : > { %v594_v56 = vpop.f32.mrf.mxu0  ;;  %v720_v4 = vperm.slane %v712_v0, %v9586_v60 }
  0xeb   : > { %v745_v15 = vrot.slane %v720_v4, 4 }
  0xed   : > { %v651_v57 = vpop.f32.mrf.mxu1 }
 0x15a   : > { %v9590_v2 = vpop.permute.xlu0 %8654 }
 0x15b   : > { %v8656_v3 = vunpack.i.l.bf16 %v9590_v2 }
 0x15d   : > { %v721_v6 = vrot.slane %v8656_v3, 4  ;;  %v726_v7 = vperm.slane %v8656_v3, %v9586_v60 }
 0x15f   : > { %v722_v11 = vsel %vm691_vm9, 0.0, %v721_v6  ;;  %v731_v12 = vrot.slane %v726_v7, 4  ;;  %v734_v14 = vsel %vm691_vm9, %v726_v7, %v733_v8 }
 0x160   : > { %v730_v13 = vperm.slane %v722_v11, %v9586_v60  ;;  %v742_v16 = vperm.slane %v734_v14, %v9594_v5 }
 0x161   : > { %v732_v17 = vsel %vm691_vm9, %v731_v12, %v716_v1 }
 0x162   : > { %v738_v20 = vperm.slane %v732_v17, %v9594_v5  ;;  %v757_v21 = vrot.slane %v742_v16, 4  ;;  %v746_v22 = vsel %vm691_vm9, %v730_v13, %v745_v15  ;;  %v743_v23 = vrot.slane %v730_v13, 4 }
 0x163   : > { %v754_v25 = vperm.slane %v746_v22, %v9594_v5  ;;  %v765_v27 = vpack.c.bf16 %v742_v16, %v742_v16 }
 0x164   : > { %v755_v24 = vrot.slane %v738_v20, 4  ;;  %v758_v26 = vsel %vm691_vm9, 0.0, %v757_v21  ;;  %v763_v31 = vpack.c.bf16 %v738_v20, %v738_v20  ;;  %v744_v34 = vsel %vm691_vm9, %v743_v23, %v720_v4 }
 0x165   : > { %v766_v28 = vpack.c.bf16 %v758_v26, %v758_v26  ;;  %v761_v30 = vrot.slane %v754_v25, 4  ;;  %v769_v35 = vpack.c.bf16 %v754_v25, %v754_v25  ;;  %v750_v37 = vperm.slane %v744_v34, %v9594_v5 }
 0x166   : > { %v756_v29 = vsel %vm691_vm9, 0.0, %v755_v24 }
 0x167   : > { %v764_v32 = vpack.c.bf16 %v756_v29, %v756_v29  ;;  %8658 = vxpose.binary.xlu1.c.b16.start.end [1/2] (short) (narrow) %v766_v28, %v765_v27, 16  ;;  %v762_v33 = vsel %vm691_vm9, 0.0, %v761_v30  ;;  %v759_v38 = vrot.slane %v750_v37, 4  ;;  %v767_v40 = vpack.c.bf16 %v750_v37, %v750_v37 }
 0x168   : > { %v770_v36 = vpack.c.bf16 %v762_v33, %v762_v33 }
 0x169   : > { %8661 = vxpose.binary.xlu0.c.b16.start.end [1/2] (short) (narrow) %v764_v32, %v763_v31, 16  ;;  %v760_v39 = vsel %vm691_vm9, 0.0, %v759_v38 }
 0x16a   : > { %8664 = vxpose.binary.xlu2.c.b16.start.end [1/2] (short) (narrow) %v770_v36, %v769_v35, 16  ;;  %v768_v41 = vpack.c.bf16 %v760_v39, %v760_v39 }
 0x177   : > { %8667 = vxpose.binary.xlu1.c.b16.start.end [1/2] (short) (narrow) %v768_v41, %v767_v40, 16 }
 0x20b   : > { %v8665_v44 = vpop.trf.xlu2 }
 0x20c   : > { %v1014_v57 = vshrl.u32 %v8665_v44, 16 }
 0x213   : > { %v8659_v43 = vpop.trf.xlu1  ;;  %v8666_v52 = vpop.trf.xlu2 }
 0x214   : > { %v998_v49 = vshrl.u32 %v8659_v43, 16  ;;  %v1015_v58 = vshrl.u32 %v8666_v52, 16  ;;  %v1012_v62 = vpack.i.b16 %v8666_v52, %v8665_v44 }
 0x215   : > { %v8662_v46 = vpop.trf.xlu0 }
 0x216   : > { %v990_v61 = vshrl.u32 %v8662_v46, 16  ;;  %v1016_v1 = vpack.i.b16 %v1015_v58, %v1014_v57  ;;  %v1030_v7 = vrot.slane %v1012_v62, 4 }
 0x218   : > { %v1086_v16 = vrot.slane %v1016_v1, 4 }
 0x21b   : > { %v8660_v47 = vpop.trf.xlu1 }
 0x21c   : > { %v999_v48 = vshrl.u32 %v8660_v47, 16  ;;  %v996_v50 = vpack.i.b16 %v8660_v47, %v8659_v43 }
 0x21d   : > { %v8663_v55 = vpop.trf.xlu0 }
 0x21e   : > { %v1000_v54 = vpack.i.b16 %v999_v48, %v998_v49  ;;  %v1032_v59 = vrot.slane %v996_v50, 4  ;;  %v991_v0 = vshrl.u32 %v8663_v55, 16  ;;  %v988_v4 = vpack.i.b16 %v8663_v55, %v8662_v46 }
 0x21f   : > { %v1031_v26 = vsel %vm691_vm9, %v1030_v7, %v996_v50 }
 0x220   : > { %v1088_v63 = vrot.slane %v1000_v54, 4  ;;  %v1033_v3 = vsel %vm691_vm9, %v1012_v62, %v1032_v59  ;;  %v992_v6 = vpack.i.b16 %v991_v0, %v990_v61  ;;  %v1020_v12 = vrot.slane %v988_v4, 4 }
 0x221   : > { %v1041_v8 = vperm.slane %v1033_v3, %v9586_v60  ;;  %v1087_v34 = vsel %vm691_vm9, %v1086_v16, %v1000_v54  ;;  %v1037_v37 = vperm.slane %v1031_v26, %v9586_v60 }
 0x222   : > { %v1089_v51 = vsel %vm691_vm9, %v1016_v1, %v1088_v63  ;;  %v1076_v20 = vrot.slane %v992_v6, 4  ;;  %v1093_v43 = vperm.slane %v1087_v34, %v9586_v60 }
 0x223   : > { %v8668_v56 = vpop.trf.xlu1  ;;  %v1097_v17 = vperm.slane %v1089_v51, %v9586_v60  ;;  %v1054_v25 = vrot.slane %v1041_v8, 4  ;;  %v1042_v1 = vrot.slane %v1037_v37, 4 }
 0x224   : > { %v1006_v13 = vshrl.u32 %v8668_v56, 16  ;;  %v1098_v3 = vrot.slane %v1093_v43, 4 }
 0x225   : > { %v1110_v33 = vrot.slane %v1097_v17, 4 }
 0x22b   : > { %v8669_v11 = vpop.trf.xlu1 }
 0x22c   : > { %v1004_v14 = vpack.i.b16 %v8669_v11, %v8668_v56  ;;  %v1007_v15 = vshrl.u32 %v8669_v11, 16 }
 0x22e   : > { %v1008_v21 = vpack.i.b16 %v1007_v15, %v1006_v13  ;;  %v1018_v22 = vrot.slane %v1004_v14, 4  ;;  %v1021_v23 = vsel %vm691_vm9, %v1004_v14, %v1020_v12 }
 0x22f   : > { %v1029_v24 = vperm.slane %v1021_v23, %v9586_v60 }
 0x230   : > { %v1019_v27 = vsel %vm691_vm9, %v1018_v22, %v988_v4  ;;  %v1074_v28 = vrot.slane %v1008_v21, 4  ;;  %v1077_v29 = vsel %vm691_vm9, %v1008_v21, %v1076_v20  ;;  %v9653_v20 = vpop.f32.mrf.mxu2 }
 0x231   : > { %v1025_v30 = vperm.slane %v1019_v27, %v9586_v60  ;;  %v1055_v31 = vsel %vm691_vm9, %v1054_v25, %v1029_v24  ;;  %v1085_v32 = vperm.slane %v1077_v29, %v9586_v60  ;;  %v1056_v54 = vrot.slane %v1029_v24, 4 }
 0x232   : > { %v1075_v35 = vsel %vm691_vm9, %v1074_v28, %v992_v6  ;;  %v1061_v36 = vperm.slane %v1055_v31, %v9594_v5  ;;  %v8657_v29 = vunpack.i.h.bf16 %v9590_v2 }
 0x233   : > { %v1111_v38 = vsel %vm691_vm9, %v1110_v33, %v1085_v32  ;;  %v1044_v39 = vrot.slane %v1025_v30, 4  ;;  %v1081_v40 = vperm.slane %v1075_v35, %v9586_v60  ;;  %v1112_v55 = vrot.slane %v1085_v32, 4 }
 0x234   : > { %v1117_v41 = vperm.slane %v1111_v38, %v9594_v5  ;;  %v1070_v42 = vrot.slane %v1061_v36, 4  ;;  %v1057_v56 = vsel %vm691_vm9, %v1041_v8, %v1056_v54  ;;  %v1043_v4 = vsel %vm691_vm9, %v1042_v1, %v1025_v30 }
 0x235   : > { %v1045_v44 = vsel %vm691_vm9, %v1037_v37, %v1044_v39  ;;  %v1100_v45 = vrot.slane %v1081_v40, 4  ;;  %v1113_v57 = vsel %vm691_vm9, %v1097_v17, %v1112_v55  ;;  %v1065_v58 = vperm.slane %v1057_v56, %v9594_v5 }
 0x236   : > { %8670 = vxpose.binary.xlu1.c.b16.start.end [1/2] (short) (narrow) %v1117_v41, %v1061_v36, 16  ;;  %v1126_v46 = vrot.slane %v1117_v41, 4  ;;  %v1071_v48 = vsel %vm691_vm9, 0, %v1070_v42  ;;  %v1053_v50 = vperm.slane %v1045_v44, %v9594_v5  ;;  %v1121_v59 = vperm.slane %v1113_v57, %v9594_v5 }
 0x237   : > { %v1101_v47 = vsel %vm691_vm9, %v1093_v43, %v1100_v45  ;;  %v1072_v61 = vrot.slane %v1065_v58, 4  ;;  %v1099_v51 = vsel %vm691_vm9, %v1098_v3, %v1081_v40  ;;  %v1049_v6 = vperm.slane %v1043_v4, %v9594_v5 }
 0x238   : > { %v1127_v49 = vsel %vm691_vm9, 0, %v1126_v46  ;;  %v1109_v52 = vperm.slane %v1101_v47, %v9594_v5  ;;  %v1128_v62 = vrot.slane %v1121_v59, 4  ;;  %v1105_v7 = vperm.slane %v1099_v51, %v9594_v5  ;;  %v676_v21 = vpop.f32.mrf.mxu2 }
 0x239   : > { %8676 = vxpose.binary.xlu2.c.b16.start.end [1/2] (short) (narrow) %v1127_v49, %v1071_v48, 16  ;;  %v1073_v63 = vsel %vm691_vm9, 0, %v1072_v61  ;;  %v1068_v8 = vrot.slane %v1053_v50, 4  ;;  %v1066_v12 = vrot.slane %v1049_v6, 4  ;;  %v684_v30 = vperm.slane %v9582_v53, %v9586_v60 }
 0x23a   : > { %8679 = vxpose.binary.xlu0.c.b16.start.end [1/2] (short) (narrow) %v1109_v52, %v1053_v50, 16  ;;  %v1129_v0 = vsel %vm691_vm9, 0, %v1128_v62  ;;  %v1124_v11 = vrot.slane %v1109_v52, 4  ;;  %v1122_v13 = vrot.slane %v1105_v7, 4  ;;  %v689_v33 = vperm.slane %v8657_v29, %v9586_v60 }
 0x23b   : > { %v1069_v14 = vsel %vm691_vm9, 0, %v1068_v8  ;;  %v1067_v16 = vsel %vm691_vm9, 0, %v1066_v12  ;;  %v693_v34 = vrot.slane %v684_v30, 4 }
 0x23c   : > { %v1125_v15 = vsel %vm691_vm9, 0, %v1124_v11  ;;  %v1123_v17 = vsel %vm691_vm9, 0, %v1122_v13  ;;  %v690_v35 = vrot.slane %v689_v33, 4 }
 0x23d   : > { %v694_v36 = vsel %vm691_vm9, %v689_v33, %v693_v34 }
 0x23e   : > { %v702_v39 = vperm.slane %v694_v36, %v9594_v5  ;;  %v692_v42 = vsel %vm691_vm9, %v690_v35, %v684_v30 }
 0x23f   : > { %v698_v46 = vperm.slane %v692_v42, %v9594_v5 }
 0x240   : > { %v705_v47 = vrot.slane %v702_v39, 4  ;;  %v836_v8 = vpack.c.bf16 %v702_v39, %v702_v39 }
 0x242   : > { %v706_v1 = vsel %vm691_vm9, 0.0, %v705_v47 }
 0x246   : > { %8673 = vxpose.binary.xlu1.c.b16.start.end [1/2] (short) (narrow) %v1121_v59, %v1065_v58, 16 }
 0x249   : > { %8682 = vxpose.binary.xlu2.c.b16.start.end [1/2] (short) (narrow) %v1129_v0, %v1073_v63, 16  ;;  %v703_v0 = vrot.slane %v698_v46, 4 }
 0x256   : > { %8694 = vxpose.binary.xlu1.c.b16.start.end [1/2] (short) (narrow) %v1125_v15, %v1069_v14, 16  ;;  %v845_v14 = vpack.c.bf16 %v706_v1, %v706_v1 }
 0x259   : > { %8685 = vxpose.binary.xlu2.c.b16.start.end [1/2] (short) (narrow) %v1123_v17, %v1067_v16, 16  ;;  %v704_v16 = vsel %vm691_vm9, 0.0, %v703_v0 }
 0x269   : > { %8688 = vxpose.binary.xlu2.c.b16.start.end [1/2] (short) (narrow) %v1105_v7, %v1049_v6, 16 }
 0x2a8   : > { %772 = vrot.lane.b32.xlu0 %v9653_v20, %s9338_s9 }
 0x2da   : > { %v8677_v22 = vpop.trf.xlu2 }
 0x2e2   : > { %v8671_v23 = vpop.trf.xlu1  ;;  %v8678_v24 = vpop.trf.xlu2 }
 0x2e6   : > { %v8680_v38 = vpop.trf.xlu0 }
 0x2e7   : > { %v1386_v52 = vrot.slane %v8680_v38, 4  ;;  %v775_v38 = vrot.slane %v9653_v20, 4 }
 0x2e9   : > { %v776_v47 = vsel %vm691_vm9, 0.0, %v775_v38 }
 0x2ea   : > { %v8672_v25 = vpop.trf.xlu1  ;;  %v8683_v26 = vpop.trf.xlu2 }
 0x2eb   : > { %v1404_v37 = vrot.slane %v8683_v26, 4  ;;  %v837_v26 = vrot.slane %v836_v8, 4 }
 0x2ed   : > { %v1405_v53 = vsel %vm691_vm9, %v1404_v37, %v8677_v22 }
 0x2ee   : > { %v1409_v54 = vperm.slane %v1405_v53, %v9586_v60  ;;  %v8681_v6 = vpop.trf.xlu0 }
 0x2ef   : > { %v1424_v15 = vrot.slane %v8681_v6, 4 }
 0x2f0   : > { %v1416_v3 = vrot.slane %v1409_v54, 4 }
 0x2f2   : > { %v8674_v27 = vpop.trf.xlu1  ;;  %v8684_v28 = vpop.trf.xlu2 }
 0x2f3   : > { %v1398_v2 = vrot.slane %v8674_v27, 4  ;;  %v1442_v43 = vrot.slane %v8684_v28, 4  ;;  %v844_v27 = vpack.c.bf16 %v704_v16, %v704_v16  ;;  %v846_v28 = vrot.slane %v845_v14, 4 }
 0x2f5   : > { %v1399_v48 = vsel %vm691_vm9, %v1398_v2, %v8671_v23  ;;  %v1443_v49 = vsel %vm691_vm9, %v1442_v43, %v8678_v24  ;;  %v847_v37 = vsel %vm691_vm9, %v846_v28, %v844_v27 }
 0x2f6   : > { %v1403_v56 = vperm.slane %v1399_v48, %v9586_v60  ;;  %v1447_v57 = vperm.slane %v1443_v49, %v9586_v60  ;;  %v851_v2 = vperm.slane %v847_v37, %v9594_v5  ;;  %v780_v48 = vperm.slane %v9653_v20, %v9586_v60 }
 0x2f8   : > { %v1454_v11 = vrot.slane %v1447_v57, 4  ;;  %v1417_v13 = vsel %vm691_vm9, %v1416_v3, %v1403_v56  ;;  %v784_v57 = vperm.slane %v776_v47, %v9586_v60  ;;  %v856_v14 = vshrl.u32 %v851_v2, 16 }
 0x2f9   : > { %v1421_v23 = vperm.slane %v1417_v13, %v9594_v5 }
 0x2fa   : > { %v8675_v31 = vpop.trf.xlu1  ;;  %v8686_v32 = vpop.trf.xlu2 }
 0x2fb   : > { %v1436_v45 = vrot.slane %v8675_v31, 4  ;;  %v1422_v34 = vrot.slane %v1421_v23, 4 }
 0x2fd   : > { %v1437_v55 = vsel %vm691_vm9, %v1436_v45, %v8672_v25  ;;  %v835_v25 = vpack.c.bf16 %v698_v46, %v698_v46 }
 0x2fe   : > { %v1441_v4 = vperm.slane %v1437_v55, %v9586_v60 }
 0x2ff   : > { %v839_v36 = vsel %vm691_vm9, %v837_v26, %v835_v25 }
 0x300   : > { %v1455_v22 = vsel %vm691_vm9, %v1454_v11, %v1441_v4  ;;  %v843_v45 = vperm.slane %v839_v36, %v9594_v5 }
 0x301   : > { %v1459_v31 = vperm.slane %v1455_v22, %v9594_v5 }
 0x302   : > { %v8695_v40 = vpop.trf.xlu1  ;;  %v8687_v41 = vpop.trf.xlu2  ;;  %v854_v54 = vpack.i.b16 %v851_v2, %v843_v45 }
 0x303   : > { %v1392_v44 = vrot.slane %v8695_v40, 4 }
 0x305   : > { %v1393_v50 = vsel %vm691_vm9, %v1392_v44, %v8686_v32 }
 0x306   : > { %v1397_v58 = vperm.slane %v1393_v50, %v9586_v60 }
 0x308   : > { %v1410_v12 = vrot.slane %v1397_v58, 4 }
 0x30a   : > { %v8696_v59 = vpop.trf.xlu1  ;;  %v8689_v61 = vpop.trf.xlu2 }
 0x30b   : > { %v1430_v62 = vrot.slane %v8696_v59, 4  ;;  %v1387_v63 = vsel %vm691_vm9, %v1386_v52, %v8689_v61 }
 0x30c   : > { %v1391_v51 = vperm.slane %v1387_v63, %v9586_v60 }
 0x30d   : > { %v1431_v7 = vsel %vm691_vm9, %v1430_v62, %v8687_v41  ;;  %v1460_v41 = vrot.slane %v1459_v31, 4  ;;  %v809_v62 = vrot.slane %v784_v57, 4 }
 0x30e   : > { %v1435_v17 = vperm.slane %v1431_v7, %v9586_v60  ;;  %v1411_v21 = vsel %vm691_vm9, %v1410_v12, %v1391_v51 }
 0x30f   : > { %v1415_v30 = vperm.slane %v1411_v21, %v9594_v5 }
 0x310   : > { %v1448_v32 = vrot.slane %v1435_v17, 4 }
 0x311   : > { %v1423_v39 = vsel %vm691_vm9, %v1422_v34, %v1415_v30  ;;  %v797_v30 = vrot.slane %v780_v48, 4 }
 0x312   : > { %v8690_v24 = vpop.trf.xlu2  ;;  %v1466_v44 = vshrl.u32 %v1423_v39, 16 }
 0x313   : > { %v1425_v29 = vsel %vm691_vm9, %v1424_v15, %v8690_v24  ;;  %v855_v15 = vshrl.u32 %v843_v45, 16 }
 0x314   : > { %v1429_v33 = vperm.slane %v1425_v29, %v9586_v60 }
 0x315   : > { %v857_v17 = vpack.i.b16 %v856_v14, %v855_v15 }
 0x316   : > { %v1449_v35 = vsel %vm691_vm9, %v1448_v32, %v1429_v33 }
 0x317   : > { %v1453_v40 = vperm.slane %v1449_v35, %v9594_v5 }
 0x319   : > { %v1461_v42 = vsel %vm691_vm9, %v1460_v41, %v1453_v40 }
 0x31a   : > { %v1464_v43 = vpack.i.b16 %v1461_v42, %v1423_v39  ;;  %v1467_v53 = vshrl.u32 %v1461_v42, 16  ;;  %v773_v46 = vpop.permute.xlu0 %772 }
 0x31b   : > { %v785_v49 = vrot.slane %v773_v46, 4  ;;  %v790_v50 = vperm.slane %v773_v46, %v9586_v60 }
 0x31c   : > { %1481 = vmatpush.bf16.msra.mxu3 %v1464_v43  ;;  %v1468_v52 = vpack.i.b16 %v1467_v53, %v1466_v44 }
 0x31d   : > { %v786_v55 = vsel %vm691_vm9, 0.0, %v785_v49  ;;  %v795_v56 = vrot.slane %v790_v50, 4  ;;  %v798_v31 = vsel %vm691_vm9, %v790_v50, %v797_v30 }
 0x31e   : > { %v794_v58 = vperm.slane %v786_v55, %v9586_v60  ;;  %v806_v32 = vperm.slane %v798_v31, %v9594_v5 }
 0x31f   : > { %8369 = vmatmul.msk.bf16.vlgmr.msra.gmra.mxu3 %vm1470_vm10, %v854_v54  ;;  %v796_v59 = vsel %vm691_vm9, %v795_v56, %v780_v48 }
 0x320   : > { %1497 = vmatpush.bf16.msrb.mxu3 %v1468_v52  ;;  %v802_v20 = vperm.slane %v796_v59, %v9594_v5  ;;  %v807_v61 = vrot.slane %v794_v58, 4  ;;  %v810_v7 = vsel %vm691_vm9, %v794_v58, %v809_v62  ;;  %v821_v33 = vrot.slane %v806_v32, 4 }
 0x321   : > { %v818_v13 = vperm.slane %v810_v7, %v9594_v5  ;;  %v829_v35 = vpack.c.bf16 %v806_v32, %v806_v32 }
 0x322   : > { %v808_v63 = vsel %vm691_vm9, %v807_v61, %v784_v57  ;;  %v819_v0 = vrot.slane %v802_v20, 4  ;;  %v827_v3 = vpack.c.bf16 %v802_v20, %v802_v20  ;;  %v822_v34 = vsel %vm691_vm9, 0.0, %v821_v33 }
 0x323   : > { %v814_v1 = vperm.slane %v808_v63, %v9594_v5  ;;  %v825_v16 = vrot.slane %v818_v13, 4  ;;  %v833_v22 = vpack.c.bf16 %v818_v13, %v818_v13  ;;  %v830_v36 = vpack.c.bf16 %v822_v34, %v822_v34 }
 0x324   : > { %v820_v4 = vsel %vm691_vm9, 0.0, %v819_v0 }
 0x325   : > { %v823_v51 = vrot.slane %v814_v1, 4  ;;  %v828_v6 = vpack.c.bf16 %v820_v4, %v820_v4  ;;  %v831_v8 = vpack.c.bf16 %v814_v1, %v814_v1  ;;  %v826_v21 = vsel %vm691_vm9, 0.0, %v825_v16 }
 0x326   : > { %v834_v23 = vpack.c.bf16 %v826_v21, %v826_v21 }
 0x327   : > { %v824_v11 = vsel %vm691_vm9, 0.0, %v823_v51  ;;  %8691 = vxpose.binary.xlu0.c.b16.start.end [1/2] (short) (narrow) %v828_v6, %v827_v3, 16 }
 0x328   : > { %v832_v12 = vpack.c.bf16 %v824_v11, %v824_v11 }
 0x32a   : > { %8700 = vxpose.binary.xlu2.c.b16.start.end [1/2] (short) (narrow) %v832_v12, %v831_v8, 16 }
 0x32f   : > { %8370 = vmatmul.msk.bf16.vlgmr.msrb.gmra.mxu3 %vm1470_vm10, %v857_v17 }
 0x337   : > { %8703 = vxpose.binary.xlu0.c.b16.start.end [1/2] (short) (narrow) %v834_v23, %v833_v22, 16 }
 0x3a2   : > { %v1483_v24 = vpop.f32.mrf.mxu3 }
 0x3a3   : > { %v1504_v25 = vsel %vm11004_vm11, %v1483_v24, -inf }
 0x3a4   : > { %1505 = vmax.xlane.f32.xlu1 %v1504_v25 }
 0x3aa   : > { %v1485_v26 = vpop.f32.mrf.mxu3 }
 0x3b2   : > { %v1499_v27 = vpop.f32.mrf.mxu3 }
 0x3b3   : > { %v1507_v28 = vsel %vm11004_vm11, %v1499_v27, -inf }
 0x3b4   : > { %1508 = vmax.xlane.f32.xlu2 %v1507_v28 }
 0x3ba   : > { %v1501_v29 = vpop.f32.mrf.mxu3 }
 0x3cb   : > { %v8701_v37 = vpop.trf.xlu2 }
 0x3cc   : > { %v1702_v57 = vshrl.u32 %v8701_v37, 16 }
 0x3d3   : > { %v8702_v41 = vpop.trf.xlu2  ;;  %v8692_v47 = vpop.trf.xlu0 }
 0x3d4   : > { %v1686_v50 = vshrl.u32 %v8692_v47, 16  ;;  %v1703_v58 = vshrl.u32 %v8702_v41, 16  ;;  %v1700_v61 = vpack.i.b16 %v8702_v41, %v8701_v37 }
 0x3d6   : > { %v1704_v63 = vpack.i.b16 %v1703_v58, %v1702_v57  ;;  %v1714_v25 = vrot.slane %v1700_v61, 4 }
 0x3d8   : > { %v1770_v26 = vrot.slane %v1704_v63, 4 }
 0x3db   : > { %v8693_v48 = vpop.trf.xlu0 }
 0x3dc   : > { %v1687_v52 = vshrl.u32 %v8693_v48, 16  ;;  %v1684_v54 = vpack.i.b16 %v8693_v48, %v8692_v47 }
 0x3de   : > { %8697 = vxpose.binary.xlu1.c.b16.start.end [1/2] (short) (narrow) %v830_v36, %v829_v35, 16  ;;  %v1688_v55 = vpack.i.b16 %v1687_v52, %v1686_v50  ;;  %v1716_v59 = vrot.slane %v1684_v54, 4 }
 0x3e0   : > { %v1772_v20 = vrot.slane %v1688_v55, 4  ;;  %v1717_v0 = vsel %vm691_vm9, %v1700_v61, %v1716_v59 }
 0x3e1   : > { %v1725_v11 = vperm.slane %v1717_v0, %v9586_v60 }
 0x3e2   : > { %v1773_v1 = vsel %vm691_vm9, %v1704_v63, %v1772_v20 }
 0x3e3   : > { %v8704_v49 = vpop.trf.xlu0  ;;  %v1781_v15 = vperm.slane %v1773_v1, %v9586_v60  ;;  %v1752_v23 = vrot.slane %v1725_v11, 4 }
 0x3e4   : > { %v1710_v3 = vshrl.u32 %v8704_v49, 16 }
 0x3e5   : > { %v1808_v31 = vrot.slane %v1781_v15, 4 }
 0x3eb   : > { %v8705_v62 = vpop.trf.xlu0 }
 0x3ec   : > { %v1711_v6 = vshrl.u32 %v8705_v62, 16  ;;  %v1708_v12 = vpack.i.b16 %v8705_v62, %v8704_v49 }
 0x3ee   : > { %v1712_v16 = vpack.i.b16 %v1711_v6, %v1710_v3  ;;  %v1726_v32 = vrot.slane %v1708_v12, 4 }
 0x3f0   : > { %v1782_v34 = vrot.slane %v1712_v16, 4 }
 0x417   : > { %v1506_v38 = vpop.xlane.xlu1 %1505 }
 0x418   : > { %v1510_v39 = vsub.f32 %v1483_v24, %v1506_v38  ;;  %v1715_v38 = vsel %vm691_vm9, %v1714_v25, %v1684_v54 }
 0x419   : > { %v9756_v50 = vperm.slane %v1715_v38, %v9586_v60 }
 0x41a   : > { %v1512_v40 = vmul.f32 1.442695, %v1510_v39  ;;  %v1771_v39 = vsel %vm691_vm9, %v1770_v26, %v1688_v55 }
 0x41b   : > { %v9759_v52 = vperm.slane %v1771_v39, %v9586_v60  ;;  %v1740_v62 = vrot.slane %v9756_v50, 4 }
 0x41c   : > { %9001 = vpow2.f32 %v1512_v40 }
 0x41d   : > { %v1796_v63 = vrot.slane %v9759_v52, 4 }
 0x422   : > { %v9721_v42 = vpop.eup %9001 }
 0x423   : > { %v1516_v2 = vsel %vm11004_vm11, %v9721_v42, 0.0 }
 0x424   : > { %1517 = vadd.xlane.f32.xlu0 %v1516_v2 }
 0x427   : > { %v1509_v43 = vpop.xlane.xlu2 %1508 }
 0x428   : > { %v1511_v44 = vsub.f32 %v1499_v27, %v1509_v43 }
 0x42a   : > { %v1514_v53 = vmul.f32 1.442695, %v1511_v44 }
 0x42c   : > { %9003 = vpow2.f32 %v1514_v53 }
 0x432   : > { %v9725_v45 = vpop.eup %9003 }
 0x433   : > { %v1519_v46 = vsel %vm11004_vm11, %v9725_v45, 0.0  ;;  %vm11006_vm11 = vcmask 64512  }
 0x43e   : > { %1520 = vadd.xlane.f32.xlu1 %v1519_v46 }
 0x48a   : > { %v8698_v56 = vpop.trf.xlu1 }
 0x48b   : > { %v1694_v51 = vshrl.u32 %v8698_v56, 16 }
 0x492   : > { %v8699_v4 = vpop.trf.xlu1 }
 0x493   : > { %v1692_v7 = vpack.i.b16 %v8699_v4, %v8698_v56  ;;  %v1695_v8 = vshrl.u32 %v8699_v4, 16 }
 0x495   : > { %v1696_v13 = vpack.i.b16 %v1695_v8, %v1694_v51  ;;  %v1728_v14 = vrot.slane %v1692_v7, 4  ;;  %v1727_v43 = vsel %vm691_vm9, %v1726_v32, %v1692_v7 }
 0x496   : > { %v1733_v57 = vperm.slane %v1727_v43, %v9586_v60 }
 0x497   : > { %v1729_v17 = vsel %vm691_vm9, %v1708_v12, %v1728_v14  ;;  %v1784_v21 = vrot.slane %v1696_v13, 4  ;;  %v1518_v22 = vpop.xlane.xlu0 %1517  ;;  %v1783_v44 = vsel %vm691_vm9, %v1782_v34, %v1696_v13 }
 0x498   : > { %v1737_v24 = vperm.slane %v1729_v17, %v9586_v60  ;;  %9005 = vrcp.f32 %v1518_v22  ;;  %v1789_v58 = vperm.slane %v1783_v44, %v9586_v60  ;;  %v1533_v59 = vand.u32 2147483648, %v1518_v22 }
 0x499   : > { %v1785_v27 = vsel %vm691_vm9, %v1712_v16, %v1784_v21  ;;  %v1531_v61 = vand.u32 2147483647, %v1518_v22  ;;  %vm1527_vm13 = vweird.f32 %v1518_v22  ;;  %v1741_v3 = vsel %vm691_vm9, %v1733_v57, %v1740_v62 }
 0x49a   : > { %v1750_v28 = vrot.slane %v1737_v24, 4  ;;  %v1793_v29 = vperm.slane %v1785_v27, %v9586_v60  ;;  %v1753_v30 = vsel %vm691_vm9, %v1737_v24, %v1752_v23  ;;  %v1534_v1 = vor.u32 1.1754944e-38, %v1533_v59 }
 0x49b   : > { %v9739_v33 = vperm.slane %v1753_v30, %v9594_v5  ;;  %v1797_v4 = vsel %vm691_vm9, %v1789_v58, %v1796_v63  ;;  %vm1532_vm15 = vcmp.eq.f32.partialorder %v1531_v61, 8.507059e+37  ;;  %v1749_v8 = vperm.slane %v1741_v3, %v9594_v5 }
 0x49c   : > { %v1751_v35 = vsel %vm691_vm9, %v1750_v28, %v1725_v11  ;;  %v1806_v36 = vrot.slane %v1793_v29, 4  ;;  %v1809_v37 = vsel %vm691_vm9, %v1793_v29, %v1808_v31  ;;  %v1805_v11 = vperm.slane %v1797_v4, %v9594_v5 }
 0x49d   : > { %v1768_v40 = vrot.slane %v9739_v33, 4  ;;  %v9747_v41 = vperm.slane %v1809_v37, %v9594_v5  ;;  %v1757_v47 = vperm.slane %v1751_v35, %v9594_v5  ;;  %v1764_v14 = vrot.slane %v1749_v8, 4 }
 0x49e   : > { %v9006_v2 = vpop.eup %9005  ;;  %v1807_v53 = vsel %vm691_vm9, %v1806_v36, %v1781_v15  ;;  %v1820_v15 = vrot.slane %v1805_v11, 4  ;;  %v1738_v39 = vrot.slane %v1733_v57, 4 }
 0x49f   : > { %v1523_v46 = vmul.f32 %v9006_v2, %v1518_v22  ;;  %v1813_v48 = vperm.slane %v1807_v53, %v9594_v5  ;;  %v1824_v49 = vrot.slane %v9747_v41, 4  ;;  %v1769_v55 = vsel %vm691_vm9, 0, %v1768_v40 }
 0x4a0   : > { %vm1528_vm12 = vweird.f32 %v9006_v2  ;;  %v1765_v17 = vsel %vm691_vm9, 0, %v1764_v14  ;;  %v1821_v21 = vsel %vm691_vm9, 0, %v1820_v15  ;;  %v1766_v24 = vrot.slane %v1757_v47, 4 }
 0x4a1   : > { %v1524_v54 = vsub.f32 1.0, %v1523_v46  ;;  %8724 = vxpose.binary.xlu1.c.b16.start.end [1/2] (short) (narrow) %v1813_v48, %v1757_v47, 16  ;;  %v1825_v56 = vsel %vm691_vm9, 0, %v1824_v49  ;;  %vm1529_vm14 = vmor %vm1527_vm13, %vm1528_vm12  ;;  %v1822_v26 = vrot.slane %v1813_v48, 4  ;;  %v1794_v40 = vrot.slane %v1789_v58, 4 }
 0x4a2   : > { %8706 = vxpose.binary.xlu2.c.b16.start.end [1/2] (short) (narrow) %v1825_v56, %v1769_v55, 16  ;;  %v1767_v31 = vsel %vm691_vm9, 0, %v1766_v24 }
 0x4a3   : > { %v1525_v20 = vmul.f32 %v9006_v2, %v1524_v54  ;;  %v1823_v32 = vsel %vm691_vm9, 0, %v1822_v26  ;;  %v1795_v43 = vsel %vm691_vm9, %v1794_v40, %v9759_v52 }
 0x4a4   : > { %v1801_v53 = vperm.slane %v1795_v43, %v9594_v5 }
 0x4a5   : > { %v1526_v0 = vadd.f32 %v9006_v2, %v1525_v20 }
 0x4a6   : > { %v1818_v46 = vrot.slane %v1801_v53, 4 }
 0x4a7   : > { %v1530_v51 = vsel %vm1529_vm14, %v9006_v2, %v1526_v0  ;;  %v1739_v2 = vsel %vm691_vm9, %v1738_v39, %v9756_v50 }
 0x4a8   : > { %v1535_v6 = vsel %vm1532_vm15, %v1534_v1, %v1530_v51  ;;  %v1745_v44 = vperm.slane %v1739_v2, %v9594_v5  ;;  %v1819_v48 = vsel %vm691_vm9, 0, %v1818_v46 }
 0x4a9   : > { %v1536_v7 = vmul.f32 %v9721_v42, %v1535_v6 }
 0x4ab   : > { %v1552_v12 = vpack.c.bf16 %v1536_v7, %v1536_v7 }
 0x4ad   : > { %v2169_v13 = vsel %vm11006_vm11, %v1552_v12, 0 }
 0x4ae   : > { %2178 = vmatpush.bf16.xpose.msrb.mxu0 %v2169_v13 }
 0x4b1   : > { %v1521_v16 = vpop.xlane.xlu1 %1520 }
 0x4b2   : > { %9007 = vrcp.f32 %v1521_v16  ;;  %8709 = vxpose.binary.xlu2.c.b16.start.end [1/2] (short) (narrow) %v1821_v21, %v1765_v17, 16  ;;  %v1548_v25 = vand.u32 2147483648, %v1521_v16  ;;  %v1546_v28 = vand.u32 2147483647, %v1521_v16  ;;  %vm1542_vm13 = vweird.f32 %v1521_v16 }
 0x4b4   : > { %v1549_v30 = vor.u32 1.1754944e-38, %v1548_v25  ;;  %vm1547_vm15 = vcmp.eq.f32.partialorder %v1546_v28, 8.507059e+37 }
 0x4b8   : > { %v9008_v22 = vpop.eup %9007 }
 0x4b9   : > { %v1538_v42 = vmul.f32 %v9008_v22, %v1521_v16  ;;  %vm1543_vm12 = vweird.f32 %v9008_v22 }
 0x4ba   : > { %vm1544_vm14 = vmor %vm1542_vm13, %vm1543_vm12  ;;  %vm11005_vm12 = vcmask 257024  }
 0x4bb   : > { %v1539_v23 = vsub.f32 1.0, %v1538_v42 }
 0x4bd   : > { %v1540_v27 = vmul.f32 %v9008_v22, %v1539_v23 }
 0x4bf   : > { %v1541_v29 = vadd.f32 %v9008_v22, %v1540_v27 }
 0x4c1   : > { %v1545_v34 = vsel %vm1544_vm14, %v9008_v22, %v1541_v29 }
 0x4c2   : > { %8712 = vxpose.binary.xlu2.c.b16.start.end [1/2] (short) (narrow) %v1823_v32, %v1767_v31, 16  ;;  %v1550_v35 = vsel %vm1547_vm15, %v1549_v30, %v1545_v34 }
 0x4c3   : > { %v1551_v36 = vmul.f32 %v9725_v45, %v1550_v35  ;;  %v1762_v45 = vrot.slane %v1745_v44, 4 }
 0x4c5   : > { %v1553_v37 = vpack.c.bf16 %v1551_v36, %v1551_v36  ;;  %v1763_v47 = vsel %vm691_vm9, 0, %v1762_v45 }
 0x4c7   : > { %v2189_v38 = vsel %vm11006_vm11, %v1553_v37, 0 }
 0x4c8   : > { %2198 = vmatpush.bf16.xpose.msrb.mxu1 %v2189_v38 }
 0x4d2   : > { %8715 = vxpose.binary.xlu2.c.b16.start.end [1/2] (short) (narrow) %v9747_v41, %v9739_v33, 16 }
 0x4e2   : > { %8718 = vxpose.binary.xlu2.c.b16.start.end [1/2] (short) (narrow) %v1819_v48, %v1763_v47, 16 }
 0x4f2   : > { %8721 = vxpose.binary.xlu2.c.b16.start.end [1/2] (short) (narrow) %v1805_v11, %v1749_v8, 16 }
 0x502   : > { %8727 = vxpose.binary.xlu2.c.b16.start.end [1/2] (short) (narrow) %v1801_v53, %v1745_v44, 16 }
 0x543   : > { %v8707_v33 = vpop.trf.xlu2 }
 0x544   : > { %v2100_v54 = vrot.slane %v8707_v33, 4 }
 0x54b   : > { %v8708_v41 = vpop.trf.xlu2 }
 0x54c   : > { %v2138_v6 = vrot.slane %v8708_v41, 4 }
 0x54d   : > { %v8725_v62 = vpop.trf.xlu1 }
 0x553   : > { %v8710_v49 = vpop.trf.xlu2 }
 0x554   : > { %v2088_v4 = vrot.slane %v8710_v49, 4 }
 0x555   : > { %v8726_v12 = vpop.trf.xlu1 }
 0x55b   : > { %v8711_v50 = vpop.trf.xlu2 }
 0x55c   : > { %v2126_v42 = vrot.slane %v8711_v50, 4 }
 0x563   : > { %v8713_v55 = vpop.trf.xlu2 }
 0x564   : > { %v2101_v52 = vsel %vm691_vm9, %v2100_v54, %v8713_v55 }
 0x565   : > { %v2105_v1 = vperm.slane %v2101_v52, %v9586_v60 }
 0x567   : > { %v2112_v11 = vrot.slane %v2105_v1, 4 }
 0x56b   : > { %v8714_v56 = vpop.trf.xlu2 }
 0x56c   : > { %v2139_v13 = vsel %vm691_vm9, %v2138_v6, %v8714_v56 }
 0x56d   : > { %v2143_v21 = vperm.slane %v2139_v13, %v9586_v60 }
 0x56f   : > { %v2150_v29 = vrot.slane %v2143_v21, 4 }
 0x573   : > { %v8716_v57 = vpop.trf.xlu2 }
 0x574   : > { %v2094_v63 = vrot.slane %v8716_v57, 4  ;;  %v8533_v57 = vld [vmem:[#allocation10 + $0x8] sm:$0xff] }
 0x575   : > { %2347 = vmatpush.bf16.msrb.mxu2 %v8533_v57 }
 0x576   : > { %v2095_v0 = vsel %vm691_vm9, %v2094_v63, %v8725_v62 }
 0x577   : > { %v2099_v51 = vperm.slane %v2095_v0, %v9586_v60 }
 0x579   : > { %v2113_v14 = vsel %vm691_vm9, %v2112_v11, %v2099_v51 }
 0x57a   : > { %v2117_v23 = vperm.slane %v2113_v14, %v9594_v5 }
 0x57b   : > { %v8717_v58 = vpop.trf.xlu2 }
 0x57c   : > { %v2132_v7 = vrot.slane %v8717_v58, 4  ;;  %v2118_v31 = vrot.slane %v2117_v23, 4 }
 0x57e   : > { %v2133_v16 = vsel %vm691_vm9, %v2132_v7, %v8726_v12 }
 0x57f   : > { %v2137_v25 = vperm.slane %v2133_v16, %v9586_v60 }
 0x581   : > { %v2151_v34 = vsel %vm691_vm9, %v2150_v29, %v2137_v25 }
 0x582   : > { %v2155_v39 = vperm.slane %v2151_v34, %v9594_v5 }
 0x583   : > { %v8719_v59 = vpop.trf.xlu2 }
 0x584   : > { %v2089_v8 = vsel %vm691_vm9, %v2088_v4, %v8719_v59  ;;  %v2156_v53 = vrot.slane %v2155_v39, 4  ;;  %v9064_v39 = vld [vmem:[%s9515_s14 + $0x8] sm:$0xff] }
 0x585   : > { %v2093_v15 = vperm.slane %v2089_v8, %v9586_v60 }
 0x587   : > { %v2106_v26 = vrot.slane %v2093_v15, 4 }
 0x58b   : > { %v8720_v20 = vpop.trf.xlu2 }
 0x58c   : > { %v2127_v28 = vsel %vm691_vm9, %v2126_v42, %v8720_v20 }
 0x58d   : > { %v2131_v35 = vperm.slane %v2127_v28, %v9586_v60  ;;  %v2334_v28 = vsel %vm561_vm2, %v9550_v10, %v9548_v9  ;;  %v9063_v10 = vld [vmem:[%s9515_s14] sm:$0xff] }
 0x58e   : > { %v2335_v29 = vsel %vm563_vm3, %v9557_v18, %v2334_v28 }
 0x58f   : > { %v2144_v2 = vrot.slane %v2131_v35, 4 }
 0x593   : > { %v8722_v61 = vpop.trf.xlu2 }
 0x594   : > { %v2082_v17 = vrot.slane %v8722_v61, 4 }
 0x59b   : > { %v8723_v3 = vpop.trf.xlu2 }
 0x59c   : > { %v2120_v36 = vrot.slane %v8723_v3, 4 }
 0x5a3   : > { %v8728_v22 = vpop.trf.xlu2 }
 0x5a4   : > { %v2083_v24 = vsel %vm691_vm9, %v2082_v17, %v8728_v22 }
 0x5a5   : > { %v2087_v27 = vperm.slane %v2083_v24, %v9586_v60  ;;  %v8532_v24 = vld [vmem:[#allocation10] sm:$0xff] }
 0x5a6   : > { %2348 = vmatpush.bf16.msrb.mxu2 %v8532_v24 }
 0x5a7   : > { %v2107_v30 = vsel %vm691_vm9, %v2106_v26, %v2087_v27 }
 0x5a8   : > { %v2111_v32 = vperm.slane %v2107_v30, %v9594_v5  ;;  %v2336_v30 = vsel %vm565_vm4, %v9559_v19, %v2335_v29 }
 0x5aa   : > { %v2119_v37 = vsel %vm691_vm9, %v2118_v31, %v2111_v32 }
 0x5ab   : > { %v8729_v38 = vpop.trf.xlu2  ;;  %v2161_v48 = vshrl.u32 %v2119_v37, 16 }
 0x5ac   : > { %v2121_v40 = vsel %vm691_vm9, %v2120_v36, %v8729_v38  ;;  %v9342_v36 = vmov 32.0   ;;  %v8510_v38 = vld [vmem:[#allocation5 + $0x10] sm:$0xff] }
 0x5ad   : > { %v2125_v43 = vperm.slane %v2121_v40, %v9586_v60  ;;  %9009 = vrcp.f32 %v9342_v36  ;;  %v2392_v40 = vpack.c.bf16 %v9064_v39, %v9063_v10 }
 0x5af   : > { %v2145_v44 = vsel %vm691_vm9, %v2144_v2, %v2125_v43 }
 0x5b0   : > { %v2149_v45 = vperm.slane %v2145_v44, %v9594_v5 }
 0x5b2   : > { %v2157_v46 = vsel %vm691_vm9, %v2156_v53, %v2149_v45 }
 0x5b3   : > { %v2160_v47 = vpack.i.b16 %v2157_v46, %v2119_v37  ;;  %v2162_v33 = vshrl.u32 %v2157_v46, 16  ;;  %v8511_v37 = vld [vmem:[#allocation5 + $0x18] sm:$0xff]  ;;  %v9010_v9 = vpop.eup %9009 }
 0x5b4   : > { %2415 = vmatpush.bf16.msra.mxu3 %v8511_v37  ;;  %v2359_v18 = vmul.f32 32.0, %v9010_v9  ;;  %vm2363_vm13 = vweird.f32 %v9010_v9 }
 0x5b5   : > { %8371 = vmatmul.msk.bf16.vlgmr.msrb.gmra.mxu0 %vm11006_vm11, %v2160_v47  ;;  %v2163_v41 = vpack.i.b16 %v2162_v33, %v2161_v48  ;;  %v8519_v33 = vld [vmem:[#allocation7 + $0x18] sm:$0xff] }
 0x5b6   : > { %v2360_v19 = vsub.f32 1.0, %v2359_v18  ;;  %2446 = vmatpush.bf16.msra.mxu0 %v8519_v33 }
 0x5b7   : > { %8372 = vmatmul.msk.bf16.vlgmr.msrb.gmra.mxu1 %vm11006_vm11, %v2163_v41  ;;  %v8527_v41 = vld [vmem:[#allocation8 + $0x18] sm:$0xff] }
 0x5b8   : > { %2416 = vmatpush.bf16.msra.mxu3 %v8510_v38  ;;  %v2361_v2 = vmul.f32 %v9010_v9, %v2360_v19  ;;  %2471 = vmatpush.bf16.msra.mxu1 %v8527_v41 }
 0x5ba   : > { %v2362_v43 = vadd.f32 %v9010_v9, %v2361_v2 }
 0x5bb   : > { %8390 = vmatmul.msk.bf16.vlgmr.msra.gmra.mxu3 %vm528_vm1, %v2392_v40 }
 0x5bc   : > { %v9846_v44 = vsel %vm2363_vm13, %v9010_v9, %v2362_v43 }
 0x632   : > { %v2180_v49 = vpop.f32.mrf.mxu0 }
 0x634   : > { %v2200_v50 = vpop.f32.mrf.mxu1 }
 0x635   : > { %v8730_v54 = vpack.i.bf16 %v2200_v50, %v2180_v49  ;;  %v8518_v50 = vld [vmem:[#allocation7 + $0x10] sm:$0xff] }
 0x636   : > { %2447 = vmatpush.bf16.msra.mxu0 %v8518_v50 }
 0x637   : > { %8731 = vxpose.xlu0.b32.start [1/2] (short) (narrow) %v8730_v54, 8  ;;  %v8526_v54 = vld [vmem:[#allocation8 + $0x10] sm:$0xff] }
 0x638   : > { %2472 = vmatpush.bf16.msra.mxu1 %v8526_v54 }
 0x63a   : > { %v2182_v55 = vpop.f32.mrf.mxu0 }
 0x63c   : > { %v2202_v52 = vpop.f32.mrf.mxu1 }
 0x63d   : > { %v8732_v56 = vpack.i.bf16 %v2202_v52, %v2182_v55 }
 0x63e   : > { %v2418_v49 = vpop.f32.mrf.mxu3 }
 0x63f   : > { %8733 = vxpose.xlu0.b32.end [2/2] (short) (narrow) %v8732_v56, 8 }
 0x646   : > { %v2420_v56 = vpop.f32.mrf.mxu3 }
 0x647   : > { %v9851_v57 = vmul.f32 0.25, %v2420_v56 }
 0x6db   : > { %v8734_v58 = vpop.trf.xlu0 }
 0x6dc   : > { %v8738_v59 = vunpack.i.h.bf16 %v8734_v58  ;;  %v8735_v20 = vunpack.i.l.bf16 %v8734_v58 }
 0x6de   : > { %v2276_v61 = vperm.slane %v8738_v59, %v9586_v60  ;;  %v2272_v62 = vperm.slane %v8735_v20, %v9586_v60 }
 0x6e0   : > { %v2277_v63 = vrot.slane %v2276_v61, 4  ;;  %v2279_v0 = vrot.slane %v2272_v62, 4 }
 0x6e2   : > { %v2278_v1 = vsel %vm691_vm9, %v2277_v63, %v2272_v62  ;;  %v2280_v3 = vsel %vm691_vm9, %v2276_v61, %v2279_v0 }
 0x6e3   : > { %v2284_v4 = vperm.slane %v2278_v1, %v9594_v5  ;;  %v2288_v51 = vperm.slane %v2280_v3, %v9594_v5  ;;  %v8993_v1 = vld [vmem:[%s11001_s5] ss:$0 sm:$0xff] }
 0x6e5   : > { %v2291_v6 = vrot.slane %v2288_v51, 4  ;;  %v2289_v7 = vrot.slane %v2284_v4, 4  ;;  %v8994_v51 = vld [vmem:[#allocation11] ss:$0 sm:$0xff] }
 0x6e7   : > { %v2292_v8 = vsel %vm691_vm9, 0.0, %v2291_v6  ;;  %v2290_v12 = vsel %vm691_vm9, 0.0, %v2289_v7  ;;  %v2293_v13 = vsel %vm691_vm9, %v2291_v6, %v2284_v4 }
 0x6e8   : > { %v2298_v11 = vrot.slane %v2292_v8, 4  ;;  %v2297_v16 = vperm.slane %v2293_v13, %v9586_v60 }
 0x6ea   : > { %v2299_v14 = vsel %vm691_vm9, %v2298_v11, %v2290_v12  ;;  %v9860_v11 = vmul.f32 0.25, %v2418_v49 }
 0x6eb   : > { %v2303_v15 = vperm.slane %v2299_v14, %v9586_v60 }
 0x6ed   : > { %v2304_v17 = vrot.slane %v2303_v15, 4 }
 0x6ef   : > { %v2305_v21 = vsel %vm691_vm9, %v2304_v17, %v2297_v16 }
 0x6f0   : > { %v2309_v22 = vperm.slane %v2305_v21, %v9594_v5 }
 0x6f2   : > { %v2310_v42 = vrot.slane %v2309_v22, 4 }
 0x6f4   : > { %v2311_v23 = vsel %vm691_vm9, 0.0, %v2310_v42 }
 0x6f5   : > { %2313 = vrot.lane.b32.xlu2 %v2311_v23, %s9341_s15 }
 0x6fd   : > { %2482 = vrot.lane.b32.xlu2 %v9851_v57, %s9338_s9 }
 0x74f   : > { %v2314_v25 = vpop.permute.xlu2 %2313 }
 0x750   : > { %v2316_v26 = vsel %vm1470_vm10, %v2309_v22, %v2314_v25 }
 0x751   : > { %v2317_v27 = vpack.c.bf16 %v2316_v26, %v2316_v26 }
 0x753   : > { %8381 = vmatmul.msk.bf16.vlgmr.msrb.gmra.mxu2 %vm528_vm1, %v2317_v27 }
 0x757   : > { %v9866_v17 = vpop.permute.xlu2 %2482 }
 0x7d6   : > { %v2350_v31 = vpop.f32.mrf.mxu2 }
 0x7d7   : > { %v2351_v32 = vadd.f32 %v2350_v31, %v2336_v30 }
 0x7d9   : > { %v2355_v34 = vsel %vm11005_vm12, %v2351_v32, 0.0 }
 0x7da   : > { %2356 = vadd.xlane.f32.xlu0 %v2355_v34 }
 0x7de   : > { %v2352_v35 = vpop.f32.mrf.mxu2 }
 0x84d   : > { %v2357_v53 = vpop.xlane.xlu0 %2356 }
 0x84e   : > { %v2365_v45 = vmul.f32 %v9846_v44, %v2357_v53 }
 0x850   : > { %v2366_v46 = vsub.f32 %v2351_v32, %v2365_v45 }
 0x852   : > { %v2367_v47 = vmul.f32 %v2366_v46, %v2366_v46 }
 0x854   : > { %v2368_v48 = vsel %vm11005_vm12, %v2367_v47, 0.0 }
 0x855   : > { %2369 = vadd.xlane.f32.xlu1 %v2368_v48 }
 0x8c8   : > { %v2370_v55 = vpop.xlane.xlu1 %2369 }
 0x8c9   : > { %v2371_v52 = vmul.f32 %v2370_v55, %v9846_v44 }
 0x8cb   : > { %v2372_v58 = vadd.f32 1e-06, %v2371_v52 }
 0x8cd   : > { %9011 = vrsqrt.f32 %v2372_v58  ;;  %vm2379_vm15 = vweird.f32 %v2372_v58 }
 0x8d3   : > { %v9012_v59 = vpop.eup %9011 }
 0x8d4   : > { %v2374_v20 = vmul.f32 %v9012_v59, %v2372_v58  ;;  %vm2380_vm14 = vweird.f32 %v9012_v59 }
 0x8d5   : > { %vm2381_vm13 = vmor %vm2379_vm15, %vm2380_vm14  ;;  %vm3324_vm14 = vcmask 31744  }
 0x8d6   : > { %v2375_v61 = vmul.f32 %v9012_v59, %v2374_v20 }
 0x8d8   : > { %v2376_v62 = vmul.f32 0.5, %v2375_v61 }
 0x8da   : > { %v2377_v63 = vsub.f32 1.5, %v2376_v62 }
 0x8dc   : > { %v2378_v0 = vmul.f32 %v9012_v59, %v2377_v63 }
 0x8de   : > { %v2382_v3 = vsel %vm2381_vm13, %v9012_v59, %v2378_v0 }
 0x8df   : > { %v2383_v4 = vmul.f32 %v2382_v3, %v2366_v46 }
 0x8e1   : > { %v2387_v6 = vmul.f32 %v8993_v1, %v2383_v4 }
 0x8e3   : > { %v2391_v7 = vadd.f32 %v8994_v51, %v2387_v6  ;;  %v9343_v6 = vmov 0  }
 0x8e5   : > { %v2393_v8 = vpack.c.bf16 %v2391_v7, %v2391_v7  ;;  %v9891_v7 = vpack.i.b16 0, %v9343_v6 }
 0x8e7   : > { %8399 = vmatmul.msk.bf16.vlgmr.msra.gmra.mxu0 %vm528_vm1, %v2393_v8  ;;  %8408 = vmatmul.msk.bf16.vlgmr.msra.gmra.mxu1 %vm528_vm1, %v2393_v8 }
 0x964   : > { %v2449_v12 = vpop.f32.mrf.mxu0  ;;  %v9862_v13 = vpop.f32.mrf.mxu1 }
 0x965   : > { %v8739_v14 = vpack.i.bf16 %v9860_v11, %v2449_v12  ;;  %v2612_v21 = vperm.slane %v2449_v12, %v9586_v60 }
 0x967   : > { %8740 = vrot.lane.b32.xlu2 %v8739_v14, %s9338_s9  ;;  %v2620_v24 = vrot.slane %v2612_v21, 4 }
 0x96c   : > { %v2451_v15 = vpop.f32.mrf.mxu0  ;;  %v2476_v16 = vpop.f32.mrf.mxu1 }
 0x9c1   : > { %v9869_v22 = vpop.permute.xlu2 %8740 }
 0x9c2   : > { %v8742_v42 = vunpack.i.l.bf16 %v9869_v22 }
 0x9c4   : > { %v2617_v23 = vperm.slane %v8742_v42, %v9586_v60 }
 0x9c6   : > { %v2618_v25 = vrot.slane %v2617_v23, 4  ;;  %v2621_v26 = vsel %vm691_vm9, %v2617_v23, %v2620_v24 }
 0x9c7   : > { %v2629_v27 = vperm.slane %v2621_v26, %v9594_v5 }
 0x9c8   : > { %v2619_v29 = vsel %vm691_vm9, %v2618_v25, %v2612_v21 }
 0x9c9   : > { %v2632_v28 = vrot.slane %v2629_v27, 4  ;;  %v2625_v31 = vperm.slane %v2619_v29, %v9594_v5  ;;  %v2636_v32 = vpack.c.bf16 %v2629_v27, %v2629_v27 }
 0x9cb   : > { %v2633_v30 = vsel %vm691_vm9, 0.0, %v2632_v28  ;;  %v2630_v35 = vrot.slane %v2625_v31, 4  ;;  %v2634_v37 = vpack.c.bf16 %v2625_v31, %v2625_v31 }
 0x9cc   : > { %v2637_v34 = vpack.c.bf16 %v2633_v30, %v2633_v30 }
 0x9cd   : > { %v2631_v36 = vsel %vm691_vm9, 0.0, %v2630_v35 }
 0x9ce   : > { %8744 = vxpose.binary.xlu1.c.b16.start.end [1/2] (short) (narrow) %v2637_v34, %v2636_v32, 16  ;;  %v2635_v38 = vpack.c.bf16 %v2631_v36, %v2631_v36 }
 0x9d0   : > { %8747 = vxpose.binary.xlu2.c.b16.start.end [1/2] (short) (narrow) %v2635_v38, %v2634_v37, 16 }
 0xa71   : > { %v8748_v9 = vpop.trf.xlu2 }
 0xa72   : > { %v2822_v40 = vshrl.u32 %v8748_v9, 16 }
 0xa79   : > { %v8749_v10 = vpop.trf.xlu2 }
 0xa7a   : > { %v8745_v39 = vpop.trf.xlu1  ;;  %v2823_v18 = vshrl.u32 %v8749_v10, 16  ;;  %v2820_v19 = vpack.i.b16 %v8749_v10, %v8748_v9 }
 0xa7b   : > { %v2830_v46 = vshrl.u32 %v8745_v39, 16 }
 0xa7c   : > { %v2824_v2 = vpack.i.b16 %v2823_v18, %v2822_v40  ;;  %v2845_v43 = vperm.slane %v2820_v19, %v9586_v60  ;;  %v2840_v16 = vrot.slane %v2820_v19, 4 }
 0xa7e   : > { %v2897_v45 = vperm.slane %v2824_v2, %v9586_v60  ;;  %v2862_v49 = vrot.slane %v2845_v43, 4  ;;  %v2892_v21 = vrot.slane %v2824_v2, 4  ;;  %v2841_v24 = vsel %vm691_vm9, %v9891_v7, %v2840_v16 }
 0xa7f   : > { %v2849_v30 = vperm.slane %v2841_v24, %v9586_v60 }
 0xa80   : > { %v2914_v50 = vrot.slane %v2897_v45, 4  ;;  %v2893_v25 = vsel %vm691_vm9, %v9891_v7, %v2892_v21 }
 0xa81   : > { %v2901_v31 = vperm.slane %v2893_v25, %v9586_v60  ;;  %v2874_v9 = vrot.slane %v2849_v30, 4 }
 0xa82   : > { %v8746_v53 = vpop.trf.xlu1 }
 0xa83   : > { %v2828_v47 = vpack.i.b16 %v8746_v53, %v8745_v39  ;;  %v2831_v48 = vshrl.u32 %v8746_v53, 16  ;;  %v2926_v10 = vrot.slane %v2901_v31, 4 }
 0xa85   : > { %v2832_v33 = vpack.i.b16 %v2831_v48, %v2830_v46  ;;  %v2855_v41 = vperm.slane %v2828_v47, %v9586_v60  ;;  %v2850_v1 = vrot.slane %v2828_v47, 4 }
 0xa87   : > { %v2860_v54 = vrot.slane %v2855_v41, 4  ;;  %v2907_v55 = vperm.slane %v2832_v33, %v9586_v60  ;;  %v2863_v52 = vsel %vm691_vm9, %v2855_v41, %v2862_v49  ;;  %v2902_v3 = vrot.slane %v2832_v33, 4 }
 0xa88   : > { %v2871_v59 = vperm.slane %v2863_v52, %v9594_v5  ;;  %v2851_v14 = vsel %vm691_vm9, %v9891_v7, %v2850_v1  ;;  %v2538_v52 = vrot.slane %v9851_v57, 4 }
 0xa89   : > { %v2912_v56 = vrot.slane %v2907_v55, 4  ;;  %v2915_v58 = vsel %vm691_vm9, %v2907_v55, %v2914_v50  ;;  %v2861_v61 = vsel %vm691_vm9, %v2860_v54, %v2845_v43  ;;  %v2903_v15 = vsel %vm691_vm9, %v9891_v7, %v2902_v3 }
 0xa8a   : > { %v2923_v20 = vperm.slane %v2915_v58, %v9594_v5  ;;  %v2867_v62 = vperm.slane %v2861_v61, %v9594_v5  ;;  %v2859_v42 = vperm.slane %v2851_v14, %v9586_v60  ;;  %v2911_v23 = vperm.slane %v2903_v15, %v9586_v60 }
 0xa8b   : > { %v2913_v63 = vsel %vm691_vm9, %v2912_v56, %v2897_v45  ;;  %v2886_v26 = vrot.slane %v2871_v59, 4  ;;  %v8743_v56 = vunpack.i.h.bf16 %v9869_v22  ;;  %v2486_v58 = vrot.slane %v9860_v11, 4 }
 0xa8c   : > { %8750 = vxpose.binary.xlu0.c.b16.start.end [1/2] (short) (narrow) %v2923_v20, %v2871_v59, 16  ;;  %v2919_v0 = vperm.slane %v2913_v63, %v9594_v5  ;;  %v2884_v4 = vrot.slane %v2867_v62, 4  ;;  %v2938_v27 = vrot.slane %v2923_v20, 4  ;;  %v2872_v28 = vrot.slane %v2859_v42, 4 }
 0xa8d   : > { %v2924_v29 = vrot.slane %v2911_v23, 4  ;;  %v2887_v32 = vsel %vm691_vm9, 0, %v2886_v26  ;;  %v2875_v39 = vsel %vm691_vm9, %v2859_v42, %v2874_v9  ;;  %v2927_v40 = vsel %vm691_vm9, %v2911_v23, %v2926_v10 }
 0xa8e   : > { %v2936_v51 = vrot.slane %v2919_v0, 4  ;;  %v2885_v8 = vsel %vm691_vm9, 0, %v2884_v4  ;;  %v2939_v34 = vsel %vm691_vm9, 0, %v2938_v27  ;;  %v2873_v35 = vsel %vm691_vm9, %v2872_v28, %v2849_v30 }
 0xa8f   : > { %v2925_v36 = vsel %vm691_vm9, %v2924_v29, %v2901_v31  ;;  %v2879_v37 = vperm.slane %v2873_v35, %v9594_v5  ;;  %v2883_v18 = vperm.slane %v2875_v39, %v9594_v5  ;;  %v2935_v19 = vperm.slane %v2927_v40, %v9594_v5 }
 0xa90   : > { %v2937_v12 = vsel %vm691_vm9, 0, %v2936_v51  ;;  %v2931_v38 = vperm.slane %v2925_v36, %v9594_v5  ;;  %v2548_v59 = vrot.slane %v9866_v17, 4  ;;  %v2539_v20 = vsel %vm691_vm9, 0.0, %v2538_v52 }
 0xa91   : > { %8753 = vxpose.binary.xlu1.c.b16.start.end [1/2] (short) (narrow) %v2937_v12, %v2885_v8, 16  ;;  %v2888_v2 = vrot.slane %v2879_v37, 4  ;;  %v2890_v46 = vrot.slane %v2883_v18, 4  ;;  %v2942_v47 = vrot.slane %v2935_v19, 4  ;;  %v2496_v61 = vrot.slane %v8743_v56, 4 }
 0xa92   : > { %v2940_v43 = vrot.slane %v2931_v38, 4  ;;  %v2549_v1 = vsel %vm691_vm9, 0.0, %v2548_v59  ;;  %v2543_v51 = vperm.slane %v9851_v57, %v9586_v60  ;;  %v2553_v15 = vperm.slane %v9866_v17, %v9586_v60 }
 0xa93   : > { %v2889_v53 = vsel %vm691_vm9, 0, %v2888_v2  ;;  %v2891_v48 = vsel %vm691_vm9, 0, %v2890_v46  ;;  %v2943_v33 = vsel %vm691_vm9, 0, %v2942_v47  ;;  %v2497_v3 = vsel %vm691_vm9, 0.0, %v2496_v61 }
 0xa94   : > { %v2941_v45 = vsel %vm691_vm9, 0, %v2940_v43  ;;  %v2557_v6 = vperm.slane %v2549_v1, %v9586_v60  ;;  %v2505_v12 = vperm.slane %v2497_v3, %v9586_v60  ;;  %v2560_v16 = vrot.slane %v2543_v51, 4 }
 0xa95   : > { %v2491_v23 = vperm.slane %v9860_v11, %v9586_v60  ;;  %v2501_v26 = vperm.slane %v8743_v56, %v9586_v60  ;;  %v2558_v27 = vrot.slane %v2553_v15, 4 }
 0xa96   : > { %v2570_v21 = vrot.slane %v2557_v6, 4  ;;  %v2518_v25 = vrot.slane %v2505_v12, 4  ;;  %v2561_v28 = vsel %vm691_vm9, %v2553_v15, %v2560_v16 }
 0xa97   : > { %v2559_v35 = vsel %vm691_vm9, %v2558_v27, %v2543_v51  ;;  %v2569_v36 = vperm.slane %v2561_v28, %v9594_v5 }
 0xa99   : > { %v2584_v43 = vrot.slane %v2569_v36, 4 }
 0xa9b   : > { %v2585_v59 = vsel %vm691_vm9, 0.0, %v2584_v43 }
 0xa9c   : > { %8759 = vxpose.binary.xlu0.c.b16.start.end [1/2] (short) (narrow) %v2939_v34, %v2887_v32, 16  ;;  %v2508_v32 = vrot.slane %v2491_v23, 4  ;;  %v2506_v34 = vrot.slane %v2501_v26, 4 }
 0xaa1   : > { %8756 = vxpose.binary.xlu1.c.b16.start.end [1/2] (short) (narrow) %v2931_v38, %v2879_v37, 16  ;;  %v2509_v38 = vsel %vm691_vm9, %v2501_v26, %v2508_v32 }
 0xaa2   : > { %v2517_v2 = vperm.slane %v2509_v38, %v9594_v5 }
 0xaa4   : > { %v2532_v56 = vrot.slane %v2517_v2, 4 }
 0xaa6   : > { %v2533_v15 = vsel %vm691_vm9, 0.0, %v2532_v56 }
 0xaac   : > { %8762 = vxpose.binary.xlu0.c.b16.start.end [1/2] (short) (narrow) %v2935_v19, %v2883_v18, 16  ;;  %v2565_v18 = vperm.slane %v2559_v35, %v9594_v5  ;;  %v2507_v19 = vsel %vm691_vm9, %v2506_v34, %v2491_v23  ;;  %v2592_v35 = vpack.c.bf16 %v2517_v2, %v2517_v2 }
 0xaae   : > { %v2582_v52 = vrot.slane %v2565_v18, 4 }
 0xab0   : > { %v2583_v16 = vsel %vm691_vm9, 0.0, %v2582_v52 }
 0xab1   : > { %8765 = vxpose.binary.xlu1.c.b16.start.end [1/2] (short) (narrow) %v2941_v45, %v2889_v53, 16 }
 0xabc   : > { %8768 = vxpose.binary.xlu0.c.b16.start.end [1/2] (short) (narrow) %v2943_v33, %v2891_v48, 16  ;;  %v2513_v33 = vperm.slane %v2507_v19, %v9594_v5 }
 0xabe   : > { %v2590_v52 = vpack.c.bf16 %v2513_v33, %v2513_v33 }
 0xacc   : > { %8771 = vxpose.binary.xlu0.c.b16.start.end [1/2] (short) (narrow) %v2919_v0, %v2867_v62, 16  ;;  %v2487_v62 = vsel %vm691_vm9, 0.0, %v2486_v58  ;;  %v2547_v0 = vperm.slane %v2539_v20, %v9586_v60 }
 0xacd   : > { %v2495_v22 = vperm.slane %v2487_v62, %v9586_v60 }
 0xace   : > { %v2572_v8 = vrot.slane %v2547_v0, 4  ;;  %v2571_v29 = vsel %vm691_vm9, %v2570_v21, %v2547_v0  ;;  %v2600_v0 = vpack.c.bf16 %v2569_v36, %v2569_v36 }
 0xacf   : > { %v2520_v14 = vrot.slane %v2495_v22, 4  ;;  %v2519_v11 = vsel %vm691_vm9, %v2518_v25, %v2495_v22  ;;  %v2577_v37 = vperm.slane %v2571_v29, %v9594_v5  ;;  %v2598_v25 = vpack.c.bf16 %v2565_v18, %v2565_v18 }
 0xad0   : > { %v2573_v24 = vsel %vm691_vm9, %v2557_v6, %v2572_v8  ;;  %v2525_v10 = vperm.slane %v2519_v11, %v9594_v5  ;;  %v2530_v6 = vrot.slane %v2513_v33, 4  ;;  %v2593_v29 = vpack.c.bf16 %v2533_v15, %v2533_v15 }
 0xad1   : > { %v2521_v57 = vsel %vm691_vm9, %v2505_v12, %v2520_v14  ;;  %v2581_v17 = vperm.slane %v2573_v24, %v9594_v5  ;;  %v2586_v53 = vrot.slane %v2577_v37, 4  ;;  %v2602_v1 = vpack.c.bf16 %v2577_v37, %v2577_v37 }
 0xad2   : > { %v2529_v30 = vperm.slane %v2521_v57, %v9594_v5  ;;  %v2534_v47 = vrot.slane %v2525_v10, 4  ;;  %v2601_v12 = vpack.c.bf16 %v2585_v59, %v2585_v59  ;;  %v2594_v27 = vpack.c.bf16 %v2525_v10, %v2525_v10 }
 0xad3   : > { %v2588_v9 = vrot.slane %v2581_v17, 4  ;;  %v2604_v46 = vpack.c.bf16 %v2581_v17, %v2581_v17  ;;  %v2587_v20 = vsel %vm691_vm9, 0.0, %v2586_v53  ;;  %v2706_v57 = vrot.slane %v2602_v1, 4 }
 0xad4   : > { %v2536_v39 = vrot.slane %v2529_v30, 4  ;;  %v2535_v22 = vsel %vm691_vm9, 0.0, %v2534_v47  ;;  %v2596_v8 = vpack.c.bf16 %v2529_v30, %v2529_v30  ;;  %v2603_v14 = vpack.c.bf16 %v2587_v20, %v2587_v20 }
 0xad5   : > { %v2589_v45 = vsel %vm691_vm9, 0.0, %v2588_v9  ;;  %v2712_v3 = vrot.slane %v2604_v46, 4  ;;  %v2595_v23 = vpack.c.bf16 %v2535_v22, %v2535_v22  ;;  %v2531_v28 = vsel %vm691_vm9, 0.0, %v2530_v6 }
 0xad6   : > { %v2537_v48 = vsel %vm691_vm9, 0.0, %v2536_v39  ;;  %v2605_v61 = vpack.c.bf16 %v2589_v45, %v2589_v45  ;;  %v2676_v17 = vrot.slane %v2596_v8, 4  ;;  %v2599_v30 = vpack.c.bf16 %v2583_v16, %v2583_v16 }
 0xad7   : > { %v2597_v62 = vpack.c.bf16 %v2537_v48, %v2537_v48  ;;  %v2713_v26 = vsel %vm691_vm9, %v2712_v3, %v2600_v0  ;;  %v2724_v11 = vrot.slane %v2603_v14, 4  ;;  %v2688_v36 = vrot.slane %v2595_v23, 4 }
 0xad8   : > { %v2730_v21 = vrot.slane %v2605_v61, 4  ;;  %v2707_v38 = vsel %vm691_vm9, %v2706_v57, %v2598_v25  ;;  %v2717_v9 = vperm.slane %v2713_v26, %v9586_v60  ;;  %v2591_v39 = vpack.c.bf16 %v2531_v28, %v2531_v28 }
 0xad9   : > { %v2694_v24 = vrot.slane %v2597_v62, 4  ;;  %v2670_v18 = vrot.slane %v2594_v27, 4  ;;  %v2677_v43 = vsel %vm691_vm9, %v2676_v17, %v2592_v35  ;;  %v2725_v2 = vsel %vm691_vm9, %v2724_v11, %v2599_v30 }
 0xada   : > { %v2731_v34 = vsel %vm691_vm9, %v2730_v21, %v2601_v12  ;;  %v2689_v56 = vsel %vm691_vm9, %v2688_v36, %v2591_v39  ;;  %v2711_v61 = vperm.slane %v2707_v38, %v9586_v60  ;;  %v2718_v62 = vrot.slane %v2717_v9, 4 }
 0xadb   : > { %v2695_v37 = vsel %vm691_vm9, %v2694_v24, %v2593_v29  ;;  %v2735_v47 = vperm.slane %v2731_v34, %v9586_v60  ;;  %v2671_v0 = vsel %vm691_vm9, %v2670_v18, %v2590_v52  ;;  %v2729_v3 = vperm.slane %v2725_v2, %v9586_v60 }
 0xadc   : > { %v2699_v48 = vperm.slane %v2695_v37, %v9586_v60  ;;  %v2675_v15 = vperm.slane %v2671_v0, %v9586_v60  ;;  %v2719_v26 = vsel %vm691_vm9, %v2718_v62, %v2711_v61 }
 0xadd   : > { %v2736_v6 = vrot.slane %v2735_v47, 4 }
 0xade   : > { %v2700_v22 = vrot.slane %v2699_v48, 4 }
 0xadf   : > { %v2737_v27 = vsel %vm691_vm9, %v2736_v6, %v2729_v3 }
 0xae0   : > { %v2741_v38 = vperm.slane %v2737_v27, %v9594_v5 }
 0xae2   : > { %v2752_v47 = vshrl.u32 %v2741_v38, 16 }
 0xb0b   : > { %2639 = vrot.lane.b32.xlu1 %v9862_v13, %s9338_s9 }
 0xb38   : > { %v9923_v41 = vpop.trf.xlu0 }
 0xb39   : > { %v3200_v8 = vrot.slane %v9923_v41, 4 }
 0xb3d   : > { %v9925_v49 = vpop.trf.xlu1 }
 0xb40   : > { %v9927_v50 = vpop.trf.xlu0 }
 0xb41   : > { %v3238_v35 = vrot.slane %v9927_v50, 4 }
 0xb45   : > { %v9931_v55 = vpop.trf.xlu1 }
 0xb48   : > { %v9929_v54 = vpop.trf.xlu0 }
 0xb49   : > { %v3206_v53 = vrot.slane %v9929_v54, 4  ;;  %v2681_v54 = vperm.slane %v2677_v43, %v9586_v60 }
 0xb4b   : > { %v3207_v1 = vsel %vm691_vm9, %v3206_v53, %v9925_v49  ;;  %v2682_v49 = vrot.slane %v2681_v54, 4 }
 0xb4d   : > { %v9944_v4 = vpop.trf.xlu1  ;;  %v2683_v17 = vsel %vm691_vm9, %v2682_v49, %v2675_v15 }
 0xb4e   : > { %v2687_v37 = vperm.slane %v2683_v17, %v9594_v5 }
 0xb50   : > { %v9939_v63 = vpop.trf.xlu0  ;;  %v2745_v2 = vshrl.u32 %v2687_v37, 16 }
 0xb51   : > { %v3244_v12 = vrot.slane %v9939_v63, 4 }
 0xb55   : > { %v9964_v31 = vpop.trf.xlu1 }
 0xb58   : > { %v9953_v42 = vpop.trf.xlu0 }
 0xb59   : > { %v3212_v59 = vrot.slane %v9953_v42, 4 }
 0xb5b   : > { %v3213_v14 = vsel %vm691_vm9, %v3212_v59, %v9944_v4  ;;  %v3245_v4 = vsel %vm691_vm9, %v3244_v12, %v9931_v55  ;;  %v2723_v55 = vperm.slane %v2719_v26, %v9594_v5 }
 0xb5c   : > { %v3217_v25 = vperm.slane %v3213_v14, %v9586_v60  ;;  %v3249_v30 = vperm.slane %v3245_v4, %v9586_v60 }
 0xb5d   : > { %v8766_v58 = vpop.trf.xlu1  ;;  %v2750_v52 = vpack.i.b16 %v2741_v38, %v2723_v55 }
 0xb5e   : > { %v3262_v43 = vrot.slane %v3249_v30, 4 }
 0xb5f   : > { %v3285_v3 = vunpack.c.l.b16 %v2750_v52 }
 0xb60   : > { %v9972_v40 = vpop.trf.xlu0 }
 0xb61   : > { %v3250_v33 = vrot.slane %v9972_v40, 4  ;;  %v3211_v40 = vperm.slane %v3207_v1, %v9586_v60 }
 0xb63   : > { %v3251_v23 = vsel %vm691_vm9, %v3250_v33, %v9964_v31  ;;  %v3224_v28 = vrot.slane %v3211_v40, 4 }
 0xb64   : > { %v3255_v29 = vperm.slane %v3251_v23, %v9586_v60 }
 0xb65   : > { %v8767_v19 = vpop.trf.xlu1 }
 0xb68   : > { %v8769_v51 = vpop.trf.xlu0 }
 0xb69   : > { %v3218_v32 = vrot.slane %v8769_v51, 4  ;;  %v2693_v51 = vperm.slane %v2689_v56, %v9586_v60 }
 0xb6b   : > { %v3219_v45 = vsel %vm691_vm9, %v3218_v32, %v8766_v58  ;;  %v2701_v57 = vsel %vm691_vm9, %v2700_v22, %v2693_v51 }
 0xb6c   : > { %v3223_v58 = vperm.slane %v3219_v45, %v9586_v60  ;;  %v2705_v32 = vperm.slane %v2701_v57, %v9594_v5  ;;  %v2751_v45 = vshrl.u32 %v2723_v55, 16 }
 0xb6e   : > { %v3230_v16 = vrot.slane %v3223_v58, 4  ;;  %v2744_v50 = vpack.i.b16 %v2705_v32, %v2687_v37  ;;  %v2753_v62 = vpack.i.b16 %v2752_v47, %v2751_v45 }
 0xb70   : > { %v8770_v10 = vpop.trf.xlu0  ;;  %v3231_v31 = vsel %vm691_vm9, %v3230_v16, %v3217_v25  ;;  %v3284_v58 = vunpack.c.l.b16 %v2744_v50  ;;  %v3305_v6 = vunpack.c.l.b16 %v2753_v62  ;;  %v2644_v25 = vperm.slane %v9862_v13, %v9586_v60 }
 0xb71   : > { %v3256_v46 = vrot.slane %v8770_v10, 4  ;;  %v3235_v36 = vperm.slane %v3231_v31, %v9594_v5 }
 0xb72   : > { %v3286_v51 = vpack.c.b16 %v3285_v3, %v3284_v58 }
 0xb73   : > { %v3257_v20 = vsel %vm691_vm9, %v3256_v46, %v8767_v19  ;;  %v2746_v19 = vshrl.u32 %v2705_v32, 16  ;;  %v3236_v46 = vrot.slane %v3235_v36, 4 }
 0xb74   : > { %v3261_v42 = vperm.slane %v3257_v20, %v9586_v60 }
 0xb75   : > { %v2747_v61 = vpack.i.b16 %v2746_v19, %v2745_v2 }
 0xb76   : > { %v3268_v41 = vrot.slane %v3261_v42, 4 }
 0xb77   : > { %v3304_v22 = vunpack.c.l.b16 %v2747_v61 }
 0xb78   : > { %v8772_v21 = vpop.trf.xlu0  ;;  %v3269_v11 = vsel %vm691_vm9, %v3268_v41, %v3255_v29 }
 0xb79   : > { %v3201_v24 = vsel %vm691_vm9, %v3200_v8, %v8772_v21  ;;  %v3273_v39 = vperm.slane %v3269_v11, %v9594_v5  ;;  %v3306_v8 = vpack.c.b16 %v3305_v6, %v3304_v22 }
 0xb7a   : > { %v3205_v63 = vperm.slane %v3201_v24, %v9586_v60 }
 0xb7b   : > { %v3274_v56 = vrot.slane %v3273_v39, 4 }
 0xb7c   : > { %v3225_v34 = vsel %vm691_vm9, %v3224_v28, %v3205_v63  ;;  %v2652_v63 = vrot.slane %v2644_v25, 4 }
 0xb7d   : > { %v3229_v18 = vperm.slane %v3225_v34, %v9594_v5  ;;  %v2640_v24 = vpop.permute.xlu1 %2639 }
 0xb7e   : > { %v2649_v41 = vperm.slane %v2640_v24, %v9586_v60 }
 0xb7f   : > { %v3237_v20 = vsel %vm691_vm9, %v3236_v46, %v3229_v18 }
 0xb80   : > { %v8773_v9 = vpop.trf.xlu0  ;;  %v3280_v1 = vshrl.u32 %v3237_v20, 16  ;;  %v2653_v57 = vsel %vm691_vm9, %v2649_v41, %v2652_v63  ;;  %v2650_v26 = vrot.slane %v2649_v41, 4 }
 0xb81   : > { %v3239_v10 = vsel %vm691_vm9, %v3238_v35, %v8773_v9  ;;  %v2661_v4 = vperm.slane %v2653_v57, %v9594_v5 }
 0xb82   : > { %v3243_v53 = vperm.slane %v3239_v10, %v9586_v60  ;;  %v2651_v28 = vsel %vm691_vm9, %v2650_v26, %v2644_v25 }
 0xb83   : > { %v2664_v27 = vrot.slane %v2661_v4, 4  ;;  %v2657_v29 = vperm.slane %v2651_v28, %v9594_v5  ;;  %v2668_v17 = vpack.c.bf16 %v2661_v4, %v2661_v4 }
 0xb84   : > { %v3263_v48 = vsel %vm691_vm9, %v3262_v43, %v3243_v53 }
 0xb85   : > { %v3267_v59 = vperm.slane %v3263_v48, %v9594_v5  ;;  %v2665_v31 = vsel %vm691_vm9, 0.0, %v2664_v27  ;;  %v2662_v30 = vrot.slane %v2657_v29, 4  ;;  %v2666_v11 = vpack.c.bf16 %v2657_v29, %v2657_v29 }
 0xb86   : > { %v2669_v32 = vpack.c.bf16 %v2665_v31, %v2665_v31 }
 0xb87   : > { %v3275_v54 = vsel %vm691_vm9, %v3274_v56, %v3267_v59  ;;  %v2663_v13 = vsel %vm691_vm9, 0.0, %v2662_v30 }
 0xb88   : > { %v3278_v0 = vpack.i.b16 %v3275_v54, %v3237_v20  ;;  %v3281_v33 = vshrl.u32 %v3275_v54, 16  ;;  %v2667_v34 = vpack.c.bf16 %v2663_v13, %v2663_v13 }
 0xb8a   : > { %3297 = vmatpush.bf16.msra.mxu2 %v3278_v0  ;;  %v3282_v42 = vpack.i.b16 %v3281_v33, %v3280_v1 }
 0xb8c   : > { %3317 = vmatpush.bf16.msrb.mxu3 %v3282_v42 }
 0xb8d   : > { %8409 = vmatmul.msk.bf16.vlgmr.msra.gmra.mxu2 %vm1470_vm10, %v3286_v51 }
 0xb8f   : > { %8410 = vmatmul.msk.bf16.vlgmr.msrb.gmra.mxu3 %vm1470_vm10, %v3306_v8 }
 0xc10   : > { %v10048_v12 = vpop.f32.mrf.mxu2 }
 0xc11   : > { %v3325_v14 = vsel %vm3324_vm14, %v10048_v12, -inf }
 0xc12   : > { %3326 = vmax.xlane.f32.xlu2 %v3325_v14  ;;  %v10052_v15 = vpop.f32.mrf.mxu3 }
 0xc13   : > { %v3331_v40 = vsel %vm3324_vm14, %v10052_v15, -inf }
 0xc18   : > { %v3301_v49 = vpop.f32.mrf.mxu2 }
 0xc19   : > { %v3328_v16 = vsel %vm3324_vm14, %v3301_v49, -inf }
 0xc1a   : > { %3332 = vmax.xlane.f32.xlu2 %v3331_v40  ;;  %3329 = vmax.xlane.f32.xlu0 %v3328_v16  ;;  %v10057_v21 = vpop.f32.mrf.mxu3 }
 0xc1b   : > { %v3334_v23 = vsel %vm3324_vm14, %v10057_v21, -inf }
 0xc22   : > { %3335 = vmax.xlane.f32.xlu2 %v3334_v23 }
 0xc43   : > { %8777 = vxpose.binary.xlu0.c.b16.start.end [1/2] (short) (narrow) %v2669_v32, %v2668_v17, 16 }
 0xc4b   : > { %8774 = vxpose.binary.xlu2.c.b16.start.end [1/2] (short) (narrow) %v2667_v34, %v2666_v11, 16 }
 0xc85   : > { %v10074_v9 = vpop.xlane.xlu2 %3326 }
 0xc8d   : > { %v3330_v55 = vpop.xlane.xlu0 %3329  ;;  %v10076_v39 = vpop.xlane.xlu2 %3332 }
 0xc8e   : > { %v3338_v35 = vsub.f32 %v3301_v49, %v3330_v55 }
 0xc90   : > { %v3343_v36 = vmul.f32 1.442695, %v3338_v35 }
 0xc92   : > { %9013 = vpow2.f32 %v3343_v36 }
 0xc95   : > { %v10078_v18 = vpop.xlane.xlu2 %3335 }
 0xc98   : > { %v10070_v37 = vpop.eup %9013 }
 0xc99   : > { %v3352_v38 = vsel %vm3324_vm14, %v10070_v37, 0.0 }
 0xcbc   : > { %3353 = vadd.xlane.f32.xlu2 %v3352_v38 }
 0xcec   : > { %v8775_v10 = vpop.trf.xlu2 }
 0xced   : > { %v3493_v53 = vshrl.u32 %v8775_v10, 16 }
 0xcef   : > { %v8778_v19 = vpop.trf.xlu0 }
 0xcf0   : > { %v3501_v52 = vshrl.u32 %v8778_v19, 16 }
 0xcf4   : > { %v8776_v43 = vpop.trf.xlu2 }
 0xcf5   : > { %v3491_v45 = vpack.i.b16 %v8776_v43, %v8775_v10  ;;  %v3494_v46 = vshrl.u32 %v8776_v43, 16 }
 0xcf7   : > { %v3495_v50 = vpack.i.b16 %v3494_v46, %v3493_v53  ;;  %v3505_v2 = vrot.slane %v3491_v45, 4  ;;  %v3510_v47 = vperm.slane %v3491_v45, %v9586_v60  ;;  %v8779_v48 = vpop.trf.xlu0 }
 0xcf8   : > { %v3499_v56 = vpack.i.b16 %v8779_v48, %v8778_v19  ;;  %v3502_v59 = vshrl.u32 %v8779_v48, 16 }
 0xcf9   : > { %v3506_v20 = vsel %vm691_vm9, %v9891_v7, %v3505_v2  ;;  %v3527_v61 = vrot.slane %v3510_v47, 4  ;;  %v3557_v54 = vrot.slane %v3495_v50, 4  ;;  %v3562_v58 = vperm.slane %v3495_v50, %v9586_v60 }
 0xcfa   : > { %v3514_v62 = vperm.slane %v3506_v20, %v9586_v60  ;;  %v3503_v0 = vpack.i.b16 %v3502_v59, %v3501_v52  ;;  %v3515_v1 = vrot.slane %v3499_v56, 4  ;;  %v3520_v33 = vperm.slane %v3499_v56, %v9586_v60 }
 0xcfb   : > { %v3558_v3 = vsel %vm691_vm9, %v9891_v7, %v3557_v54  ;;  %v3579_v22 = vrot.slane %v3562_v58, 4  ;;  %v3337_v54 = vsub.f32 %v10048_v12, %v10074_v9 }
 0xcfc   : > { %v3566_v42 = vperm.slane %v3558_v3, %v9586_v60  ;;  %v3516_v51 = vsel %vm691_vm9, %v9891_v7, %v3515_v1  ;;  %v3525_v6 = vrot.slane %v3520_v33, 4  ;;  %v3567_v8 = vrot.slane %v3503_v0, 4 }
 0xcfd   : > { %v3524_v14 = vperm.slane %v3516_v51, %v9586_v60  ;;  %v3572_v49 = vperm.slane %v3503_v0, %v9586_v60  ;;  %v3528_v40 = vsel %vm691_vm9, %v3520_v33, %v3527_v61  ;;  %v3539_v16 = vrot.slane %v3514_v62, 4 }
 0xcfe   : > { %v3568_v23 = vsel %vm691_vm9, %v9891_v7, %v3567_v8  ;;  %v3536_v24 = vperm.slane %v3528_v40, %v9594_v5  ;;  %v3591_v25 = vrot.slane %v3566_v42, 4  ;;  %v3526_v57 = vsel %vm691_vm9, %v3525_v6, %v3510_v47 }
 0xcff   : > { %v3576_v41 = vperm.slane %v3568_v23, %v9586_v60  ;;  %v3577_v63 = vrot.slane %v3572_v49, 4  ;;  %v3580_v4 = vsel %vm691_vm9, %v3572_v49, %v3579_v22  ;;  %v3540_v28 = vsel %vm691_vm9, %v3524_v14, %v3539_v16 }
 0xd00   : > { %v3551_v26 = vrot.slane %v3536_v24, 4  ;;  %v3588_v27 = vperm.slane %v3580_v4, %v9594_v5  ;;  %v3548_v31 = vperm.slane %v3540_v28, %v9594_v5  ;;  %v3532_v32 = vperm.slane %v3526_v57, %v9594_v5 }
 0xd01   : > { %v3578_v29 = vsel %vm691_vm9, %v3577_v63, %v3562_v58  ;;  %v3592_v17 = vsel %vm691_vm9, %v3576_v41, %v3591_v25  ;;  %v3537_v38 = vrot.slane %v3524_v14, 4  ;;  %v3589_v10 = vrot.slane %v3576_v41, 4 }
 0xd02   : > { %v3584_v30 = vperm.slane %v3578_v29, %v9594_v5  ;;  %v3603_v13 = vrot.slane %v3588_v27, 4  ;;  %v3600_v11 = vperm.slane %v3592_v17, %v9594_v5  ;;  %v3555_v34 = vrot.slane %v3548_v31, 4 }
 0xd03   : > { %v3552_v55 = vsel %vm691_vm9, 0, %v3551_v26  ;;  %v3538_v53 = vsel %vm691_vm9, %v3537_v38, %v3514_v62  ;;  %v3590_v45 = vsel %vm691_vm9, %v3589_v10, %v3566_v42  ;;  %v3549_v48 = vrot.slane %v3532_v32, 4 }
 0xd04   : > { %8801 = vxpose.binary.xlu2.c.b16.start.end [1/2] (short) (narrow) %v3584_v30, %v3532_v32, 16  ;;  %v3604_v35 = vsel %vm691_vm9, 0, %v3603_v13  ;;  %v3607_v36 = vrot.slane %v3600_v11, 4  ;;  %v3556_v19 = vsel %vm691_vm9, 0, %v3555_v34  ;;  %v3544_v46 = vperm.slane %v3538_v53, %v9594_v5 }
 0xd05   : > { %8783 = vxpose.binary.xlu0.c.b16.start.end [1/2] (short) (narrow) %v3604_v35, %v3552_v55, 16  ;;  %v3596_v50 = vperm.slane %v3590_v45, %v9594_v5  ;;  %v3601_v52 = vrot.slane %v3584_v30, 4  ;;  %v3550_v20 = vsel %vm691_vm9, 0, %v3549_v48  ;;  %v3341_v58 = vmul.f32 1.442695, %v3337_v54 }
 0xd06   : > { %v3608_v43 = vsel %vm691_vm9, 0, %v3607_v36  ;;  %v3553_v2 = vrot.slane %v3544_v46, 4  ;;  %v3339_v62 = vsub.f32 %v10052_v15, %v10076_v39  ;;  %v3340_v33 = vsub.f32 %v10057_v21, %v10078_v18 }
 0xd07   : > { %8780 = vxpose.binary.xlu1.c.b16.start.end [1/2] (short) (narrow) %v3608_v43, %v3556_v19, 16  ;;  %v3605_v47 = vrot.slane %v3596_v50, 4  ;;  %v3602_v61 = vsel %vm691_vm9, 0, %v3601_v52  ;;  %9015 = vpow2.f32 %v3341_v58 }
 0xd08   : > { %v3554_v56 = vsel %vm691_vm9, 0, %v3553_v2  ;;  %v3345_v0 = vmul.f32 1.442695, %v3339_v62  ;;  %v3347_v22 = vmul.f32 1.442695, %v3340_v33 }
 0xd09   : > { %v3606_v59 = vsel %vm691_vm9, 0, %v3605_v47 }
 0xd0a   : > { %9017 = vpow2.f32 %v3345_v0 }
 0xd0b   : > { %9019 = vpow2.f32 %v3347_v22 }
 0xd0d   : > { %v9016_v1 = vpop.eup %9015 }
 0xd0e   : > { %v3349_v3 = vsel %vm3324_vm14, %v9016_v1, 0.0 }
 0xd10   : > { %v10127_v42 = vpop.eup %9017 }
 0xd11   : > { %v3355_v12 = vsel %vm3324_vm14, %v10127_v42, 0.0  ;;  %v10131_v9 = vpop.eup %9019 }
 0xd12   : > { %v3358_v15 = vsel %vm3324_vm14, %v10131_v9, 0.0 }
 0xd15   : > { %8786 = vxpose.binary.xlu0.c.b16.start.end [1/2] (short) (narrow) %v3606_v59, %v3554_v56, 16 }
 0xd17   : > { %8792 = vxpose.binary.xlu1.c.b16.start.end [1/2] (short) (narrow) %v3602_v61, %v3550_v20, 16 }
 0xd25   : > { %8789 = vxpose.binary.xlu0.c.b16.start.end [1/2] (short) (narrow) %v3600_v11, %v3548_v31, 16 }
 0xd2f   : > { %v3354_v51 = vpop.xlane.xlu2 %3353 }
 0xd30   : > { %9021 = vrcp.f32 %v3354_v51  ;;  %vm3381_vm13 = vweird.f32 %v3354_v51  ;;  %v3385_v41 = vand.u32 2147483647, %v3354_v51 }
 0xd32   : > { %vm3386_vm11 = vcmp.eq.f32.partialorder %v3385_v41, 8.507059e+37 }
 0xd35   : > { %8795 = vxpose.binary.xlu0.c.b16.start.end [1/2] (short) (narrow) %v3588_v27, %v3536_v24, 16  ;;  %v3387_v24 = vand.u32 2147483648, %v3354_v51 }
 0xd36   : > { %v9022_v6 = vpop.eup %9021 }
 0xd37   : > { %v3377_v14 = vmul.f32 %v9022_v6, %v3354_v51  ;;  %vm3382_vm15 = vweird.f32 %v9022_v6  ;;  %v3388_v26 = vor.u32 1.1754944e-38, %v3387_v24 }
 0xd38   : > { %vm3383_vm12 = vmor %vm3381_vm13, %vm3382_vm15 }
 0xd39   : > { %v3378_v49 = vsub.f32 1.0, %v3377_v14 }
 0xd3b   : > { %v3379_v16 = vmul.f32 %v9022_v6, %v3378_v49 }
 0xd3d   : > { %v3380_v23 = vadd.f32 %v9022_v6, %v3379_v16 }
 0xd3f   : > { %v3384_v4 = vsel %vm3383_vm12, %v9022_v6, %v3380_v23 }
 0xd40   : > { %v3389_v31 = vsel %vm3386_vm11, %v3388_v26, %v3384_v4 }
 0xd41   : > { %v3390_v13 = vmul.f32 %v10070_v37, %v3389_v31 }
 0xd43   : > { %v3422_v19 = vpack.c.bf16 %v3390_v13, %v3390_v13 }
 0xd45   : > { %v3950_v47 = vunpack.c.l.b16 %v3422_v19 }
 0xd77   : > { %3350 = vadd.xlane.f32.xlu1 %v3349_v3 }
 0xd7f   : > { %3356 = vadd.xlane.f32.xlu1 %v3355_v12 }
 0xd87   : > { %3359 = vadd.xlane.f32.xlu1 %v3358_v15 }
 0xdb1   : > { %v8784_v23 = vpop.trf.xlu0 }
 0xdb2   : > { %v3871_v4 = vrot.slane %v8784_v23, 4 }
 0xdb3   : > { %v10135_v39 = vpop.trf.xlu1 }
 0xdb4   : > { %v3883_v26 = vrot.slane %v10135_v39, 4 }
 0xdb9   : > { %v8785_v24 = vpop.trf.xlu0 }
 0xdbb   : > { %v10137_v21 = vpop.trf.xlu1 }
 0xdc1   : > { %8798 = vxpose.binary.xlu1.c.b16.start.end [1/2] (short) (narrow) %v3596_v50, %v3544_v46, 16 }
 0xdc3   : > { %v10139_v18 = vpop.trf.xlu1 }
 0xdcb   : > { %v10141_v8 = vpop.trf.xlu1 }
 0xdea   : > { %v3351_v40 = vpop.xlane.xlu1 %3350 }
 0xdeb   : > { %9023 = vrcp.f32 %v3351_v40  ;;  %v3372_v29 = vand.u32 2147483648, %v3351_v40  ;;  %v3370_v17 = vand.u32 2147483647, %v3351_v40  ;;  %vm3366_vm7 = vweird.f32 %v3351_v40 }
 0xded   : > { %v3373_v11 = vor.u32 1.1754944e-38, %v3372_v29  ;;  %vm3371_vm15 = vcmp.eq.f32.partialorder %v3370_v17, 8.507059e+37  ;;  %v3909_v17 = vrot.slane %v8785_v24, 4 }
 0xdf1   : > { %v9024_v25 = vpop.eup %9023 }
 0xdf2   : > { %v3362_v63 = vmul.f32 %v9024_v25, %v3351_v40  ;;  %v3357_v57 = vpop.xlane.xlu1 %3356  ;;  %vm3367_vm8 = vweird.f32 %v9024_v25 }
 0xdf3   : > { %9025 = vrcp.f32 %v3357_v57  ;;  %vm3368_vm6 = vmor %vm3366_vm7, %vm3367_vm8  ;;  %v3402_v53 = vand.u32 2147483648, %v3357_v57  ;;  %vm3396_vm11 = vweird.f32 %v3357_v57  ;;  %v3400_v50 = vand.u32 2147483647, %v3357_v57 }
 0xdf4   : > { %v3363_v27 = vsub.f32 1.0, %v3362_v63 }
 0xdf5   : > { %v3403_v56 = vor.u32 1.1754944e-38, %v3402_v53 }
 0xdf6   : > { %v3364_v28 = vmul.f32 %v9024_v25, %v3363_v27  ;;  %v8802_v27 = vpop.trf.xlu2 }
 0xdf8   : > { %v3365_v32 = vadd.f32 %v9024_v25, %v3364_v28 }
 0xdf9   : > { %v9026_v30 = vpop.eup %9025 }
 0xdfa   : > { %v3392_v34 = vmul.f32 %v9026_v30, %v3357_v57  ;;  %v3360_v55 = vpop.xlane.xlu1 %3359  ;;  %v3369_v35 = vsel %vm3368_vm6, %v9024_v25, %v3365_v32  ;;  %vm3397_vm12 = vweird.f32 %v9026_v30  ;;  %vm3401_vm6 = vcmp.eq.f32.partialorder %v3400_v50, 8.507059e+37  ;;  %v8787_v25 = vpop.trf.xlu0 }
 0xdfb   : > { %9027 = vrcp.f32 %v3360_v55  ;;  %v3374_v38 = vsel %vm3371_vm15, %v3373_v11, %v3369_v35  ;;  %vm3398_vm7 = vmor %vm3396_vm11, %vm3397_vm12  ;;  %v3417_v61 = vand.u32 2147483648, %v3360_v55  ;;  %v3415_v0 = vand.u32 2147483647, %v3360_v55 }
 0xdfc   : > { %v3393_v36 = vsub.f32 1.0, %v3392_v34  ;;  %v3375_v10 = vmul.f32 %v9016_v1, %v3374_v38  ;;  %vm3411_vm13 = vweird.f32 %v3360_v55  ;;  %v3884_v29 = vsel %vm691_vm9, %v3883_v26, %v8787_v25 }
 0xdfd   : > { %v3418_v3 = vor.u32 1.1754944e-38, %v3417_v61  ;;  %vm3416_vm12 = vcmp.eq.f32.partialorder %v3415_v0, 8.507059e+37  ;;  %v3921_v11 = vrot.slane %v10137_v21, 4 }
 0xdfe   : > { %v3394_v43 = vmul.f32 %v9026_v30, %v3393_v36  ;;  %v3421_v45 = vpack.c.bf16 %v3375_v10, %v3375_v10  ;;  %v8803_v19 = vpop.trf.xlu2 }
 0xe00   : > { %v3395_v46 = vadd.f32 %v9026_v30, %v3394_v43  ;;  %v3949_v37 = vunpack.c.l.b16 %v3421_v45 }
 0xe01   : > { %v9028_v2 = vpop.eup %9027 }
 0xe02   : > { %v3407_v48 = vmul.f32 %v9028_v2, %v3360_v55  ;;  %v3399_v52 = vsel %vm3398_vm7, %v9026_v30, %v3395_v46  ;;  %v3951_v59 = vpack.c.b16 %v3950_v47, %v3949_v37  ;;  %vm3412_vm8 = vweird.f32 %v9028_v2  ;;  %v8788_v41 = vpop.trf.xlu0 }
 0xe03   : > { %v3404_v58 = vsel %vm3401_vm6, %v3403_v56, %v3399_v52  ;;  %vm3413_vm15 = vmor %vm3411_vm13, %vm3412_vm8  ;;  %v3888_v30 = vperm.slane %v3884_v29, %v9586_v60  ;;  %v3922_v53 = vsel %vm691_vm9, %v3921_v11, %v8788_v41 }
 0xe04   : > { %v3408_v20 = vsub.f32 1.0, %v3407_v48  ;;  %v3956_v54 = vsel %vm3324_vm14, %v3951_v59, 0  ;;  %v3405_v33 = vmul.f32 %v10127_v42, %v3404_v58 }
 0xe05   : > { %3965 = vmatpush.bf16.xpose.msrb.mxu0 %v3956_v54  ;;  %v3895_v10 = vrot.slane %v3888_v30, 4 }
 0xe06   : > { %v3409_v62 = vmul.f32 %v9028_v2, %v3408_v20  ;;  %v3423_v51 = vpack.c.bf16 %v3405_v33, %v3405_v33 }
 0xe08   : > { %v3410_v1 = vadd.f32 %v9028_v2, %v3409_v62  ;;  %v3974_v14 = vunpack.c.l.b16 %v3423_v51 }
 0xe0a   : > { %v3414_v22 = vsel %vm3413_vm15, %v9028_v2, %v3410_v1  ;;  %v8790_v42 = vpop.trf.xlu0 }
 0xe0b   : > { %v3419_v12 = vsel %vm3416_vm12, %v3418_v3, %v3414_v22  ;;  %v3877_v34 = vrot.slane %v8790_v42, 4  ;;  %vm11022_vm12 = vcmask 1046534  }
 0xe0c   : > { %v3420_v15 = vmul.f32 %v10131_v9, %v3419_v12  ;;  %v3872_v9 = vsel %vm691_vm9, %v3871_v4, %v10139_v18  ;;  %v3910_v18 = vsel %vm691_vm9, %v3909_v17, %v10141_v8  ;;  %v3926_v8 = vperm.slane %v3922_v53, %v9586_v60 }
 0xe0d   : > { %v3876_v31 = vperm.slane %v3872_v9, %v9586_v60  ;;  %v3914_v45 = vperm.slane %v3910_v18, %v9586_v60 }
 0xe0e   : > { %v3424_v6 = vpack.c.bf16 %v3420_v15, %v3420_v15  ;;  %v3933_v54 = vrot.slane %v3926_v8, 4 }
 0xe0f   : > { %v3889_v55 = vrot.slane %v3876_v31, 4  ;;  %v3927_v52 = vrot.slane %v3914_v45, 4 }
 0xe10   : > { %v3975_v49 = vunpack.c.l.b16 %v3424_v6 }
 0xe12   : > { %v3976_v40 = vpack.c.b16 %v3975_v49, %v3974_v14  ;;  %v8791_v63 = vpop.trf.xlu0 }
 0xe13   : > { %v3915_v37 = vrot.slane %v8791_v63, 4 }
 0xe14   : > { %v3981_v16 = vsel %vm3324_vm14, %v3976_v40, 0 }
 0xe15   : > { %3990 = vmatpush.bf16.xpose.msrb.mxu1 %v3981_v16 }
 0xe1a   : > { %v8796_v57 = vpop.trf.xlu0 }
 0xe1b   : > { %v3865_v28 = vrot.slane %v8796_v57, 4 }
 0xe1d   : > { %v3866_v32 = vsel %vm691_vm9, %v3865_v28, %v8802_v27 }
 0xe1e   : > { %v3870_v39 = vperm.slane %v3866_v32, %v9586_v60 }
 0xe20   : > { %v3890_v21 = vsel %vm691_vm9, %v3889_v55, %v3870_v39 }
 0xe21   : > { %v3894_v47 = vperm.slane %v3890_v21, %v9594_v5 }
 0xe22   : > { %v8797_v13 = vpop.trf.xlu0 }
 0xe23   : > { %v3903_v36 = vrot.slane %v8797_v13, 4  ;;  %v8535_v13 = vld [vmem:[#allocation10 + $0x18] sm:$0xff] }
 0xe24   : > { %4273 = vmatpush.bf16.msrb.mxu2 %v8535_v13 }
 0xe25   : > { %v3904_v50 = vsel %vm691_vm9, %v3903_v36, %v8803_v19 }
 0xe26   : > { %v3908_v56 = vperm.slane %v3904_v50, %v9586_v60 }
 0xe28   : > { %v3928_v62 = vsel %vm691_vm9, %v3927_v52, %v3908_v56 }
 0xe29   : > { %v3932_v33 = vperm.slane %v3928_v62, %v9594_v5 }
 0xe6d   : > { %v8799_v35 = vpop.trf.xlu1 }
 0xe6e   : > { %v3878_v38 = vsel %vm691_vm9, %v3877_v34, %v8799_v35 }
 0xe6f   : > { %v3882_v43 = vperm.slane %v3878_v38, %v9586_v60 }
 0xe71   : > { %v3896_v46 = vsel %vm691_vm9, %v3895_v10, %v3882_v43 }
 0xe72   : > { %v3900_v2 = vperm.slane %v3896_v46, %v9594_v5 }
 0xe74   : > { %v3901_v48 = vrot.slane %v3900_v2, 4 }
 0xe75   : > { %v8800_v59 = vpop.trf.xlu1 }
 0xe76   : > { %v3916_v20 = vsel %vm691_vm9, %v3915_v37, %v8800_v59  ;;  %v3902_v61 = vsel %vm691_vm9, %v3901_v48, %v3894_v47 }
 0xe77   : > { %v3920_v58 = vperm.slane %v3916_v20, %v9586_v60  ;;  %v3944_v15 = vshrl.u32 %v3902_v61, 16 }
 0xe79   : > { %v3934_v0 = vsel %vm691_vm9, %v3933_v54, %v3920_v58 }
 0xe7a   : > { %v3938_v1 = vperm.slane %v3934_v0, %v9594_v5 }
 0xe7c   : > { %v3939_v3 = vrot.slane %v3938_v1, 4 }
 0xe7e   : > { %v3940_v22 = vsel %vm691_vm9, %v3939_v3, %v3932_v33 }
 0xe7f   : > { %v3943_v12 = vpack.i.b16 %v3940_v22, %v3902_v61  ;;  %v3945_v51 = vshrl.u32 %v3940_v22, 16 }
 0xe81   : > { %8411 = vmatmul.msk.bf16.vlgmr.msrb.gmra.mxu0 %vm3324_vm14, %v3943_v12  ;;  %v3946_v6 = vpack.i.b16 %v3945_v51, %v3944_v15 }
 0xe83   : > { %8412 = vmatmul.msk.bf16.vlgmr.msrb.gmra.mxu1 %vm3324_vm14, %v3946_v6 }
 0xefe   : > { %v3967_v14 = vpop.f32.mrf.mxu0 }
 0xf00   : > { %v3992_v49 = vpop.f32.mrf.mxu1 }
 0xf01   : > { %v8804_v40 = vpack.i.bf16 %v3992_v49, %v3967_v14 }
 0xf03   : > { %8805 = vxpose.xlu0.b32.start [1/2] (short) (narrow) %v8804_v40, 16 }
 0xf06   : > { %v3969_v16 = vpop.f32.mrf.mxu0 }
 0xf08   : > { %v3994_v23 = vpop.f32.mrf.mxu1 }
 0xf09   : > { %v8806_v24 = vpack.i.bf16 %v3994_v23, %v3969_v16 }
 0xf0b   : > { %8807 = vxpose.xlu0.b32.end [2/2] (short) (narrow) %v8806_v24, 16 }
 0xfa7   : > { %v8808_v25 = vpop.trf.xlu0 }
 0xfa8   : > { %v8812_v41 = vunpack.i.h.bf16 %v8808_v25  ;;  %v8809_v42 = vunpack.i.l.bf16 %v8808_v25 }
 0xfaa   : > { %v4071_v63 = vrot.slane %v8812_v41, 4  ;;  %v4076_v57 = vperm.slane %v8812_v41, %v9586_v60  ;;  %v4061_v4 = vrot.slane %v8809_v42, 4  ;;  %v4066_v26 = vperm.slane %v8809_v42, %v9586_v60 }
 0xfac   : > { %v4072_v27 = vsel %vm691_vm9, 0.0, %v4071_v63  ;;  %v4081_v9 = vrot.slane %v4076_v57, 4  ;;  %v4062_v28 = vsel %vm691_vm9, 0.0, %v4061_v4  ;;  %v4083_v29 = vrot.slane %v4066_v26, 4 }
 0xfad   : > { %v4080_v31 = vperm.slane %v4072_v27, %v9586_v60  ;;  %v4070_v17 = vperm.slane %v4062_v28, %v9586_v60 }
 0xfae   : > { %v4082_v32 = vsel %vm691_vm9, %v4081_v9, %v4066_v26  ;;  %v4084_v30 = vsel %vm691_vm9, %v4076_v57, %v4083_v29 }
 0xfaf   : > { %v4093_v11 = vrot.slane %v4080_v31, 4  ;;  %v4088_v34 = vperm.slane %v4082_v32, %v9594_v5  ;;  %v4092_v55 = vperm.slane %v4084_v30, %v9594_v5  ;;  %v4095_v39 = vrot.slane %v4070_v17, 4  ;;  %v8813_v35 = vpop.trf.xlu0 }
 0xfb0   : > { %v8817_v18 = vunpack.i.h.bf16 %v8813_v35  ;;  %v8814_v36 = vunpack.i.l.bf16 %v8813_v35 }
 0xfb1   : > { %v4094_v38 = vsel %vm691_vm9, %v4093_v11, %v4070_v17  ;;  %v4096_v10 = vsel %vm691_vm9, %v4080_v31, %v4095_v39  ;;  %v4105_v19 = vrot.slane %v4088_v34, 4  ;;  %v4107_v43 = vrot.slane %v4092_v55, 4 }
 0xfb2   : > { %v4100_v53 = vperm.slane %v4094_v38, %v9594_v5  ;;  %v4104_v45 = vperm.slane %v4096_v10, %v9594_v5  ;;  %v4123_v21 = vrot.slane %v8817_v18, 4  ;;  %v4128_v46 = vperm.slane %v8817_v18, %v9586_v60 }
 0xfb3   : > { %v4108_v50 = vsel %vm691_vm9, 0.0, %v4107_v43  ;;  %v4113_v2 = vrot.slane %v8814_v36, 4  ;;  %v4118_v59 = vperm.slane %v8814_v36, %v9586_v60  ;;  %v4106_v20 = vsel %vm691_vm9, 0.0, %v4105_v19 }
 0xfb4   : > { %v4111_v8 = vrot.slane %v4104_v45, 4  ;;  %v4170_v37 = vrot.slane %v4108_v50, 4  ;;  %v4124_v47 = vsel %vm691_vm9, 0.0, %v4123_v21  ;;  %v4133_v52 = vrot.slane %v4128_v46, 4 }
 0xfb5   : > { %v4132_v48 = vperm.slane %v4124_v47, %v9586_v60  ;;  %v4114_v56 = vsel %vm691_vm9, 0.0, %v4113_v2  ;;  %v4109_v61 = vrot.slane %v4100_v53, 4  ;;  %v4135_v33 = vrot.slane %v4118_v59, 4 }
 0xfb6   : > { %v4112_v54 = vsel %vm691_vm9, 0.0, %v4111_v8  ;;  %v4122_v58 = vperm.slane %v4114_v56, %v9586_v60  ;;  %v4134_v1 = vsel %vm691_vm9, %v4133_v52, %v4118_v59  ;;  %v4171_v12 = vsel %vm691_vm9, %v4170_v37, %v4106_v20 }
 0xfb7   : > { %v4181_v62 = vrot.slane %v4112_v54, 4  ;;  %v4145_v0 = vrot.slane %v4132_v48, 4  ;;  %v4140_v3 = vperm.slane %v4134_v1, %v9594_v5  ;;  %v4136_v15 = vsel %vm691_vm9, %v4128_v46, %v4135_v33 }
 0xfb8   : > { %v4147_v22 = vrot.slane %v4122_v58, 4  ;;  %v4175_v6 = vperm.slane %v4171_v12, %v9586_v60  ;;  %v4144_v14 = vperm.slane %v4136_v15, %v9594_v5  ;;  %v4110_v16 = vsel %vm691_vm9, 0.0, %v4109_v61 }
 0xfb9   : > { %v4146_v51 = vsel %vm691_vm9, %v4145_v0, %v4122_v58  ;;  %v4165_v23 = vsel %vm691_vm9, %v4107_v43, %v4088_v34  ;;  %v4176_v25 = vsel %vm691_vm9, %v4111_v8, %v4100_v53  ;;  %v4182_v41 = vsel %vm691_vm9, %v4181_v62, %v4110_v16  ;;  %v8534_v62 = vld [vmem:[#allocation10 + $0x10] sm:$0xff] }
 0xfba   : > { %v4148_v49 = vsel %vm691_vm9, %v4132_v48, %v4147_v22  ;;  %v4152_v40 = vperm.slane %v4146_v51, %v9594_v5  ;;  %v4157_v42 = vrot.slane %v4140_v3, 4  ;;  %v4159_v63 = vrot.slane %v4144_v14, 4  ;;  %4274 = vmatpush.bf16.msrb.mxu2 %v8534_v62  ;;  %v9065_v51 = vld [vmem:[%s9515_s14] sm:$0xff] }
 0xfbb   : > { %v4156_v24 = vperm.slane %v4148_v49, %v9594_v5  ;;  %v4186_v57 = vperm.slane %v4182_v41, %v9586_v60  ;;  %v4187_v4 = vrot.slane %v4175_v6, 4  ;;  %v4169_v28 = vperm.slane %v4165_v23, %v9586_v60 }
 0xfbc   : > { %v4161_v26 = vrot.slane %v4152_v40, 4  ;;  %v4160_v9 = vsel %vm691_vm9, 0.0, %v4159_v63  ;;  %v4180_v17 = vperm.slane %v4176_v25, %v9586_v60  ;;  %v4158_v30 = vsel %vm691_vm9, 0.0, %v4157_v42 }
 0xfbd   : > { %v4163_v27 = vrot.slane %v4156_v24, 4  ;;  %v4208_v31 = vrot.slane %v4160_v9, 4  ;;  %v4193_v32 = vrot.slane %v4186_v57, 4  ;;  %v4188_v11 = vsel %vm691_vm9, %v4187_v4, %v4169_v28 }
 0xfbe   : > { %v4203_v34 = vsel %vm691_vm9, %v4159_v63, %v4140_v3  ;;  %v4162_v55 = vsel %vm691_vm9, 0.0, %v4161_v26  ;;  %v4192_v19 = vperm.slane %v4188_v11, %v9594_v5  ;;  %v8528_v11 = vld [vmem:[#allocation8 + $0x20] sm:$0xff] }
 0xfbf   : > { %v4164_v29 = vsel %vm691_vm9, 0.0, %v4163_v27  ;;  %v4194_v39 = vsel %vm691_vm9, %v4193_v32, %v4180_v17  ;;  %v4209_v35 = vsel %vm691_vm9, %v4208_v31, %v4158_v30  ;;  %v4214_v38 = vsel %vm691_vm9, %v4163_v27, %v4152_v40  ;;  %v9066_v40 = vld [vmem:[%s9515_s14 + $0x8] sm:$0xff]  ;;  %s8198_s14 = scalar_lea.hbm %s11003_s7, %s8540_s30 }
 0xfc0   : > { %v4219_v13 = vrot.slane %v4164_v29, 4  ;;  %v4198_v18 = vperm.slane %v4194_v39, %v9594_v5  ;;  %v4213_v36 = vperm.slane %v4209_v35, %v9586_v60  ;;  %v4207_v53 = vperm.slane %v4203_v34, %v9586_v60  ;;  %v8521_v17 = vld [vmem:[#allocation7 + $0x28] sm:$0xff]  ;;  %v8512_v34 = vld [vmem:[#allocation5 + $0x20] sm:$0xff]  ;;  %s8201_s8 = sshll.u32 %s8198_s14, 4  ;;  %s8202_s8 = int_to_ptr.hbm [resolvable:$true] %s8201_s8 }
 0xfc1   : > { %v4218_v46 = vperm.slane %v4214_v38, %v9586_v60  ;;  %v4201_v37 = vrot.slane %v4192_v19, 4  ;;  %v8529_v32 = vld [vmem:[#allocation8 + $0x28] sm:$0xff]  ;;  %4515 = vmatpush.bf16.msra.mxu0 %v8521_v17  ;;  %s9261_s10 = sshra.s32 %s8202_s8, 4  ;;  %s9262_s10 = int_to_ptr.hbm [resolvable:$true] %s9261_s10 }
 0xfc2   : > { %v4220_v10 = vsel %vm691_vm9, %v4219_v13, %v4162_v55  ;;  %v4225_v45 = vrot.slane %v4213_v36, 4  ;;  %v4199_v21 = vrot.slane %v4198_v18, 4  ;;  %v8513_v30 = vld [vmem:[#allocation5 + $0x28] sm:$0xff]  ;;  %4540 = vmatpush.bf16.msra.mxu1 %v8529_v32  ;;  %v8520_v13 = vld [vmem:[#allocation7 + $0x20] sm:$0xff]  ;;  %s9263_s23 = scalar_lea.hbm %s9262_s10, 16  ;;  %p9268_p13 = scmp.lt.s32.totalorder %s9262_s10, %s11003_s7 }
 0xfc3   : > { %v4224_v43 = vperm.slane %v4220_v10, %v9586_v60  ;;  %v4202_v20 = vsel %vm691_vm9, %v4198_v18, %v4201_v37  ;;  %4462 = vmatpush.bf16.msra.mxu3 %v8513_v30  ;;  %p9264_p1 = scmp.ne.s32.totalorder %s9262_s10, %s9263_s23  ;;  %p9269_p7 = scmp.lt.s32.totalorder %s9267_s13, %s9263_s23 }
 0xfc4   : > { %v4226_v2 = vsel %vm691_vm9, %v4225_v45, %v4207_v53  ;;  %v4200_v8 = vsel %vm691_vm9, %v4199_v21, %v4192_v19  ;;  %v8995_v21 = vld [vmem:[%s11001_s5 + $0x1] ss:$0 sm:$0xff] }
 0xfc5   : > { %v4231_v50 = vrot.slane %v4224_v43, 4  ;;  %v4230_v47 = vperm.slane %v4226_v2, %v9594_v5  ;;  %4516 = vmatpush.bf16.msra.mxu0 %v8520_v13  ;;  %v8996_v2 = vld [vmem:[#allocation11 + $0x1] ss:$0 sm:$0xff]  ;;  %p9265_p3 = pnand %p9264_p1, %p9476_p0  ;;  %p9270_p8 = por %p9269_p7, %p9268_p13 }
 0xfc6   : > { %4541 = vmatpush.bf16.msra.mxu1 %v8528_v11 }
 0xfc7   : > { %v4232_v48 = vsel %vm691_vm9, %v4231_v50, %v4218_v46  ;;  %v4239_v56 = vrot.slane %v4230_v47, 4  ;;  %4463 = vmatpush.bf16.msra.mxu3 %v8512_v34  ;;  %p9266_p5 = pneg %p9265_p3 }
 0xfc8   : > { %v4236_v52 = vperm.slane %v4232_v48, %v9594_v5 }
 0xfc9   : > { %p9271_p9 = pnand %p9270_p8, %p9266_p5 }
 0xfca   : > { %v4237_v59 = vrot.slane %v4236_v52, 4  ;;  %v4240_v61 = vsel %vm691_vm9, %v4236_v52, %v4239_v56 }
 0xfcb   : > { %v8818_v54 = vpack.i.bf16 %v4240_v61, %v4202_v20 }
 0xfcc   : > { %v4238_v58 = vsel %vm691_vm9, %v4237_v59, %v4230_v47 }
 0xfcd   : > { %8819 = vrot.lane.b32.xlu1 %v8818_v54, %s9341_s15 }
0x103f   : > { %v8820_v0 = vpop.permute.xlu1 %8819 }
0x1040   : > { %v8822_v1 = vunpack.i.h.bf16 %v8820_v0  ;;  %v8821_v33 = vunpack.i.l.bf16 %v8820_v0 }
0x1042   : > { %v4250_v3 = vsel %vm1470_vm10, %v4238_v58, %v8822_v1  ;;  %v4249_v22 = vsel %vm1470_vm10, %v4200_v8, %v8821_v33 }
0x1043   : > { %v4251_v12 = vpack.c.bf16 %v4250_v3, %v4249_v22 }
0x1045   : > { %8421 = vmatmul.msk.bf16.vlgmr.msrb.gmra.mxu2 %vm528_vm1, %v4251_v12 }
0x10c8   : > { %v4276_v15 = vpop.f32.mrf.mxu2 }
0x10c9   : > { %v4277_v6 = vadd.f32 %v9065_v51, %v4276_v15 }
0x10cb   : > { %v4281_v14 = vsel %vm528_vm1, %v4277_v6, 0.0 }
0x10cc   : > { %4282 = vadd.xlane.f32.xlu0 %v4281_v14 }
0x10d0   : > { %v4278_v49 = vpop.f32.mrf.mxu2 }
0x10d1   : > { %v4279_v16 = vadd.f32 %v9066_v40, %v4278_v49 }
0x10d3   : > { %v4284_v23 = vsel %vm528_vm1, %v4279_v16, 0.0 }
0x10d4   : > { %4285 = vadd.xlane.f32.xlu2 %v4284_v23 }
0x113f   : > { %v4283_v24 = vpop.xlane.xlu0 %4282 }
0x1140   : > { %v4287_v25 = vmul.f32 %v4283_v24, %v9846_v44 }
0x1142   : > { %v4289_v41 = vsub.f32 %v4277_v6, %v4287_v25 }
0x1144   : > { %v4291_v42 = vmul.f32 %v4289_v41, %v4289_v41 }
0x1146   : > { %v4293_v63 = vsel %vm528_vm1, %v4291_v42, 0.0 }
0x1147   : > { %v4286_v57 = vpop.xlane.xlu2 %4285  ;;  %4294 = vadd.xlane.f32.xlu1 %v4293_v63 }
0x1148   : > { %v4288_v4 = vmul.f32 %v4286_v57, %v9846_v44 }
0x114a   : > { %v4290_v26 = vsub.f32 %v4279_v16, %v4288_v4 }
0x114c   : > { %v4292_v27 = vmul.f32 %v4290_v26, %v4290_v26 }
0x114e   : > { %v4296_v9 = vsel %vm528_vm1, %v4292_v27, 0.0 }
0x114f   : > { %4297 = vadd.xlane.f32.xlu1 %v4296_v9 }
0x11ba   : > { %v4295_v28 = vpop.xlane.xlu1 %4294 }
0x11bb   : > { %v4299_v29 = vmul.f32 %v4295_v28, %v9846_v44 }
0x11bd   : > { %v4301_v31 = vadd.f32 1e-06, %v4299_v29 }
0x11bf   : > { %9029 = vrsqrt.f32 %v4301_v31  ;;  %vm4309_vm7 = vweird.f32 %v4301_v31 }
0x11c2   : > { %v4298_v55 = vpop.xlane.xlu1 %4297 }
0x11c3   : > { %v4300_v39 = vmul.f32 %v4298_v55, %v9846_v44 }
0x11c5   : > { %v9030_v35 = vpop.eup %9029  ;;  %v4302_v18 = vadd.f32 1e-06, %v4300_v39 }
0x11c6   : > { %v4304_v36 = vmul.f32 %v9030_v35, %v4301_v31  ;;  %vm4310_vm11 = vweird.f32 %v9030_v35 }
0x11c7   : > { %9031 = vrsqrt.f32 %v4302_v18  ;;  %vm4311_vm6 = vmor %vm4309_vm7, %vm4310_vm11  ;;  %vm4319_vm13 = vweird.f32 %v4302_v18  ;;  %vm11023_vm11 = vcmask 1047559  }
0x11c8   : > { %v4305_v38 = vmul.f32 %v9030_v35, %v4304_v36 }
0x11ca   : > { %v4306_v10 = vmul.f32 0.5, %v4305_v38 }
0x11cc   : > { %v4307_v19 = vsub.f32 1.5, %v4306_v10 }
0x11cd   : > { %v9032_v43 = vpop.eup %9031 }
0x11ce   : > { %v4308_v53 = vmul.f32 %v9030_v35, %v4307_v19  ;;  %v4314_v45 = vmul.f32 %v9032_v43, %v4302_v18  ;;  %vm4320_vm8 = vweird.f32 %v9032_v43 }
0x11cf   : > { %vm4321_vm15 = vmor %vm4319_vm13, %vm4320_vm8 }
0x11d0   : > { %v4312_v46 = vsel %vm4311_vm6, %v9030_v35, %v4308_v53  ;;  %v4315_v50 = vmul.f32 %v9032_v43, %v4314_v45 }
0x11d1   : > { %v4323_v8 = vmul.f32 %v4312_v46, %v4289_v41 }
0x11d2   : > { %v4316_v37 = vmul.f32 0.5, %v4315_v50 }
0x11d3   : > { %v4328_v47 = vmul.f32 %v8995_v21, %v4323_v8 }
0x11d4   : > { %v4317_v48 = vsub.f32 1.5, %v4316_v37 }
0x11d5   : > { %v10261_v52 = vadd.f32 %v8996_v2, %v4328_v47 }
0x11d6   : > { %v4318_v56 = vmul.f32 %v9032_v43, %v4317_v48 }
0x11d7   : > { %v4337_v59 = vrot.slane %v10261_v52, 2  ;;  %v4338_v20 = vrot.slane %v10261_v52, 4  ;;  %v4339_v61 = vrot.slane %v10261_v52, 6  ;;  %v4349_v54 = vsel %vm471_vm0, %v10261_v52, -inf }
0x11d8   : > { %v4350_v58 = vrot.slane %v4349_v54, 4  ;;  %v4322_v62 = vsel %vm4321_vm15, %v9032_v43, %v4318_v56  ;;  %vm11028_vm15 = vcmask 64512  }
0x11d9   : > { %v4356_v0 = vsel %vm471_vm0, %v4337_v59, -inf  ;;  %v4363_v1 = vsel %vm471_vm0, %v4338_v20, -inf  ;;  %v4324_v33 = vmul.f32 %v4322_v62, %v4290_v26  ;;  %v4370_v3 = vsel %vm471_vm0, %v4339_v61, -inf }
0x11da   : > { %v4351_v22 = vmax.f32 %v4349_v54, %v4350_v58  ;;  %v4357_v12 = vrot.slane %v4356_v0, 4  ;;  %v4364_v15 = vrot.slane %v4363_v1, 4  ;;  %v4371_v51 = vrot.slane %v4370_v3, 4 }
0x11db   : > { %v4329_v6 = vmul.f32 %v8995_v21, %v4324_v33 }
0x11dc   : > { %v4352_v14 = vrot.slane %v4351_v22, 2  ;;  %v4358_v49 = vmax.f32 %v4356_v0, %v4357_v12  ;;  %v4365_v40 = vmax.f32 %v4363_v1, %v4364_v15  ;;  %v4372_v16 = vmax.f32 %v4370_v3, %v4371_v51 }
0x11dd   : > { %v10271_v23 = vadd.f32 %v8996_v2, %v4329_v6 }
0x11de   : > { %v4353_v24 = vmax.f32 %v4351_v22, %v4352_v14  ;;  %v4359_v25 = vrot.slane %v4358_v49, 2  ;;  %v4366_v41 = vrot.slane %v4365_v40, 2  ;;  %v4373_v42 = vrot.slane %v4372_v16, 2 }
0x11df   : > { %v4340_v63 = vrot.slane %v10271_v23, 2  ;;  %v4341_v57 = vrot.slane %v10271_v23, 4  ;;  %v4342_v4 = vrot.slane %v10271_v23, 6  ;;  %v4377_v26 = vsel %vm471_vm0, %v10271_v23, -inf }
0x11e0   : > { %v4354_v27 = vrot.slane %v4353_v24, 1  ;;  %v4360_v9 = vmax.f32 %v4358_v49, %v4359_v25  ;;  %v4367_v28 = vmax.f32 %v4365_v40, %v4366_v41  ;;  %v4374_v29 = vmax.f32 %v4372_v16, %v4373_v42 }
0x11e1   : > { %v4378_v31 = vrot.slane %v4377_v26, 4  ;;  %v4384_v17 = vsel %vm471_vm0, %v4340_v63, -inf  ;;  %v4391_v32 = vsel %vm471_vm0, %v4341_v57, -inf  ;;  %v4398_v30 = vsel %vm471_vm0, %v4342_v4, -inf }
0x11e2   : > { %v4355_v13 = vmax.f32 %v4353_v24, %v4354_v27  ;;  %v4361_v11 = vrot.slane %v4360_v9, 1  ;;  %v4368_v34 = vrot.slane %v4367_v28, 1  ;;  %v4375_v55 = vrot.slane %v4374_v29, 1 }
0x11e3   : > { %v4379_v39 = vmax.f32 %v4377_v26, %v4378_v31  ;;  %v4385_v35 = vrot.slane %v4384_v17, 4  ;;  %v4392_v18 = vrot.slane %v4391_v32, 4  ;;  %v4399_v36 = vrot.slane %v4398_v30, 4 }
0x11e4   : > { %v4362_v38 = vmax.f32 %v4360_v9, %v4361_v11  ;;  %v4369_v10 = vmax.f32 %v4367_v28, %v4368_v34  ;;  %v4376_v19 = vmax.f32 %v4374_v29, %v4375_v55  ;;  %v4421_v43 = vpack.c.bf16 %v4355_v13, %v4355_v13 }
0x11e5   : > { %v4380_v53 = vrot.slane %v4379_v39, 2  ;;  %v4386_v45 = vmax.f32 %v4384_v17, %v4385_v35  ;;  %v4393_v21 = vmax.f32 %v4391_v32, %v4392_v18  ;;  %v4400_v46 = vmax.f32 %v4398_v30, %v4399_v36 }
0x11e6   : > { %v4422_v50 = vpack.c.bf16 %v4362_v38, %v4362_v38  ;;  %v4423_v2 = vpack.c.bf16 %v4369_v10, %v4369_v10  ;;  %v4424_v8 = vpack.c.bf16 %v4376_v19, %v4376_v19  ;;  %v4478_v59 = vunpack.c.l.b16 %v4421_v43 }
0x11e7   : > { %v4381_v37 = vmax.f32 %v4379_v39, %v4380_v53  ;;  %v4387_v47 = vrot.slane %v4386_v45, 2  ;;  %v4394_v48 = vrot.slane %v4393_v21, 2  ;;  %v4401_v56 = vrot.slane %v4400_v46, 2 }
0x11e8   : > { %v4479_v20 = vunpack.c.l.b16 %v4422_v50  ;;  %v4480_v61 = vunpack.c.l.b16 %v4423_v2  ;;  %v4405_v54 = vsel %vm528_vm1, %v4355_v13, -inf  ;;  %v4406_v3 = vsel %vm528_vm1, %v4362_v38, -inf }
0x11e9   : > { %v4382_v58 = vrot.slane %v4381_v37, 1  ;;  %v4388_v62 = vmax.f32 %v4386_v45, %v4387_v47  ;;  %v4395_v0 = vmax.f32 %v4393_v21, %v4394_v48  ;;  %v4402_v1 = vmax.f32 %v4400_v46, %v4401_v56 }
0x11ea   : > { %v4486_v33 = vsel %vm561_vm2, %v4479_v20, %v4478_v59  ;;  %v4408_v22 = vsel %vm528_vm1, %v4369_v10, -inf  ;;  %v4409_v12 = vsel %vm528_vm1, %v4376_v19, -inf  ;;  %v4407_v40 = vmax.f32 %v4405_v54, %v4406_v3 }
0x11eb   : > { %v4383_v15 = vmax.f32 %v4381_v37, %v4382_v58  ;;  %v4389_v51 = vrot.slane %v4388_v62, 1  ;;  %v4396_v6 = vrot.slane %v4395_v0, 1  ;;  %v4403_v14 = vrot.slane %v4402_v1, 1 }
0x11ec   : > { %v4487_v49 = vsel %vm563_vm3, %v4480_v61, %v4486_v33  ;;  %v4410_v16 = vmax.f32 %v4408_v22, %v4409_v12  ;;  %v4481_v63 = vunpack.c.l.b16 %v4424_v8  ;;  %v4417_v57 = vpack.c.bf16 %v4407_v40, %v4407_v40 }
0x11ed   : > { %v4390_v24 = vmax.f32 %v4388_v62, %v4389_v51  ;;  %v4397_v25 = vmax.f32 %v4395_v0, %v4396_v6  ;;  %v4404_v41 = vmax.f32 %v4402_v1, %v4403_v14  ;;  %v4425_v42 = vpack.c.bf16 %v4383_v15, %v4383_v15 }
0x11ee   : > { %v4418_v4 = vpack.c.bf16 %v4410_v16, %v4410_v16  ;;  %v4488_v29 = vsel %vm565_vm4, %v4481_v63, %v4487_v49  ;;  %v4411_v34 = vsel %vm528_vm1, %v4383_v15, -inf  ;;  %v6198_v35 = vsel %vm561_vm2, %v4410_v16, %v4407_v40 }
0x11ef   : > { %v4426_v26 = vpack.c.bf16 %v4390_v24, %v4390_v24  ;;  %v4427_v27 = vpack.c.bf16 %v4397_v25, %v4397_v25  ;;  %v4428_v9 = vpack.c.bf16 %v4404_v41, %v4404_v41  ;;  %v4482_v28 = vunpack.c.l.b16 %v4425_v42 }
0x11f0   : > { %v4412_v31 = vsel %vm528_vm1, %v4390_v24, -inf  ;;  %v4414_v17 = vsel %vm528_vm1, %v4397_v25, -inf  ;;  %v4415_v32 = vsel %vm528_vm1, %v4404_v41, -inf  ;;  %vm11021_vm0 = vcmask 1045509  }
0x11f1   : > { %v4483_v30 = vunpack.c.l.b16 %v4426_v26  ;;  %v4484_v13 = vunpack.c.l.b16 %v4427_v27  ;;  %v4489_v11 = vsel %vm616_vm5, %v4482_v28, %v4488_v29  ;;  %v4413_v55 = vmax.f32 %v4411_v34, %v4412_v31 }
0x11f2   : > { %v4416_v39 = vmax.f32 %v4414_v17, %v4415_v32  ;;  %v4485_v18 = vunpack.c.l.b16 %v4428_v9  ;;  %v4433_v38 = vunpack.c.l.b16 %v4417_v57  ;;  %v4434_v10 = vunpack.c.l.b16 %v4418_v4 }
0x11f3   : > { %v4490_v36 = vsel %vm11021_vm0, %v4483_v30, %v4489_v11  ;;  %v4419_v43 = vpack.c.bf16 %v4413_v55, %v4413_v55  ;;  %v6199_v21 = vsel %vm563_vm3, %v4413_v55, %v6198_v35 }
0x11f4   : > { %v4491_v19 = vsel %vm11022_vm12, %v4484_v13, %v4490_v36  ;;  %v4420_v53 = vpack.c.bf16 %v4416_v39, %v4416_v39  ;;  %v10299_v8 = vsel %vm565_vm4, %v4416_v39, %v6199_v21  ;;  %v4437_v37 = vsel %vm561_vm2, %v4434_v10, %v4433_v38 }
0x11f5   : > { %v4492_v45 = vsel %vm11023_vm11, %v4485_v18, %v4491_v19  ;;  %v4435_v50 = vunpack.c.l.b16 %v4419_v43  ;;  %vm11024_vm2 = vcmask 60416  }
0x11f6   : > { %v4493_v46 = vpack.c.b16 %v4492_v45, %v4492_v45  ;;  %v4436_v2 = vunpack.c.l.b16 %v4420_v53  ;;  %vm11027_vm5 = vmmov %vm11024_vm2 }
0x11f7   : > { %v4438_v47 = vsel %vm563_vm3, %v4435_v50, %v4437_v37  ;;  %vm11025_vm3 = vmmov %vm11024_vm2 }
0x11f8   : > { %8439 = vmatmul.msk.bf16.vlgmr.msra.gmra.mxu0 %vm528_vm1, %v4493_v46  ;;  %8448 = vmatmul.msk.bf16.vlgmr.msra.gmra.mxu1 %vm528_vm1, %v4493_v46  ;;  %v4439_v48 = vsel %vm565_vm4, %v4436_v2, %v4438_v47  ;;  %vm11026_vm4 = vmmov %vm11024_vm2 }
0x11f9   : > { %v4440_v56 = vpack.c.b16 %v4439_v48, %v4439_v48 }
0x11fb   : > { %8430 = vmatmul.msk.bf16.vlgmr.msra.gmra.mxu3 %vm528_vm1, %v4440_v56 }
0x1275   : > { %v4518_v59 = vpop.f32.mrf.mxu0  ;;  %v10307_v20 = vpop.f32.mrf.mxu1 }
0x1276   : > { %v4584_v33 = vperm.slane %v4518_v59, %v9586_v60  ;;  %v4579_v12 = vrot.slane %v4518_v59, 4 }
0x1278   : > { %v4601_v6 = vrot.slane %v4584_v33, 4  ;;  %v4580_v24 = vsel %vm691_vm9, 0.0, %v4579_v12 }
0x1279   : > { %v4588_v4 = vperm.slane %v4580_v24, %v9586_v60 }
0x127b   : > { %v4613_v32 = vrot.slane %v4588_v4, 4 }
0x127d   : > { %v4520_v61 = vpop.f32.mrf.mxu0  ;;  %v4545_v54 = vpop.f32.mrf.mxu1 }
0x127e   : > { %v4465_v58 = vpop.f32.mrf.mxu3 }
0x127f   : > { %v10309_v62 = vmul.f32 0.25, %v4465_v58 }
0x1281   : > { %v8823_v0 = vpack.i.bf16 %v10309_v62, %v4518_v59 }
0x1283   : > { %8824 = vrot.lane.b32.xlu0 %v8823_v0, %s9338_s9 }
0x1286   : > { %v4467_v1 = vpop.f32.mrf.mxu3 }
0x12f5   : > { %v10314_v3 = vpop.permute.xlu0 %8824 }
0x12f6   : > { %v8826_v22 = vunpack.i.l.bf16 %v10314_v3 }
0x12f8   : > { %v4589_v15 = vrot.slane %v8826_v22, 4  ;;  %v4594_v51 = vperm.slane %v8826_v22, %v9586_v60 }
0x12fa   : > { %v4590_v14 = vsel %vm691_vm9, 0.0, %v4589_v15  ;;  %v4599_v49 = vrot.slane %v4594_v51, 4  ;;  %v4602_v16 = vsel %vm691_vm9, %v4594_v51, %v4601_v6 }
0x12fb   : > { %v4598_v40 = vperm.slane %v4590_v14, %v9586_v60  ;;  %v4610_v41 = vperm.slane %v4602_v16, %v9594_v5 }
0x12fc   : > { %v4600_v25 = vsel %vm691_vm9, %v4599_v49, %v4584_v33 }
0x12fd   : > { %v4611_v42 = vrot.slane %v4598_v40, 4  ;;  %v4625_v63 = vrot.slane %v4610_v41, 4  ;;  %v4606_v57 = vperm.slane %v4600_v25, %v9594_v5  ;;  %v4633_v9 = vpack.c.bf16 %v4610_v41, %v4610_v41 }
0x12fe   : > { %v4614_v34 = vsel %vm691_vm9, %v4598_v40, %v4613_v32 }
0x12ff   : > { %v4626_v26 = vsel %vm691_vm9, 0.0, %v4625_v63  ;;  %v4623_v27 = vrot.slane %v4606_v57, 4  ;;  %v4612_v29 = vsel %vm691_vm9, %v4611_v42, %v4588_v4  ;;  %v4631_v30 = vpack.c.bf16 %v4606_v57, %v4606_v57 }
0x1300   : > { %v4634_v28 = vpack.c.bf16 %v4626_v26, %v4626_v26  ;;  %v4618_v17 = vperm.slane %v4612_v29, %v9594_v5  ;;  %v4622_v18 = vperm.slane %v4614_v34, %v9594_v5 }
0x1301   : > { %v4624_v31 = vsel %vm691_vm9, 0.0, %v4623_v27 }
0x1302   : > { %8828 = vxpose.binary.xlu1.c.b16.start.end [1/2] (short) (narrow) %v4634_v28, %v4633_v9, 16  ;;  %v4632_v13 = vpack.c.bf16 %v4624_v31, %v4624_v31  ;;  %v4627_v11 = vrot.slane %v4618_v17, 4  ;;  %v4635_v39 = vpack.c.bf16 %v4618_v17, %v4618_v17  ;;  %v4629_v36 = vrot.slane %v4622_v18, 4 }
0x1303   : > { %v4637_v10 = vpack.c.bf16 %v4622_v18, %v4622_v18 }
0x1304   : > { %8831 = vxpose.binary.xlu2.c.b16.start.end [1/2] (short) (narrow) %v4632_v13, %v4631_v30, 16  ;;  %v4628_v55 = vsel %vm691_vm9, 0.0, %v4627_v11  ;;  %v4630_v38 = vsel %vm691_vm9, 0.0, %v4629_v36 }
0x1305   : > { %v4636_v35 = vpack.c.bf16 %v4628_v55, %v4628_v55  ;;  %v4638_v19 = vpack.c.bf16 %v4630_v38, %v4630_v38 }
0x1307   : > { %8837 = vxpose.binary.xlu0.c.b16.start.end [1/2] (short) (narrow) %v4636_v35, %v4635_v39, 16 }
0x1314   : > { %8834 = vxpose.binary.xlu2.c.b16.start.end [1/2] (short) (narrow) %v4638_v19, %v4637_v10, 16 }
0x13a5   : > { %v8832_v43 = vpop.trf.xlu2 }
0x13a6   : > { %v4857_v47 = vshrl.u32 %v8832_v43, 16 }
0x13ad   : > { %v8833_v53 = vpop.trf.xlu2 }
0x13ae   : > { %v8829_v45 = vpop.trf.xlu1  ;;  %v4855_v2 = vpack.i.b16 %v8833_v53, %v8832_v43  ;;  %v4858_v37 = vshrl.u32 %v8833_v53, 16 }
0x13af   : > { %v4865_v54 = vshrl.u32 %v8829_v45, 16 }
0x13b0   : > { %v4859_v59 = vpack.i.b16 %v4858_v37, %v4857_v47  ;;  %v4887_v61 = vrot.slane %v4855_v2, 4 }
0x13b2   : > { %v4943_v57 = vrot.slane %v4859_v59, 4 }
0x13b3   : > { %v8838_v21 = vpop.trf.xlu0 }
0x13b4   : > { %v4873_v0 = vshrl.u32 %v8838_v21, 16 }
0x13b5   : > { %v8835_v46 = vpop.trf.xlu2 }
0x13b6   : > { %v8830_v50 = vpop.trf.xlu1  ;;  %v4881_v1 = vshrl.u32 %v8835_v46, 16 }
0x13b7   : > { %v4863_v48 = vpack.i.b16 %v8830_v50, %v8829_v45  ;;  %v4866_v56 = vshrl.u32 %v8830_v50, 16 }
0x13b9   : > { %v4867_v15 = vpack.i.b16 %v4866_v56, %v4865_v54  ;;  %v4899_v51 = vrot.slane %v4863_v48, 4 }
0x13bb   : > { %v8839_v58 = vpop.trf.xlu0  ;;  %v4955_v4 = vrot.slane %v4867_v15, 4 }
0x13bc   : > { %v4871_v33 = vpack.i.b16 %v8839_v58, %v8838_v21  ;;  %v4874_v22 = vshrl.u32 %v8839_v58, 16 }
0x13bd   : > { %v8836_v12 = vpop.trf.xlu2 }
0x13be   : > { %v4879_v6 = vpack.i.b16 %v8836_v12, %v8835_v46  ;;  %v4882_v14 = vshrl.u32 %v8836_v12, 16  ;;  %v4875_v49 = vpack.i.b16 %v4874_v22, %v4873_v0  ;;  %v4885_v40 = vrot.slane %v4871_v33, 4 }
0x13bf   : > { %v4888_v16 = vsel %vm691_vm9, %v4871_v33, %v4887_v61 }
0x13c0   : > { %v4883_v24 = vpack.i.b16 %v4882_v14, %v4881_v1  ;;  %v4897_v25 = vrot.slane %v4879_v6, 4  ;;  %v4900_v41 = vsel %vm691_vm9, %v4879_v6, %v4899_v51  ;;  %v4941_v42 = vrot.slane %v4875_v49, 4 }
0x13c1   : > { %v4908_v63 = vperm.slane %v4900_v41, %v9586_v60  ;;  %v4896_v26 = vperm.slane %v4888_v16, %v9586_v60  ;;  %v4886_v9 = vsel %vm691_vm9, %v4885_v40, %v4855_v2  ;;  %v4944_v32 = vsel %vm691_vm9, %v4875_v49, %v4943_v57 }
0x13c2   : > { %v4898_v27 = vsel %vm691_vm9, %v4897_v25, %v4863_v48  ;;  %v4953_v31 = vrot.slane %v4883_v24, 4  ;;  %v4942_v17 = vsel %vm691_vm9, %v4941_v42, %v4859_v59  ;;  %v4956_v30 = vsel %vm691_vm9, %v4883_v24, %v4955_v4 }
0x13c3   : > { %v4904_v28 = vperm.slane %v4898_v27, %v9586_v60  ;;  %v4921_v29 = vrot.slane %v4908_v63, 4  ;;  %v4964_v11 = vperm.slane %v4956_v30, %v9586_v60  ;;  %v4892_v39 = vperm.slane %v4886_v9, %v9586_v60 }
0x13c4   : > { %v4954_v13 = vsel %vm691_vm9, %v4953_v31, %v4867_v15  ;;  %v4952_v36 = vperm.slane %v4944_v32, %v9586_v60  ;;  %v4948_v19 = vperm.slane %v4942_v17, %v9586_v60  ;;  %v4923_v56 = vrot.slane %v4896_v26, 4 }
0x13c5   : > { %v4922_v34 = vsel %vm691_vm9, %v4921_v29, %v4896_v26  ;;  %v4909_v55 = vrot.slane %v4904_v28, 4  ;;  %v4960_v35 = vperm.slane %v4954_v13, %v9586_v60  ;;  %v4977_v38 = vrot.slane %v4964_v11, 4 }
0x13c6   : > { %v4928_v18 = vperm.slane %v4922_v34, %v9594_v5  ;;  %v4979_v59 = vrot.slane %v4952_v36, 4  ;;  %v4911_v61 = vrot.slane %v4892_v39, 4  ;;  %v4967_v54 = vrot.slane %v4948_v19, 4 }
0x13c7   : > { %v4910_v10 = vsel %vm691_vm9, %v4909_v55, %v4892_v39  ;;  %v4965_v43 = vrot.slane %v4960_v35, 4  ;;  %v4978_v53 = vsel %vm691_vm9, %v4977_v38, %v4952_v36  ;;  %v4924_v58 = vsel %vm691_vm9, %v4908_v63, %v4923_v56 }
0x13c8   : > { %v4984_v45 = vperm.slane %v4978_v53, %v9594_v5  ;;  %v4937_v46 = vrot.slane %v4928_v18, 4  ;;  %v4916_v50 = vperm.slane %v4910_v10, %v9594_v5  ;;  %v4980_v0 = vsel %vm691_vm9, %v4964_v11, %v4979_v59 }
0x13c9   : > { %v4966_v21 = vsel %vm691_vm9, %v4965_v43, %v4948_v19  ;;  %v4932_v22 = vperm.slane %v4924_v58, %v9594_v5  ;;  %v4988_v12 = vperm.slane %v4980_v0, %v9594_v5  ;;  %v4912_v15 = vsel %vm691_vm9, %v4904_v28, %v4911_v61 }
0x13ca   : > { %v4972_v2 = vperm.slane %v4966_v21, %v9594_v5  ;;  %8840 = vxpose.binary.xlu0.c.b16.start.end [1/2] (short) (narrow) %v4984_v45, %v4928_v18, 16  ;;  %v4993_v37 = vrot.slane %v4984_v45, 4  ;;  %v4938_v47 = vsel %vm691_vm9, 0, %v4937_v46  ;;  %v4933_v1 = vrot.slane %v4916_v50, 4 }
0x13cb   : > { %v4968_v51 = vsel %vm691_vm9, %v4960_v35, %v4967_v54  ;;  %v4920_v49 = vperm.slane %v4912_v15, %v9594_v5  ;;  %v4939_v16 = vrot.slane %v4932_v22, 4  ;;  %v4995_v24 = vrot.slane %v4988_v12, 4 }
0x13cc   : > { %8846 = vxpose.binary.xlu2.c.b16.start.end [1/2] (short) (narrow) %v4972_v2, %v4916_v50, 16  ;;  %v4994_v48 = vsel %vm691_vm9, 0, %v4993_v37  ;;  %v4989_v33 = vrot.slane %v4972_v2, 4  ;;  %v4934_v6 = vsel %vm691_vm9, 0, %v4933_v1  ;;  %v4976_v40 = vperm.slane %v4968_v51, %v9594_v5 }
0x13cd   : > { %8849 = vxpose.binary.xlu1.c.b16.start.end [1/2] (short) (narrow) %v4994_v48, %v4938_v47, 16  ;;  %v4935_v25 = vrot.slane %v4920_v49, 4  ;;  %v4940_v42 = vsel %vm691_vm9, 0, %v4939_v16  ;;  %v4996_v63 = vsel %vm691_vm9, 0, %v4995_v24  ;;  %v8827_v13 = vunpack.i.h.bf16 %v10314_v3 }
0x13ce   : > { %v4990_v14 = vsel %vm691_vm9, 0, %v4989_v33  ;;  %v4991_v41 = vrot.slane %v4976_v40, 4  ;;  %v4553_v11 = vperm.slane %v10309_v62, %v9586_v60 }
0x13cf   : > { %v4936_v57 = vsel %vm691_vm9, 0, %v4935_v25  ;;  %v4558_v55 = vperm.slane %v8827_v13, %v9586_v60 }
0x13d0   : > { %v4992_v4 = vsel %vm691_vm9, 0, %v4991_v41  ;;  %v4561_v35 = vrot.slane %v4553_v11, 4 }
0x13d1   : > { %v4559_v36 = vrot.slane %v4558_v55, 4 }
0x13d2   : > { %v4562_v38 = vsel %vm691_vm9, %v4558_v55, %v4561_v35 }
0x13d3   : > { %v4570_v10 = vperm.slane %v4562_v38, %v9594_v5  ;;  %v4560_v43 = vsel %vm691_vm9, %v4559_v36, %v4553_v11 }
0x13d4   : > { %v4566_v62 = vperm.slane %v4560_v43, %v9594_v5 }
0x13d5   : > { %v4573_v50 = vrot.slane %v4570_v10, 4  ;;  %v4704_v16 = vpack.c.bf16 %v4570_v10, %v4570_v10 }
0x13d6   : > { %v4571_v61 = vrot.slane %v4566_v62, 4  ;;  %v4703_v11 = vpack.c.bf16 %v4566_v62, %v4566_v62  ;;  %v4648_v62 = vperm.slane %v10307_v20, %v9586_v60 }
0x13d7   : > { %v4574_v54 = vsel %vm691_vm9, 0.0, %v4573_v50 }
0x13da   : > { %8843 = vxpose.binary.xlu0.c.b16.start.end [1/2] (short) (narrow) %v4988_v12, %v4932_v22, 16 }
0x13dc   : > { %8861 = vxpose.binary.xlu2.c.b16.start.end [1/2] (short) (narrow) %v4990_v14, %v4934_v6, 16  ;;  %v4712_v6 = vpack.c.bf16 %v4574_v54, %v4574_v54 }
0x13dd   : > { %8852 = vxpose.binary.xlu1.c.b16.start.end [1/2] (short) (narrow) %v4976_v40, %v4920_v49, 16  ;;  %v4572_v40 = vsel %vm691_vm9, 0.0, %v4571_v61 }
0x13ea   : > { %8858 = vxpose.binary.xlu0.c.b16.start.end [1/2] (short) (narrow) %v4996_v63, %v4940_v42, 16 }
0x13ec   : > { %8864 = vxpose.binary.xlu2.c.b16.start.end [1/2] (short) (narrow) %v4992_v4, %v4936_v57, 16 }
0x1437   : > { %4640 = vrot.lane.b32.xlu1 %v10307_v20, %s9338_s9 }
0x146d   : > { %v8847_v26 = vpop.trf.xlu2 }
0x1475   : > { %v8848_v27 = vpop.trf.xlu2 }
0x1476   : > { %v8841_v9 = vpop.trf.xlu0 }
0x1479   : > { %v8850_v28 = vpop.trf.xlu1 }
0x147d   : > { %v8862_v29 = vpop.trf.xlu2 }
0x147e   : > { %v8842_v31 = vpop.trf.xlu0 }
0x1481   : > { %v8851_v32 = vpop.trf.xlu1 }
0x1485   : > { %v8863_v17 = vpop.trf.xlu2 }
0x1486   : > { %v8844_v30 = vpop.trf.xlu0 }
0x1487   : > { %v5265_v53 = vrot.slane %v8844_v30, 4 }
0x1489   : > { %v8853_v18 = vpop.trf.xlu1  ;;  %v5266_v37 = vsel %vm691_vm9, %v5265_v53, %v8841_v9 }
0x148a   : > { %v5253_v58 = vrot.slane %v8853_v18, 4  ;;  %v5270_v1 = vperm.slane %v5266_v37, %v9586_v60 }
0x148c   : > { %v5254_v24 = vsel %vm691_vm9, %v5253_v58, %v8847_v26 }
0x148d   : > { %v8865_v34 = vpop.trf.xlu2 }
0x148e   : > { %v8845_v39 = vpop.trf.xlu0  ;;  %v5259_v45 = vrot.slane %v8865_v34, 4 }
0x148f   : > { %v5303_v22 = vrot.slane %v8845_v39, 4  ;;  %v4643_v39 = vrot.slane %v10307_v20, 4 }
0x1490   : > { %v5260_v47 = vsel %vm691_vm9, %v5259_v45, %v8862_v29  ;;  %v4713_v29 = vrot.slane %v4712_v6, 4 }
0x1491   : > { %v8854_v48 = vpop.trf.xlu1  ;;  %v5264_v33 = vperm.slane %v5260_v47, %v9586_v60  ;;  %v5304_v41 = vsel %vm691_vm9, %v5303_v22, %v8842_v31  ;;  %v4705_v31 = vrot.slane %v4704_v16, 4  ;;  %v8514_v16 = vld [vmem:[#allocation5 + $0x30] sm:$0xff] }
0x1492   : > { %v5291_v12 = vrot.slane %v8854_v48, 4  ;;  %v5308_v30 = vperm.slane %v5304_v41, %v9586_v60 }
0x1493   : > { %v5277_v25 = vrot.slane %v5264_v33, 4  ;;  %v4706_v43 = vsel %vm691_vm9, %v4705_v31, %v4703_v11 }
0x1494   : > { %v5292_v42 = vsel %vm691_vm9, %v5291_v12, %v8848_v27  ;;  %v4710_v48 = vperm.slane %v4706_v43, %v9594_v5 }
0x1495   : > { %v8866_v19 = vpop.trf.xlu2  ;;  %v5296_v26 = vperm.slane %v5292_v42, %v9586_v60 }
0x1496   : > { %v8859_v3 = vpop.trf.xlu0  ;;  %v5297_v21 = vrot.slane %v8866_v19, 4 }
0x1497   : > { %v5271_v46 = vrot.slane %v8859_v3, 4 }
0x1498   : > { %v5298_v59 = vsel %vm691_vm9, %v5297_v21, %v8863_v17  ;;  %v5258_v17 = vperm.slane %v5254_v24, %v9586_v60 }
0x1499   : > { %v5272_v2 = vsel %vm691_vm9, %v5271_v46, %v8850_v28  ;;  %v5302_v15 = vperm.slane %v5298_v59, %v9586_v60  ;;  %v4711_v28 = vpack.c.bf16 %v4572_v40, %v4572_v40  ;;  %v4644_v46 = vsel %vm691_vm9, 0.0, %v4643_v39 }
0x149a   : > { %v5276_v56 = vperm.slane %v5272_v2, %v9586_v60  ;;  %v5278_v27 = vsel %vm691_vm9, %v5277_v25, %v5258_v17  ;;  %v4652_v54 = vperm.slane %v4644_v46, %v9586_v60  ;;  %v4665_v39 = vrot.slane %v4648_v62, 4 }
0x149b   : > { %v5315_v57 = vrot.slane %v5302_v15, 4  ;;  %v4714_v18 = vsel %vm691_vm9, %v4713_v29, %v4711_v28  ;;  %v5282_v36 = vperm.slane %v5278_v27, %v9594_v5  ;;  %v4722_v15 = vshrl.u32 %v4710_v48, 16 }
0x149c   : > { %v5283_v0 = vrot.slane %v5276_v56, 4  ;;  %v4718_v21 = vperm.slane %v4714_v18, %v9594_v5  ;;  %v4677_v24 = vrot.slane %v4652_v54, 4 }
0x149e   : > { %v8860_v51 = vpop.trf.xlu0  ;;  %v5284_v14 = vsel %vm691_vm9, %v5283_v0, %v5270_v1  ;;  %v4723_v0 = vshrl.u32 %v4718_v21, 16  ;;  %v8515_v1 = vld [vmem:[#allocation5 + $0x38] sm:$0xff]  ;;  %v4721_v12 = vpack.i.b16 %v4718_v21, %v4710_v48 }
0x149f   : > { %v5309_v49 = vrot.slane %v8860_v51, 4  ;;  %v5288_v4 = vperm.slane %v5284_v14, %v9594_v5 }
0x14a0   : > { %v4724_v14 = vpack.i.b16 %v4723_v0, %v4722_v15 }
0x14a1   : > { %v5310_v63 = vsel %vm691_vm9, %v5309_v49, %v8851_v32  ;;  %v5316_v32 = vsel %vm691_vm9, %v5315_v57, %v5296_v26  ;;  %v5289_v34 = vrot.slane %v5288_v4, 4 }
0x14a2   : > { %v5314_v9 = vperm.slane %v5310_v63, %v9586_v60  ;;  %v5320_v38 = vperm.slane %v5316_v32, %v9594_v5 }
0x14a3   : > { %v5290_v3 = vsel %vm691_vm9, %v5289_v34, %v5282_v36 }
0x14a4   : > { %v5321_v13 = vrot.slane %v5314_v9, 4  ;;  %v5333_v59 = vshrl.u32 %v5290_v3, 16 }
0x14a6   : > { %v5322_v55 = vsel %vm691_vm9, %v5321_v13, %v5308_v30  ;;  %v6248_v30 = vpack.c.bf16 %v10271_v23, %v10261_v52 }
0x14a7   : > { %v5326_v35 = vperm.slane %v5322_v55, %v9594_v5 }
0x14a9   : > { %v5327_v10 = vrot.slane %v5326_v35, 4  ;;  %v4641_v19 = vpop.permute.xlu1 %4640 }
0x14aa   : > { %v4653_v53 = vrot.slane %v4641_v19, 4  ;;  %v4658_v45 = vperm.slane %v4641_v19, %v9586_v60 }
0x14ab   : > { %v5328_v50 = vsel %vm691_vm9, %v5327_v10, %v5320_v38 }
0x14ac   : > { %v4654_v2 = vsel %vm691_vm9, 0.0, %v4653_v53  ;;  %v4663_v37 = vrot.slane %v4658_v45, 4  ;;  %v5331_v47 = vpack.i.b16 %v5328_v50, %v5290_v3  ;;  %v5334_v61 = vshrl.u32 %v5328_v50, 16 }
0x14ad   : > { %v4662_v56 = vperm.slane %v4654_v2, %v9586_v60  ;;  %v4666_v35 = vsel %vm691_vm9, %v4658_v45, %v4665_v39 }
0x14ae   : > { %v4664_v58 = vsel %vm691_vm9, %v4663_v37, %v4648_v62  ;;  %5347 = vmatpush.bf16.msra.mxu2 %v5331_v47  ;;  %v5335_v22 = vpack.i.b16 %v5334_v61, %v5333_v59  ;;  %v4674_v18 = vperm.slane %v4666_v35, %v9594_v5 }
0x14af   : > { %v4670_v20 = vperm.slane %v4664_v58, %v9594_v5  ;;  %v4675_v33 = vrot.slane %v4662_v56, 4  ;;  %v4678_v57 = vsel %vm691_vm9, %v4662_v56, %v4677_v24 }
0x14b0   : > { %5363 = vmatpush.bf16.msrb.mxu3 %v5335_v22  ;;  %v4686_v28 = vperm.slane %v4678_v57, %v9594_v5  ;;  %v4689_v36 = vrot.slane %v4674_v18, 4  ;;  %v4697_v10 = vpack.c.bf16 %v4674_v18, %v4674_v18 }
0x14b1   : > { %8449 = vmatmul.msk.bf16.vlgmr.msra.gmra.mxu2 %vm1470_vm10, %v4721_v12  ;;  %v4687_v51 = vrot.slane %v4670_v20, 4  ;;  %v4676_v6 = vsel %vm691_vm9, %v4675_v33, %v4652_v54  ;;  %v4695_v25 = vpack.c.bf16 %v4670_v20, %v4670_v20 }
0x14b2   : > { %v4682_v49 = vperm.slane %v4676_v6, %v9594_v5  ;;  %v4693_v29 = vrot.slane %v4686_v28, 4  ;;  %v4701_v26 = vpack.c.bf16 %v4686_v28, %v4686_v28  ;;  %v4690_v38 = vsel %vm691_vm9, 0.0, %v4689_v36 }
0x14b3   : > { %v4688_v40 = vsel %vm691_vm9, 0.0, %v4687_v51  ;;  %8450 = vmatmul.msk.bf16.vlgmr.msrb.gmra.mxu3 %vm1470_vm10, %v4724_v14  ;;  %v4698_v19 = vpack.c.bf16 %v4690_v38, %v4690_v38 }
0x14b4   : > { %6271 = vmatpush.bf16.msra.mxu3 %v8515_v1  ;;  %v4696_v41 = vpack.c.bf16 %v4688_v40, %v4688_v40  ;;  %v4691_v42 = vrot.slane %v4682_v49, 4  ;;  %v4699_v4 = vpack.c.bf16 %v4682_v49, %v4682_v49  ;;  %v4694_v17 = vsel %vm691_vm9, 0.0, %v4693_v29 }
0x14b5   : > { %v4702_v13 = vpack.c.bf16 %v4694_v17, %v4694_v17 }
0x14b6   : > { %8855 = vxpose.binary.xlu1.c.b16.start.end [1/2] (short) (narrow) %v4696_v41, %v4695_v25, 16  ;;  %v4692_v63 = vsel %vm691_vm9, 0.0, %v4691_v42 }
0x14b7   : > { %v4700_v9 = vpack.c.bf16 %v4692_v63, %v4692_v63 }
0x14b8   : > { %6272 = vmatpush.bf16.msra.mxu3 %v8514_v16 }
0x14b9   : > { %8870 = vxpose.binary.xlu2.c.b16.start.end [1/2] (short) (narrow) %v4700_v9, %v4699_v4, 16 }
0x14c3   : > { %8470 = vmatmul.msk.bf16.vlgmr.msra.gmra.mxu3 %vm528_vm1, %v6248_v30 }
0x14c6   : > { %8873 = vxpose.binary.xlu1.c.b16.start.end [1/2] (short) (narrow) %v4702_v13, %v4701_v26, 16 }
0x1534   : > { %v5349_v11 = vpop.f32.mrf.mxu2 }
0x1535   : > { %v5369_v31 = vsel %vm11024_vm2, %v5349_v11, -inf }
0x1536   : > { %5370 = vmax.xlane.f32.xlu0 %v5369_v31  ;;  %v5365_v27 = vpop.f32.mrf.mxu3 }
0x1537   : > { %v5372_v32 = vsel %vm11025_vm3, %v5365_v27, -inf  ;;  %vm11029_vm3 = vmmov %vm11028_vm15 }
0x1538   : > { %5373 = vmax.xlane.f32.xlu2 %v5372_v32 }
0x153c   : > { %v5351_v34 = vpop.f32.mrf.mxu2 }
0x153e   : > { %v5367_v55 = vpop.f32.mrf.mxu3 }
0x155a   : > { %v8871_v43 = vpop.trf.xlu2 }
0x155b   : > { %v5567_v33 = vshrl.u32 %v8871_v43, 16 }
0x155f   : > { %8867 = vxpose.binary.xlu0.c.b16.start.end [1/2] (short) (narrow) %v4698_v19, %v4697_v10, 16 }
0x1562   : > { %v8872_v53 = vpop.trf.xlu2  ;;  %v8856_v56 = vpop.trf.xlu1 }
0x1563   : > { %v5551_v61 = vshrl.u32 %v8856_v56, 16  ;;  %v5568_v22 = vshrl.u32 %v8872_v53, 16  ;;  %v5565_v51 = vpack.i.b16 %v8872_v53, %v8871_v43 }
0x1565   : > { %v5569_v6 = vpack.i.b16 %v5568_v22, %v5567_v33  ;;  %v5579_v17 = vrot.slane %v5565_v51, 4 }
0x156a   : > { %v8857_v59 = vpop.trf.xlu1 }
0x156b   : > { %v5552_v54 = vshrl.u32 %v8857_v59, 16  ;;  %v5549_v0 = vpack.i.b16 %v8857_v59, %v8856_v56 }
0x156d   : > { %v5553_v1 = vpack.i.b16 %v5552_v54, %v5551_v61  ;;  %v5581_v12 = vrot.slane %v5549_v0, 4  ;;  %v5580_v18 = vsel %vm691_vm9, %v5579_v17, %v5549_v0 }
0x156e   : > { %v10478_v59 = vperm.slane %v5580_v18, %v9586_v60 }
0x156f   : > { %v5637_v15 = vrot.slane %v5553_v1, 4  ;;  %v5582_v49 = vsel %vm691_vm9, %v5565_v51, %v5581_v12 }
0x1570   : > { %v5590_v57 = vperm.slane %v5582_v49, %v9586_v60 }
0x1571   : > { %v5638_v40 = vsel %vm691_vm9, %v5569_v6, %v5637_v15 }
0x1572   : > { %v8874_v58 = vpop.trf.xlu1  ;;  %v5646_v29 = vperm.slane %v5638_v40, %v9586_v60 }
0x1573   : > { %v5575_v16 = vshrl.u32 %v8874_v58, 16 }
0x1574   : > { %v5673_v34 = vrot.slane %v5646_v29, 4 }
0x157a   : > { %v8875_v14 = vpop.trf.xlu1 }
0x157b   : > { %v5576_v41 = vshrl.u32 %v8875_v14, 16  ;;  %v5573_v4 = vpack.i.b16 %v8875_v14, %v8874_v58 }
0x157d   : > { %v5577_v30 = vpack.i.b16 %v5576_v41, %v5575_v16  ;;  %v5591_v38 = vrot.slane %v5573_v4, 4 }
0x15a9   : > { %v5371_v45 = vpop.xlane.xlu0 %5370 }
0x15aa   : > { %v5375_v2 = vsub.f32 %v5349_v11, %v5371_v45  ;;  %v5617_v11 = vrot.slane %v5590_v57, 4 }
0x15ab   : > { %v5374_v3 = vpop.xlane.xlu2 %5373 }
0x15ac   : > { %v5376_v21 = vsub.f32 %v5365_v27, %v5374_v3  ;;  %v5377_v37 = vmul.f32 1.442695, %v5375_v2  ;;  %v5635_v27 = vrot.slane %v5569_v6, 4  ;;  %v5647_v3 = vrot.slane %v5577_v30, 4 }
0x15ae   : > { %v5379_v46 = vmul.f32 1.442695, %v5376_v21  ;;  %v5636_v53 = vsel %vm691_vm9, %v5635_v27, %v5553_v1 }
0x15af   : > { %v10481_v61 = vperm.slane %v5636_v53, %v9586_v60 }
0x15b0   : > { %9033 = vpow2.f32 %v5379_v46 }
0x15b1   : > { %9035 = vpow2.f32 %v5377_v37  ;;  %v5661_v33 = vrot.slane %v10481_v61, 4 }
0x15b6   : > { %v10443_v50 = vpop.eup %9033 }
0x15b7   : > { %v5384_v62 = vsel %vm11026_vm4, %v10443_v50, 0.0  ;;  %v10447_v47 = vpop.eup %9035  ;;  %vm11030_vm4 = vmmov %vm11029_vm3 }
0x15b8   : > { %5385 = vadd.xlane.f32.xlu1 %v5384_v62  ;;  %v5381_v48 = vsel %vm11027_vm5, %v10447_v47, 0.0  ;;  %vm11031_vm5 = vmmov %vm11029_vm3 }
0x15d0   : > { %5382 = vadd.xlane.f32.xlu0 %v5381_v48 }
0x160b   : > { %v8868_v20 = vpop.trf.xlu0 }
0x160c   : > { %v5559_v25 = vshrl.u32 %v8868_v20, 16 }
0x1613   : > { %v8869_v24 = vpop.trf.xlu0 }
0x1614   : > { %v5557_v42 = vpack.i.b16 %v8869_v24, %v8868_v20  ;;  %v5560_v63 = vshrl.u32 %v8869_v24, 16  ;;  %v5605_v20 = vrot.slane %v10478_v59, 4 }
0x1616   : > { %v5561_v9 = vpack.i.b16 %v5560_v63, %v5559_v25  ;;  %v5593_v28 = vrot.slane %v5557_v42, 4  ;;  %v5592_v62 = vsel %vm691_vm9, %v5591_v38, %v5557_v42 }
0x1617   : > { %v5598_v0 = vperm.slane %v5592_v62, %v9586_v60 }
0x1618   : > { %v5594_v26 = vsel %vm691_vm9, %v5573_v4, %v5593_v28  ;;  %v5649_v13 = vrot.slane %v5561_v9, 4  ;;  %v5648_v2 = vsel %vm691_vm9, %v5647_v3, %v5561_v9 }
0x1619   : > { %v5602_v31 = vperm.slane %v5594_v26, %v9586_v60  ;;  %v5654_v1 = vperm.slane %v5648_v2, %v9586_v60  ;;  %v5606_v22 = vsel %vm691_vm9, %v5598_v0, %v5605_v20 }
0x161a   : > { %v5650_v32 = vsel %vm691_vm9, %v5577_v30, %v5649_v13  ;;  %v10492_v15 = vperm.slane %v5606_v22, %v9594_v5 }
0x161b   : > { %v5615_v55 = vrot.slane %v5602_v31, 4  ;;  %v5658_v39 = vperm.slane %v5650_v32, %v9586_v60  ;;  %v5618_v35 = vsel %vm691_vm9, %v5602_v31, %v5617_v11  ;;  %v5662_v12 = vsel %vm691_vm9, %v5654_v1, %v5661_v33 }
0x161c   : > { %v10462_v36 = vperm.slane %v5618_v35, %v9594_v5  ;;  %v10495_v51 = vperm.slane %v5662_v12, %v9594_v5  ;;  %v5629_v14 = vrot.slane %v10492_v15, 4  ;;  %v5659_v53 = vrot.slane %v5654_v1, 4 }
0x161d   : > { %v5671_v10 = vrot.slane %v5658_v39, 4  ;;  %v5616_v19 = vsel %vm691_vm9, %v5615_v55, %v5590_v57  ;;  %v5674_v43 = vsel %vm691_vm9, %v5658_v39, %v5673_v34 }
0x161e   : > { %v5633_v21 = vrot.slane %v10462_v36, 4  ;;  %v10469_v46 = vperm.slane %v5674_v43, %v9594_v5  ;;  %v5622_v37 = vperm.slane %v5616_v19, %v9594_v5  ;;  %v5685_v49 = vrot.slane %v10495_v51, 4 }
0x161f   : > { %v5672_v45 = vsel %vm691_vm9, %v5671_v10, %v5646_v29  ;;  %v5630_v40 = vsel %vm691_vm9, 0, %v5629_v14  ;;  %v5603_v43 = vrot.slane %v5598_v0, 4  ;;  %v5660_v2 = vsel %vm691_vm9, %v5659_v53, %v10481_v61 }
0x1620   : > { %v5678_v48 = vperm.slane %v5672_v45, %v9594_v5  ;;  %v5689_v56 = vrot.slane %v10469_v46, 4  ;;  %v5634_v54 = vsel %vm691_vm9, 0, %v5633_v21  ;;  %v5686_v16 = vsel %vm691_vm9, 0, %v5685_v49 }
0x1621   : > { %v5631_v30 = vrot.slane %v5622_v37, 4  ;;  %v5604_v45 = vsel %vm691_vm9, %v5603_v43, %v10478_v59 }
0x1622   : > { %8894 = vxpose.binary.xlu1.c.b16.start.end [1/2] (short) (narrow) %v5678_v48, %v5622_v37, 16  ;;  %v5690_v58 = vsel %vm691_vm9, 0, %v5689_v56  ;;  %v5687_v26 = vrot.slane %v5678_v48, 4  ;;  %v5610_v48 = vperm.slane %v5604_v45, %v9594_v5  ;;  %v5666_v56 = vperm.slane %v5660_v2, %v9594_v5 }
0x1623   : > { %8876 = vxpose.binary.xlu2.c.b16.start.end [1/2] (short) (narrow) %v5690_v58, %v5634_v54, 16  ;;  %v5632_v27 = vsel %vm691_vm9, 0, %v5631_v30 }
0x1624   : > { %v5688_v32 = vsel %vm691_vm9, 0, %v5687_v26  ;;  %v5627_v54 = vrot.slane %v5610_v48, 4  ;;  %v5683_v58 = vrot.slane %v5666_v56, 4 }
0x162b   : > { %v5386_v6 = vpop.xlane.xlu1 %5385 }
0x162c   : > { %9037 = vrcp.f32 %v5386_v6  ;;  %v5413_v42 = vand.u32 2147483648, %v5386_v6  ;;  %v5411_v57 = vand.u32 2147483647, %v5386_v6  ;;  %vm5407_vm6 = vweird.f32 %v5386_v6 }
0x162e   : > { %v5414_v9 = vor.u32 1.1754944e-38, %v5413_v42  ;;  %vm5412_vm13 = vcmp.eq.f32.partialorder %v5411_v57, 8.507059e+37 }
0x1632   : > { %v9038_v24 = vpop.eup %9037 }
0x1633   : > { %8879 = vxpose.binary.xlu2.c.b16.start.end [1/2] (short) (narrow) %v5686_v16, %v5630_v40, 16  ;;  %v5403_v25 = vmul.f32 %v9038_v24, %v5386_v6  ;;  %vm5408_vm7 = vweird.f32 %v9038_v24 }
0x1634   : > { %vm5409_vm8 = vmor %vm5407_vm6, %vm5408_vm7  ;;  %vm11032_vm7 = vcmask 257024  }
0x1635   : > { %v5404_v41 = vsub.f32 1.0, %v5403_v25  ;;  %vm11033_vm6 = vmmov %vm11032_vm7 }
0x1637   : > { %v5405_v63 = vmul.f32 %v9038_v24, %v5404_v41 }
0x1639   : > { %v5406_v4 = vadd.f32 %v9038_v24, %v5405_v63 }
0x163b   : > { %v5410_v28 = vsel %vm5409_vm8, %v9038_v24, %v5406_v4 }
0x163c   : > { %v5415_v29 = vsel %vm5412_vm13, %v5414_v9, %v5410_v28 }
0x163d   : > { %v5416_v17 = vmul.f32 %v10443_v50, %v5415_v29 }
0x163f   : > { %v5418_v13 = vpack.c.bf16 %v5416_v17, %v5416_v17 }
0x1641   : > { %v6053_v11 = vsel %vm11028_vm15, %v5418_v13, 0 }
0x1642   : > { %6062 = vmatpush.bf16.xpose.msrb.mxu1 %v6053_v11 }
0x1643   : > { %v5383_v31 = vpop.xlane.xlu0 %5382  ;;  %8882 = vxpose.binary.xlu2.c.b16.start.end [1/2] (short) (narrow) %v5688_v32, %v5632_v27, 16 }
0x1644   : > { %9039 = vrcp.f32 %v5383_v31  ;;  %v5398_v35 = vand.u32 2147483648, %v5383_v31  ;;  %v5396_v50 = vand.u32 2147483647, %v5383_v31  ;;  %vm5392_vm12 = vweird.f32 %v5383_v31 }
0x1646   : > { %v5399_v10 = vor.u32 1.1754944e-38, %v5398_v35  ;;  %vm5397_vm2 = vcmp.eq.f32.partialorder %v5396_v50, 8.507059e+37 }
0x164a   : > { %v9040_v34 = vpop.eup %9039 }
0x164b   : > { %v5388_v55 = vmul.f32 %v9040_v34, %v5383_v31  ;;  %vm5393_vm0 = vweird.f32 %v9040_v34 }
0x164c   : > { %vm5394_vm11 = vmor %vm5392_vm12, %vm5393_vm0 }
0x164d   : > { %v5389_v39 = vsub.f32 1.0, %v5388_v55 }
0x164f   : > { %v5390_v18 = vmul.f32 %v9040_v34, %v5389_v39 }
0x1651   : > { %v5391_v38 = vadd.f32 %v9040_v34, %v5390_v18 }
0x1653   : > { %v5395_v19 = vsel %vm5394_vm11, %v9040_v34, %v5391_v38  ;;  %8885 = vxpose.binary.xlu2.c.b16.start.end [1/2] (short) (narrow) %v10469_v46, %v10462_v36, 16  ;;  %v5628_v36 = vsel %vm691_vm9, 0, %v5627_v54 }
0x1654   : > { %v5400_v3 = vsel %vm5397_vm2, %v5399_v10, %v5395_v19 }
0x1655   : > { %v5401_v21 = vmul.f32 %v10447_v47, %v5400_v3  ;;  %v5684_v47 = vsel %vm691_vm9, 0, %v5683_v58 }
0x1657   : > { %v5417_v62 = vpack.c.bf16 %v5401_v21, %v5401_v21 }
0x1659   : > { %v6033_v37 = vsel %vm11029_vm3, %v5417_v62, 0 }
0x165a   : > { %6042 = vmatpush.bf16.xpose.msrb.mxu0 %v6033_v37 }
0x1663   : > { %8888 = vxpose.binary.xlu2.c.b16.start.end [1/2] (short) (narrow) %v5684_v47, %v5628_v36, 16 }
0x1673   : > { %8891 = vxpose.binary.xlu2.c.b16.start.end [1/2] (short) (narrow) %v10495_v51, %v10492_v15, 16 }
0x1683   : > { %8897 = vxpose.binary.xlu2.c.b16.start.end [1/2] (short) (narrow) %v5666_v56, %v5610_v48, 16 }
0x16c4   : > { %v8877_v46 = vpop.trf.xlu2 }
0x16c5   : > { %v5965_v1 = vrot.slane %v8877_v46, 4 }
0x16cc   : > { %v8878_v59 = vpop.trf.xlu2 }
0x16cd   : > { %v6003_v63 = vrot.slane %v8878_v59, 4 }
0x16ce   : > { %v8895_v16 = vpop.trf.xlu1 }
0x16d4   : > { %v8880_v61 = vpop.trf.xlu2 }
0x16d5   : > { %v5953_v41 = vrot.slane %v8880_v61, 4 }
0x16d6   : > { %v8896_v28 = vpop.trf.xlu1 }
0x16dc   : > { %v8881_v0 = vpop.trf.xlu2 }
0x16dd   : > { %v5991_v27 = vrot.slane %v8881_v0, 4 }
0x16e4   : > { %v8883_v20 = vpop.trf.xlu2 }
0x16e5   : > { %v5966_v33 = vsel %vm691_vm9, %v5965_v1, %v8883_v20 }
0x16e6   : > { %v5970_v15 = vperm.slane %v5966_v33, %v9586_v60 }
0x16e8   : > { %v5977_v9 = vrot.slane %v5970_v15, 4 }
0x16ec   : > { %v8884_v22 = vpop.trf.xlu2 }
0x16ed   : > { %v6004_v29 = vsel %vm691_vm9, %v6003_v63, %v8884_v22 }
0x16ee   : > { %v6008_v11 = vperm.slane %v6004_v29, %v9586_v60 }
0x16f0   : > { %v6015_v50 = vrot.slane %v6008_v11, 4 }
0x16f4   : > { %v8886_v12 = vpop.trf.xlu2 }
0x16f5   : > { %v5959_v24 = vrot.slane %v8886_v12, 4 }
0x16f7   : > { %v5960_v25 = vsel %vm691_vm9, %v5959_v24, %v8895_v16 }
0x16f8   : > { %v5964_v42 = vperm.slane %v5960_v25, %v9586_v60 }
0x16fa   : > { %v5978_v17 = vsel %vm691_vm9, %v5977_v9, %v5964_v42 }
0x16fb   : > { %v5982_v32 = vperm.slane %v5978_v17, %v9594_v5 }
0x16fc   : > { %v8887_v6 = vpop.trf.xlu2 }
0x16fd   : > { %v5997_v57 = vrot.slane %v8887_v6, 4  ;;  %v5983_v10 = vrot.slane %v5982_v32, 4  ;;  %v8537_v6 = vld [vmem:[#allocation10 + $0x28] sm:$0xff] }
0x16fe   : > { %6211 = vmatpush.bf16.msrb.mxu2 %v8537_v6 }
0x16ff   : > { %v5998_v26 = vsel %vm691_vm9, %v5997_v57, %v8896_v28 }
0x1700   : > { %v6002_v55 = vperm.slane %v5998_v26, %v9586_v60 }
0x1702   : > { %v6016_v43 = vsel %vm691_vm9, %v6015_v50, %v6002_v55  ;;  %v8536_v55 = vld [vmem:[#allocation10 + $0x20] sm:$0xff] }
0x1703   : > { %v6020_v45 = vperm.slane %v6016_v43, %v9594_v5  ;;  %6212 = vmatpush.bf16.msrb.mxu2 %v8536_v55 }
0x1704   : > { %v8889_v14 = vpop.trf.xlu2 }
0x1705   : > { %v5954_v4 = vsel %vm691_vm9, %v5953_v41, %v8889_v14  ;;  %v6021_v54 = vrot.slane %v6020_v45, 4  ;;  %v8523_v45 = vld [vmem:[#allocation7 + $0x38] sm:$0xff] }
0x1706   : > { %v5958_v30 = vperm.slane %v5954_v4, %v9586_v60  ;;  %6302 = vmatpush.bf16.msra.mxu0 %v8523_v45 }
0x1708   : > { %v5971_v39 = vrot.slane %v5958_v30, 4 }
0x170c   : > { %v8890_v49 = vpop.trf.xlu2 }
0x170d   : > { %v5992_v18 = vsel %vm691_vm9, %v5991_v27, %v8890_v49 }
0x170e   : > { %v5996_v53 = vperm.slane %v5992_v18, %v9586_v60 }
0x1710   : > { %v6009_v37 = vrot.slane %v5996_v53, 4 }
0x1714   : > { %v8892_v40 = vpop.trf.xlu2 }
0x1715   : > { %v5947_v13 = vrot.slane %v8892_v40, 4 }
0x171c   : > { %v8893_v51 = vpop.trf.xlu2 }
0x171d   : > { %v5985_v3 = vrot.slane %v8893_v51, 4 }
0x1724   : > { %v8898_v31 = vpop.trf.xlu2 }
0x1725   : > { %v5948_v34 = vsel %vm691_vm9, %v5947_v13, %v8898_v31 }
0x1726   : > { %v5952_v35 = vperm.slane %v5948_v34, %v9586_v60 }
0x1728   : > { %v5972_v38 = vsel %vm691_vm9, %v5971_v39, %v5952_v35 }
0x1729   : > { %v5976_v19 = vperm.slane %v5972_v38, %v9594_v5 }
0x172b   : > { %v5984_v21 = vsel %vm691_vm9, %v5983_v10, %v5976_v19 }
0x172c   : > { %v8899_v62 = vpop.trf.xlu2  ;;  %v6026_v47 = vshrl.u32 %v5984_v21, 16 }
0x172d   : > { %v5986_v2 = vsel %vm691_vm9, %v5985_v3, %v8899_v62 }
0x172e   : > { %v5990_v48 = vperm.slane %v5986_v2, %v9586_v60  ;;  %v8531_v2 = vld [vmem:[#allocation8 + $0x38] sm:$0xff] }
0x172f   : > { %6327 = vmatpush.bf16.msra.mxu1 %v8531_v2 }
0x1730   : > { %v6010_v56 = vsel %vm691_vm9, %v6009_v37, %v5990_v48  ;;  %v8522_v37 = vld [vmem:[#allocation7 + $0x30] sm:$0xff] }
0x1731   : > { %v6014_v58 = vperm.slane %v6010_v56, %v9594_v5  ;;  %v8530_v48 = vld [vmem:[#allocation8 + $0x30] sm:$0xff]  ;;  %6303 = vmatpush.bf16.msra.mxu0 %v8522_v37 }
0x1733   : > { %v6022_v36 = vsel %vm691_vm9, %v6021_v54, %v6014_v58  ;;  %6328 = vmatpush.bf16.msra.mxu1 %v8530_v48 }
0x1734   : > { %v6027_v46 = vshrl.u32 %v6022_v36, 16  ;;  %v6025_v59 = vpack.i.b16 %v6022_v36, %v5984_v21 }
0x1736   : > { %8451 = vmatmul.msk.bf16.vlgmr.msrb.gmra.mxu0 %vm11030_vm4, %v6025_v59  ;;  %v6028_v61 = vpack.i.b16 %v6027_v46, %v6026_v47 }
0x1738   : > { %8452 = vmatmul.msk.bf16.vlgmr.msrb.gmra.mxu1 %vm11031_vm5, %v6028_v61 }
0x17b3   : > { %v6044_v0 = vpop.f32.mrf.mxu0 }
0x17b5   : > { %v6064_v1 = vpop.f32.mrf.mxu1 }
0x17b6   : > { %v8900_v20 = vpack.i.bf16 %v6064_v1, %v6044_v0  ;;  %v8997_v0 = vld [vmem:[%s11001_s5 + $0x2] ss:$0 sm:$0xff] }
0x17b8   : > { %8901 = vxpose.xlu0.b32.start [1/2] (short) (narrow) %v8900_v20, 8 }
0x17bb   : > { %v6046_v33 = vpop.f32.mrf.mxu0 }
0x17bd   : > { %v6066_v22 = vpop.f32.mrf.mxu1 }
0x17be   : > { %v8902_v12 = vpack.i.bf16 %v6066_v22, %v6046_v33  ;;  %v8998_v33 = vld [vmem:[#allocation11 + $0x2] ss:$0 sm:$0xff] }
0x17c0   : > { %8903 = vxpose.xlu0.b32.end [2/2] (short) (narrow) %v8902_v12, 8 }
0x185c   : > { %v8904_v14 = vpop.trf.xlu0 }
0x185d   : > { %v8908_v49 = vunpack.i.h.bf16 %v8904_v14  ;;  %v8905_v40 = vunpack.i.l.bf16 %v8904_v14  ;;  %v6274_v14 = vpop.f32.mrf.mxu3 }
0x185f   : > { %v6140_v16 = vperm.slane %v8908_v49, %v9586_v60  ;;  %v6136_v24 = vperm.slane %v8905_v40, %v9586_v60  ;;  %v10575_v49 = vmul.f32 0.25, %v6274_v14 }
0x1861   : > { %v6141_v25 = vrot.slane %v6140_v16, 4  ;;  %v6143_v15 = vrot.slane %v6136_v24, 4 }
0x1863   : > { %v6142_v51 = vsel %vm691_vm9, %v6141_v25, %v6136_v24  ;;  %v6144_v41 = vsel %vm691_vm9, %v6140_v16, %v6143_v15 }
0x1864   : > { %v6148_v42 = vperm.slane %v6142_v51, %v9594_v5  ;;  %v6152_v63 = vperm.slane %v6144_v41, %v9594_v5 }
0x1865   : > { %v6276_v55 = vpop.f32.mrf.mxu3 }
0x1866   : > { %v6153_v57 = vrot.slane %v6148_v42, 4  ;;  %v6155_v4 = vrot.slane %v6152_v63, 4 }
0x1868   : > { %v6156_v9 = vsel %vm691_vm9, 0.0, %v6155_v4  ;;  %v6154_v29 = vsel %vm691_vm9, 0.0, %v6153_v57  ;;  %v6157_v17 = vsel %vm691_vm9, %v6155_v4, %v6148_v42 }
0x1869   : > { %v6162_v28 = vrot.slane %v6156_v9, 4  ;;  %v6161_v13 = vperm.slane %v6157_v17, %v9586_v60 }
0x186b   : > { %v6163_v30 = vsel %vm691_vm9, %v6162_v28, %v6154_v29 }
0x186c   : > { %v6167_v26 = vperm.slane %v6163_v30, %v9586_v60 }
0x186e   : > { %v6168_v11 = vrot.slane %v6167_v26, 4 }
0x1870   : > { %v6169_v31 = vsel %vm691_vm9, %v6168_v11, %v6161_v13 }
0x1871   : > { %v6173_v27 = vperm.slane %v6169_v31, %v9594_v5 }
0x1873   : > { %v6174_v32 = vrot.slane %v6173_v27, 4 }
0x1875   : > { %v6175_v34 = vsel %vm691_vm9, 0.0, %v6174_v32 }
0x1876   : > { %6177 = vrot.lane.b32.xlu2 %v6175_v34, %s9341_s15 }
0x18d0   : > { %v6178_v39 = vpop.permute.xlu2 %6177 }
0x18d1   : > { %v6180_v35 = vsel %vm1470_vm10, %v6173_v27, %v6178_v39  ;;  %v10592_v39 = vmul.f32 0.25, %v6276_v55 }
0x18d2   : > { %v6181_v18 = vpack.c.bf16 %v6180_v35, %v6180_v35 }
0x18d4   : > { %8461 = vmatmul.msk.bf16.vlgmr.msrb.gmra.mxu2 %vm528_vm1, %v6181_v18 }
0x1957   : > { %v6214_v50 = vpop.f32.mrf.mxu2 }
0x1958   : > { %v6215_v38 = vadd.f32 %v6214_v50, %v10299_v8 }
0x195a   : > { %v6218_v10 = vsel %vm11032_vm7, %v6215_v38, 0.0 }
0x195b   : > { %6219 = vadd.xlane.f32.xlu1 %v6218_v10 }
0x195f   : > { %v6216_v19 = vpop.f32.mrf.mxu2 }
0x19ce   : > { %v6220_v43 = vpop.xlane.xlu1 %6219 }
0x19cf   : > { %v6221_v53 = vmul.f32 %v6220_v43, %v9846_v44 }
0x19d1   : > { %v6222_v3 = vsub.f32 %v6215_v38, %v6221_v53 }
0x19d3   : > { %v6223_v21 = vmul.f32 %v6222_v3, %v6222_v3 }
0x19d5   : > { %v6224_v62 = vsel %vm11033_vm6, %v6223_v21, 0.0 }
0x19d6   : > { %6225 = vadd.xlane.f32.xlu0 %v6224_v62 }
0x1a49   : > { %v6226_v8 = vpop.xlane.xlu0 %6225 }
0x1a4a   : > { %v6227_v56 = vmul.f32 %v6226_v8, %v9846_v44 }
0x1a4c   : > { %v6228_v54 = vadd.f32 1e-06, %v6227_v56 }
0x1a4e   : > { %9041 = vrsqrt.f32 %v6228_v54  ;;  %vm6235_vm13 = vweird.f32 %v6228_v54 }
0x1a54   : > { %v9042_v58 = vpop.eup %9041 }
0x1a55   : > { %v6230_v36 = vmul.f32 %v9042_v58, %v6228_v54  ;;  %vm6236_vm8 = vweird.f32 %v9042_v58 }
0x1a56   : > { %vm6237_vm15 = vmor %vm6235_vm13, %vm6236_vm8 }
0x1a57   : > { %v6231_v47 = vmul.f32 %v9042_v58, %v6230_v36 }
0x1a59   : > { %v6232_v46 = vmul.f32 0.5, %v6231_v47 }
0x1a5b   : > { %v6233_v59 = vsub.f32 1.5, %v6232_v46 }
0x1a5d   : > { %v6234_v61 = vmul.f32 %v9042_v58, %v6233_v59 }
0x1a5f   : > { %v6238_v1 = vsel %vm6237_vm15, %v9042_v58, %v6234_v61 }
0x1a60   : > { %v6239_v20 = vmul.f32 %v6238_v1, %v6222_v3 }
0x1a62   : > { %v6243_v22 = vmul.f32 %v8997_v0, %v6239_v20 }
0x1a64   : > { %v6247_v12 = vadd.f32 %v8998_v33, %v6243_v22 }
0x1a66   : > { %v6249_v6 = vpack.c.bf16 %v6247_v12, %v6247_v12 }
0x1a68   : > { %8479 = vmatmul.msk.bf16.vlgmr.msra.gmra.mxu0 %vm528_vm1, %v6249_v6  ;;  %8488 = vmatmul.msk.bf16.vlgmr.msra.gmra.mxu1 %vm528_vm1, %v6249_v6 }
0x1ae5   : > { %v6305_v40 = vpop.f32.mrf.mxu0  ;;  %v10577_v16 = vpop.f32.mrf.mxu1 }
0x1ae6   : > { %v8909_v24 = vpack.i.bf16 %v10575_v49, %v6305_v40  ;;  %v6468_v51 = vperm.slane %v6305_v40, %v9586_v60 }
0x1ae8   : > { %8910 = vrot.lane.b32.xlu2 %v8909_v24, %s9338_s9  ;;  %v6476_v57 = vrot.slane %v6468_v51, 4 }
0x1aed   : > { %v6307_v25 = vpop.f32.mrf.mxu0  ;;  %v6332_v15 = vpop.f32.mrf.mxu1 }
0x1b42   : > { %v10582_v41 = vpop.permute.xlu2 %8910 }
0x1b43   : > { %v8912_v42 = vunpack.i.l.bf16 %v10582_v41 }
0x1b45   : > { %v6473_v63 = vperm.slane %v8912_v42, %v9586_v60 }
0x1b47   : > { %v6474_v4 = vrot.slane %v6473_v63, 4  ;;  %v6477_v9 = vsel %vm691_vm9, %v6473_v63, %v6476_v57 }
0x1b48   : > { %v6485_v29 = vperm.slane %v6477_v9, %v9594_v5 }
0x1b49   : > { %v6475_v28 = vsel %vm691_vm9, %v6474_v4, %v6468_v51 }
0x1b4a   : > { %v6481_v17 = vperm.slane %v6475_v28, %v9594_v5  ;;  %v6488_v30 = vrot.slane %v6485_v29, 4  ;;  %v6492_v11 = vpack.c.bf16 %v6485_v29, %v6485_v29 }
0x1b4c   : > { %v6486_v26 = vrot.slane %v6481_v17, 4  ;;  %v6489_v13 = vsel %vm691_vm9, 0.0, %v6488_v30  ;;  %v6490_v32 = vpack.c.bf16 %v6481_v17, %v6481_v17 }
0x1b4d   : > { %v6493_v31 = vpack.c.bf16 %v6489_v13, %v6489_v13 }
0x1b4e   : > { %v6487_v27 = vsel %vm691_vm9, 0.0, %v6486_v26 }
0x1b4f   : > { %v6491_v34 = vpack.c.bf16 %v6487_v27, %v6487_v27  ;;  %8914 = vxpose.binary.xlu1.c.b16.start.end [1/2] (short) (narrow) %v6493_v31, %v6492_v11, 16 }
0x1b51   : > { %8917 = vxpose.binary.xlu2.c.b16.start.end [1/2] (short) (narrow) %v6491_v34, %v6490_v32, 16 }
0x1bba   : > { %6338 = vrot.lane.b32.xlu2 %v10592_v39, %s9338_s9 }
0x1bf2   : > { %v8918_v35 = vpop.trf.xlu2 }
0x1bf3   : > { %v6678_v38 = vshrl.u32 %v8918_v35, 16 }
0x1bfa   : > { %v8919_v18 = vpop.trf.xlu2 }
0x1bfb   : > { %v8915_v50 = vpop.trf.xlu1  ;;  %v6679_v10 = vshrl.u32 %v8919_v18, 16  ;;  %v6676_v19 = vpack.i.b16 %v8919_v18, %v8918_v35 }
0x1bfc   : > { %v6686_v21 = vshrl.u32 %v8915_v50, 16 }
0x1bfd   : > { %v6680_v43 = vpack.i.b16 %v6679_v10, %v6678_v38  ;;  %v6695_v53 = vperm.slane %v6676_v19, %v9586_v60  ;;  %v6690_v14 = vrot.slane %v6676_v19, 4 }
0x1bff   : > { %v6747_v2 = vperm.slane %v6680_v43, %v9586_v60  ;;  %v6712_v8 = vrot.slane %v6695_v53, 4  ;;  %v6742_v40 = vrot.slane %v6680_v43, 4  ;;  %v6691_v63 = vsel %vm691_vm9, %v9891_v7, %v6690_v14 }
0x1c00   : > { %v6699_v17 = vperm.slane %v6691_v63, %v9586_v60  ;;  %v6399_v63 = vperm.slane %v10592_v39, %v9586_v60 }
0x1c01   : > { %v6764_v36 = vrot.slane %v6747_v2, 4  ;;  %v6743_v57 = vsel %vm691_vm9, %v9891_v7, %v6742_v40 }
0x1c02   : > { %v6751_v30 = vperm.slane %v6743_v57, %v9586_v60  ;;  %v6724_v10 = vrot.slane %v6699_v17, 4 }
0x1c03   : > { %v8916_v3 = vpop.trf.xlu1 }
0x1c04   : > { %v6684_v62 = vpack.i.b16 %v8916_v3, %v8915_v50  ;;  %v6687_v45 = vshrl.u32 %v8916_v3, 16  ;;  %v6776_v19 = vrot.slane %v6751_v30, 4 }
0x1c06   : > { %v6688_v37 = vpack.i.b16 %v6687_v45, %v6686_v21  ;;  %v6705_v48 = vperm.slane %v6684_v62, %v9586_v60  ;;  %v6700_v56 = vrot.slane %v6684_v62, 4 }
0x1c08   : > { %v6710_v54 = vrot.slane %v6705_v48, 4  ;;  %v6752_v58 = vrot.slane %v6688_v37, 4  ;;  %v6713_v47 = vsel %vm691_vm9, %v6705_v48, %v6712_v8  ;;  %v6757_v46 = vperm.slane %v6688_v37, %v9586_v60 }
0x1c09   : > { %v6701_v61 = vsel %vm691_vm9, %v9891_v7, %v6700_v56  ;;  %v6721_v33 = vperm.slane %v6713_v47, %v9594_v5  ;;  %v8913_v56 = vunpack.i.h.bf16 %v10582_v41  ;;  %v6394_v47 = vrot.slane %v10592_v39, 4 }
0x1c0a   : > { %v6711_v59 = vsel %vm691_vm9, %v6710_v54, %v6695_v53  ;;  %v6762_v0 = vrot.slane %v6757_v46, 4  ;;  %v6765_v1 = vsel %vm691_vm9, %v6757_v46, %v6764_v36  ;;  %v6753_v20 = vsel %vm691_vm9, %v9891_v7, %v6752_v58 }
0x1c0b   : > { %v6773_v22 = vperm.slane %v6765_v1, %v9594_v5  ;;  %v6717_v12 = vperm.slane %v6711_v59, %v9594_v5  ;;  %v6709_v15 = vperm.slane %v6701_v61, %v9586_v60  ;;  %v6761_v51 = vperm.slane %v6753_v20, %v9586_v60 }
0x1c0c   : > { %v6763_v6 = vsel %vm691_vm9, %v6762_v0, %v6747_v2  ;;  %v6736_v11 = vrot.slane %v6721_v33, 4  ;;  %v6342_v58 = vrot.slane %v10575_v49, 4  ;;  %v6352_v46 = vrot.slane %v8913_v56, 4 }
0x1c0d   : > { %8920 = vxpose.binary.xlu1.c.b16.start.end [1/2] (short) (narrow) %v6773_v22, %v6721_v33, 16  ;;  %v6734_v24 = vrot.slane %v6717_v12, 4  ;;  %v6769_v25 = vperm.slane %v6763_v6, %v9594_v5  ;;  %v6722_v28 = vrot.slane %v6709_v15, 4  ;;  %v6774_v29 = vrot.slane %v6761_v51, 4 }
0x1c0e   : > { %v6788_v31 = vrot.slane %v6773_v22, 4  ;;  %v6737_v34 = vsel %vm691_vm9, 0, %v6736_v11  ;;  %v6725_v43 = vsel %vm691_vm9, %v6709_v15, %v6724_v10  ;;  %v6777_v53 = vsel %vm691_vm9, %v6761_v51, %v6776_v19 }
0x1c0f   : > { %v6786_v42 = vrot.slane %v6769_v25, 4  ;;  %v6735_v4 = vsel %vm691_vm9, 0, %v6734_v24  ;;  %v6723_v26 = vsel %vm691_vm9, %v6722_v28, %v6699_v17  ;;  %v6775_v13 = vsel %vm691_vm9, %v6774_v29, %v6751_v30 }
0x1c10   : > { %v6729_v27 = vperm.slane %v6723_v26, %v9594_v5  ;;  %v6781_v32 = vperm.slane %v6775_v13, %v9594_v5  ;;  %v6789_v55 = vsel %vm691_vm9, 0, %v6788_v31  ;;  %v6733_v3 = vperm.slane %v6725_v43, %v9594_v5 }
0x1c11   : > { %v6787_v9 = vsel %vm691_vm9, 0, %v6786_v42  ;;  %v6785_v21 = vperm.slane %v6777_v53, %v9594_v5  ;;  %v6343_v0 = vsel %vm691_vm9, 0.0, %v6342_v58  ;;  %v6395_v1 = vsel %vm691_vm9, 0.0, %v6394_v47 }
0x1c12   : > { %8923 = vxpose.binary.xlu0.c.b16.start.end [1/2] (short) (narrow) %v6787_v9, %v6735_v4, 16  ;;  %v6738_v35 = vrot.slane %v6729_v27, 4  ;;  %v6790_v18 = vrot.slane %v6781_v32, 4  ;;  %v6740_v62 = vrot.slane %v6733_v3, 4  ;;  %v6353_v20 = vsel %vm691_vm9, 0.0, %v6352_v46 }
0x1c13   : > { %v6792_v45 = vrot.slane %v6785_v21, 4  ;;  %v6351_v41 = vperm.slane %v6343_v0, %v9586_v60  ;;  %v6361_v6 = vperm.slane %v6353_v20, %v9586_v60  ;;  %v6347_v15 = vperm.slane %v10575_v49, %v9586_v60 }
0x1c14   : > { %v6739_v50 = vsel %vm691_vm9, 0, %v6738_v35  ;;  %v6791_v38 = vsel %vm691_vm9, 0, %v6790_v18  ;;  %v6741_v2 = vsel %vm691_vm9, 0, %v6740_v62  ;;  %v6339_v36 = vpop.permute.xlu2 %6338  ;;  %v6357_v28 = vperm.slane %v8913_v56, %v9586_v60 }
0x1c15   : > { %v6793_v37 = vsel %vm691_vm9, 0, %v6792_v45  ;;  %v6404_v59 = vrot.slane %v6339_v36, 4  ;;  %v6376_v40 = vrot.slane %v6351_v41, 4  ;;  %v6374_v51 = vrot.slane %v6361_v6, 4 }
0x1c16   : > { %v6409_v17 = vperm.slane %v6339_v36, %v9586_v60  ;;  %v6364_v30 = vrot.slane %v6347_v15, 4  ;;  %v6416_v13 = vrot.slane %v6399_v63, 4  ;;  %v6362_v39 = vrot.slane %v6357_v28, 4 }
0x1c17   : > { %v6405_v22 = vsel %vm691_vm9, 0.0, %v6404_v59  ;;  %v6377_v42 = vsel %vm691_vm9, %v6361_v6, %v6376_v40  ;;  %v6375_v49 = vsel %vm691_vm9, %v6374_v51, %v6351_v41 }
0x1c18   : > { %v6413_v14 = vperm.slane %v6405_v22, %v9586_v60  ;;  %v6385_v29 = vperm.slane %v6377_v42, %v9594_v5  ;;  %v6365_v31 = vsel %vm691_vm9, %v6357_v28, %v6364_v30  ;;  %v6417_v35 = vsel %vm691_vm9, %v6409_v17, %v6416_v13 }
0x1c19   : > { %v6363_v19 = vsel %vm691_vm9, %v6362_v39, %v6347_v15  ;;  %v6425_v43 = vperm.slane %v6417_v35, %v9594_v5 }
0x1c1a   : > { %v6426_v57 = vrot.slane %v6413_v14, 4  ;;  %v6452_v0 = vpack.c.bf16 %v6385_v29, %v6385_v29 }
0x1c1b   : > { %v6440_v36 = vrot.slane %v6425_v43, 4 }
0x1c1d   : > { %8926 = vxpose.binary.xlu1.c.b16.start.end [1/2] (short) (narrow) %v6789_v55, %v6737_v34, 16  ;;  %v6392_v34 = vrot.slane %v6385_v29, 4  ;;  %v6414_v55 = vrot.slane %v6409_v17, 4 }
0x1c22   : > { %8932 = vxpose.binary.xlu0.c.b16.start.end [1/2] (short) (narrow) %v6791_v38, %v6739_v50, 16  ;;  %v6373_v38 = vperm.slane %v6365_v31, %v9594_v5  ;;  %v6456_v31 = vpack.c.bf16 %v6425_v43, %v6425_v43 }
0x1c2d   : > { %8929 = vxpose.binary.xlu1.c.b16.start.end [1/2] (short) (narrow) %v6785_v21, %v6733_v3, 16  ;;  %v6393_v3 = vsel %vm691_vm9, 0.0, %v6392_v34  ;;  %v6415_v21 = vsel %vm691_vm9, %v6414_v55, %v6399_v63 }
0x1c2e   : > { %v6453_v56 = vpack.c.bf16 %v6393_v3, %v6393_v3  ;;  %v6421_v58 = vperm.slane %v6415_v21, %v9594_v5 }
0x1c30   : > { %v6438_v40 = vrot.slane %v6421_v58, 4 }
0x1c32   : > { %8935 = vxpose.binary.xlu0.c.b16.start.end [1/2] (short) (narrow) %v6793_v37, %v6741_v2, 16  ;;  %v6369_v2 = vperm.slane %v6363_v19, %v9594_v5  ;;  %v6388_v37 = vrot.slane %v6373_v38, 4 }
0x1c34   : > { %v6386_v20 = vrot.slane %v6369_v2, 4  ;;  %v6389_v41 = vsel %vm691_vm9, 0.0, %v6388_v37  ;;  %v6446_v35 = vpack.c.bf16 %v6369_v2, %v6369_v2 }
0x1c35   : > { %v6449_v63 = vpack.c.bf16 %v6389_v41, %v6389_v41 }
0x1c36   : > { %v6387_v28 = vsel %vm691_vm9, 0.0, %v6386_v20 }
0x1c3d   : > { %8941 = vxpose.binary.xlu1.c.b16.start.end [1/2] (short) (narrow) %v6769_v25, %v6717_v12, 16  ;;  %v6403_v12 = vperm.slane %v6395_v1, %v9586_v60 }
0x1c3f   : > { %v6428_v25 = vrot.slane %v6403_v12, 4  ;;  %v6427_v11 = vsel %vm691_vm9, %v6426_v57, %v6403_v12 }
0x1c40   : > { %v6433_v18 = vperm.slane %v6427_v11, %v9594_v5  ;;  %v6439_v11 = vsel %vm691_vm9, 0.0, %v6438_v40 }
0x1c41   : > { %v6429_v4 = vsel %vm691_vm9, %v6413_v14, %v6428_v25  ;;  %v6550_v14 = vrot.slane %v6453_v56, 4  ;;  %v6441_v25 = vsel %vm691_vm9, 0.0, %v6440_v36 }
0x1c42   : > { %8938 = vxpose.binary.xlu0.c.b16.start.end [1/2] (short) (narrow) %v6781_v32, %v6729_v27, 16  ;;  %v6437_v26 = vperm.slane %v6429_v4, %v9594_v5  ;;  %v6381_v32 = vperm.slane %v6375_v49, %v9594_v5  ;;  %v6442_v62 = vrot.slane %v6433_v18, 4  ;;  %v6532_v4 = vrot.slane %v6452_v0, 4 }
0x1c43   : > { %v6457_v29 = vpack.c.bf16 %v6441_v25, %v6441_v25  ;;  %v6458_v17 = vpack.c.bf16 %v6433_v18, %v6433_v18  ;;  %v6448_v49 = vpack.c.bf16 %v6373_v38, %v6373_v38  ;;  %v6551_v13 = vsel %vm691_vm9, %v6550_v14, %v6449_v63 }
0x1c44   : > { %v6444_v50 = vrot.slane %v6437_v26, 4  ;;  %v6390_v53 = vrot.slane %v6381_v32, 4  ;;  %v6443_v1 = vsel %vm691_vm9, 0.0, %v6442_v62  ;;  %v6460_v22 = vpack.c.bf16 %v6437_v26, %v6437_v26 }
0x1c45   : > { %v6459_v15 = vpack.c.bf16 %v6443_v1, %v6443_v1  ;;  %v6450_v57 = vpack.c.bf16 %v6381_v32, %v6381_v32  ;;  %v6533_v18 = vsel %vm691_vm9, %v6532_v4, %v6448_v49  ;;  %v6555_v38 = vperm.slane %v6551_v13, %v9586_v60 }
0x1c46   : > { %v6445_v45 = vsel %vm691_vm9, 0.0, %v6444_v50  ;;  %v6391_v46 = vsel %vm691_vm9, 0.0, %v6390_v53  ;;  %v6568_v30 = vrot.slane %v6460_v22, 4  ;;  %v6447_v50 = vpack.c.bf16 %v6387_v28, %v6387_v28 }
0x1c47   : > { %v6461_v59 = vpack.c.bf16 %v6445_v45, %v6445_v45  ;;  %v6451_v6 = vpack.c.bf16 %v6391_v46, %v6391_v46  ;;  %v6580_v34 = vrot.slane %v6459_v15, 4  ;;  %v6526_v19 = vrot.slane %v6450_v57, 4 }
0x1c48   : > { %v6455_v53 = vpack.c.bf16 %v6439_v11, %v6439_v11  ;;  %v6562_v3 = vrot.slane %v6458_v17, 4  ;;  %v6569_v21 = vsel %vm691_vm9, %v6568_v30, %v6456_v31  ;;  %v6454_v45 = vpack.c.bf16 %v6421_v58, %v6421_v58 }
0x1c49   : > { %v6586_v51 = vrot.slane %v6461_v59, 4  ;;  %v6544_v26 = vrot.slane %v6451_v6, 4  ;;  %v6527_v46 = vsel %vm691_vm9, %v6526_v19, %v6446_v35  ;;  %v6537_v59 = vperm.slane %v6533_v18, %v9586_v60 }
0x1c4a   : > { %v6573_v0 = vperm.slane %v6569_v21, %v9586_v60  ;;  %v6563_v58 = vsel %vm691_vm9, %v6562_v3, %v6454_v45  ;;  %v6556_v22 = vrot.slane %v6555_v38, 4  ;;  %v6531_v63 = vperm.slane %v6527_v46, %v9586_v60 }
0x1c4b   : > { %v6587_v55 = vsel %vm691_vm9, %v6586_v51, %v6457_v29  ;;  %v6545_v43 = vsel %vm691_vm9, %v6544_v26, %v6447_v50  ;;  %v6538_v57 = vrot.slane %v6537_v59, 4 }
0x1c4c   : > { %v6591_v37 = vperm.slane %v6587_v55, %v9586_v60  ;;  %v6549_v1 = vperm.slane %v6545_v43, %v9586_v60 }
0x1c4d   : > { %v6539_v31 = vsel %vm691_vm9, %v6538_v57, %v6531_v63  ;;  %v6500_v57 = vperm.slane %v10577_v16, %v9586_v60 }
0x1c4e   : > { %v6592_v6 = vrot.slane %v6591_v37, 4  ;;  %v6557_v26 = vsel %vm691_vm9, %v6556_v22, %v6549_v1  ;;  %v6543_v21 = vperm.slane %v6539_v31, %v9594_v5 }
0x1c4f   : > { %v6561_v50 = vperm.slane %v6557_v26, %v9594_v5 }
0x1c50   : > { %v6601_v59 = vshrl.u32 %v6543_v21, 16 }
0x1c51   : > { %v6600_v46 = vpack.i.b16 %v6561_v50, %v6543_v21 }
0x1cb0   : > { %6495 = vrot.lane.b32.xlu0 %v10577_v16, %s9338_s9  ;;  %s381_s9 = scalar_lea.vmem [#allocation13], %s8335_s1 }
0x1cb9   : > { %v10638_v48 = vpop.trf.xlu1 }
0x1cba   : > { %v7050_v20 = vrot.slane %v10638_v48, 4  ;;  %v6567_v48 = vperm.slane %v6563_v58, %v9586_v60 }
0x1cbe   : > { %v10640_v8 = vpop.trf.xlu0 }
0x1cc1   : > { %v10643_v54 = vpop.trf.xlu1 }
0x1cc2   : > { %v7088_v40 = vrot.slane %v10643_v54, 4 }
0x1cc6   : > { %v10647_v61 = vpop.trf.xlu0 }
0x1cc9   : > { %v10652_v33 = vpop.trf.xlu1 }
0x1cca   : > { %v7056_v2 = vrot.slane %v10652_v33, 4 }
0x1ccc   : > { %v7057_v25 = vsel %vm691_vm9, %v7056_v2, %v10640_v8 }
0x1ccd   : > { %v7061_v8 = vperm.slane %v7057_v25, %v9586_v60 }
0x1cce   : > { %v10659_v24 = vpop.trf.xlu0 }
0x1ccf   : > { %v7074_v55 = vrot.slane %v7061_v8, 4 }
0x1cd1   : > { %v10667_v9 = vpop.trf.xlu1 }
0x1cd2   : > { %v7094_v41 = vrot.slane %v10667_v9, 4 }
0x1cd4   : > { %v7095_v4 = vsel %vm691_vm9, %v7094_v41, %v10647_v61 }
0x1cd5   : > { %v7099_v13 = vperm.slane %v7095_v4, %v9586_v60 }
0x1cd6   : > { %v10676_v27 = vpop.trf.xlu0 }
0x1cd7   : > { %v7112_v38 = vrot.slane %v7099_v13, 4 }
0x1cd9   : > { %v10682_v10 = vpop.trf.xlu1 }
0x1cda   : > { %v7062_v36 = vrot.slane %v10682_v10, 4 }
0x1cde   : > { %v8936_v47 = vpop.trf.xlu0 }
0x1cdf   : > { %v7068_v42 = vrot.slane %v8936_v47, 4 }
0x1ce1   : > { %v10694_v12 = vpop.trf.xlu1  ;;  %v7069_v32 = vsel %vm691_vm9, %v7068_v42, %v10659_v24  ;;  %v6581_v24 = vsel %vm691_vm9, %v6580_v34, %v6455_v53  ;;  %v6574_v42 = vrot.slane %v6573_v0, 4 }
0x1ce2   : > { %v7073_v56 = vperm.slane %v7069_v32, %v9586_v60  ;;  %v6585_v33 = vperm.slane %v6581_v24, %v9586_v60  ;;  %v7100_v30 = vrot.slane %v10694_v12, 4 }
0x1ce3   : > { %v6575_v11 = vsel %vm691_vm9, %v6574_v42, %v6567_v48 }
0x1ce4   : > { %v7080_v10 = vrot.slane %v7073_v56, 4  ;;  %v6593_v17 = vsel %vm691_vm9, %v6592_v6, %v6585_v33  ;;  %v6579_v18 = vperm.slane %v6575_v11, %v9594_v5  ;;  %v6602_v56 = vshrl.u32 %v6561_v50, 16 }
0x1ce5   : > { %v6597_v34 = vperm.slane %v6593_v17, %v9594_v5 }
0x1ce6   : > { %v8937_v39 = vpop.trf.xlu0  ;;  %v6603_v33 = vpack.i.b16 %v6602_v56, %v6601_v59 }
0x1ce7   : > { %v7106_v47 = vrot.slane %v8937_v39, 4  ;;  %v6608_v43 = vshrl.u32 %v6597_v34, 16 }
0x1ce8   : > { %v7154_v48 = vunpack.c.l.b16 %v6603_v33 }
0x1ce9   : > { %v8942_v62 = vpop.trf.xlu1  ;;  %v7107_v15 = vsel %vm691_vm9, %v7106_v47, %v10676_v27  ;;  %v6607_v47 = vshrl.u32 %v6579_v18, 16 }
0x1cea   : > { %v7051_v54 = vsel %vm691_vm9, %v7050_v20, %v8942_v62  ;;  %v7111_v27 = vperm.slane %v7107_v15, %v9586_v60 }
0x1ceb   : > { %v7055_v61 = vperm.slane %v7051_v54, %v9586_v60  ;;  %v6609_v20 = vpack.i.b16 %v6608_v43, %v6607_v47 }
0x1cec   : > { %v7118_v32 = vrot.slane %v7111_v27, 4 }
0x1ced   : > { %v7075_v53 = vsel %vm691_vm9, %v7074_v55, %v7055_v61  ;;  %v7155_v25 = vunpack.c.l.b16 %v6609_v20 }
0x1cee   : > { %v8939_v14 = vpop.trf.xlu0  ;;  %v7079_v24 = vperm.slane %v7075_v53, %v9594_v5 }
0x1cef   : > { %v7063_v51 = vsel %vm691_vm9, %v7062_v36, %v8939_v14  ;;  %v6606_v36 = vpack.i.b16 %v6597_v34, %v6579_v18  ;;  %v7156_v42 = vpack.c.b16 %v7155_v25, %v7154_v48 }
0x1cf0   : > { %v7067_v9 = vperm.slane %v7063_v51, %v9586_v60 }
0x1cf1   : > { %v8943_v28 = vpop.trf.xlu1  ;;  %v7135_v22 = vunpack.c.l.b16 %v6606_v36 }
0x1cf2   : > { %v7081_v29 = vsel %vm691_vm9, %v7080_v10, %v7067_v9  ;;  %v7089_v49 = vsel %vm691_vm9, %v7088_v40, %v8943_v28  ;;  %v7134_v40 = vunpack.c.l.b16 %v6600_v46 }
0x1cf3   : > { %v7085_v39 = vperm.slane %v7081_v29, %v9594_v5  ;;  %v7093_v12 = vperm.slane %v7089_v49, %v9586_v60  ;;  %v6508_v29 = vrot.slane %v6500_v57, 4 }
0x1cf4   : > { %v7136_v51 = vpack.c.b16 %v7135_v22, %v7134_v40 }
0x1cf5   : > { %v7086_v62 = vrot.slane %v7085_v39, 4  ;;  %v7113_v37 = vsel %vm691_vm9, %v7112_v38, %v7093_v12 }
0x1cf6   : > { %v8940_v35 = vpop.trf.xlu0  ;;  %v7117_v1 = vperm.slane %v7113_v37, %v9594_v5 }
0x1cf7   : > { %v7101_v19 = vsel %vm691_vm9, %v7100_v30, %v8940_v35  ;;  %v7087_v58 = vsel %vm691_vm9, %v7086_v62, %v7079_v24 }
0x1cf8   : > { %v7105_v3 = vperm.slane %v7101_v19, %v9586_v60  ;;  %v7130_v10 = vshrl.u32 %v7087_v58, 16 }
0x1cfa   : > { %v7119_v45 = vsel %vm691_vm9, %v7118_v32, %v7105_v3 }
0x1cfb   : > { %v7123_v2 = vperm.slane %v7119_v45, %v9594_v5 }
0x1cfd   : > { %v7124_v0 = vrot.slane %v7123_v2, 4 }
0x1cff   : > { %v7125_v41 = vsel %vm691_vm9, %v7124_v0, %v7117_v1 }
0x1d00   : > { %v7128_v6 = vpack.i.b16 %v7125_v41, %v7087_v58  ;;  %v7131_v14 = vshrl.u32 %v7125_v41, 16 }
0x1d02   : > { %7147 = vmatpush.bf16.msra.mxu2 %v7128_v6  ;;  %v7132_v15 = vpack.i.b16 %v7131_v14, %v7130_v10 }
0x1d04   : > { %7167 = vmatpush.bf16.msrb.mxu3 %v7132_v15 }
0x1d05   : > { %8489 = vmatmul.msk.bf16.vlgmr.msra.gmra.mxu2 %vm1470_vm10, %v7136_v51 }
0x1d07   : > { %8490 = vmatmul.msk.bf16.vlgmr.msrb.gmra.mxu3 %vm1470_vm10, %v7156_v42 }
0x1d22   : > { %v6496_v9 = vpop.permute.xlu0 %6495 }
0x1d23   : > { %v6505_v63 = vperm.slane %v6496_v9, %v9586_v60 }
0x1d25   : > { %v6506_v4 = vrot.slane %v6505_v63, 4  ;;  %v6509_v49 = vsel %vm691_vm9, %v6505_v63, %v6508_v29 }
0x1d26   : > { %v6517_v26 = vperm.slane %v6509_v49, %v9594_v5 }
0x1d27   : > { %v6507_v54 = vsel %vm691_vm9, %v6506_v4, %v6500_v57 }
0x1d28   : > { %v6513_v28 = vperm.slane %v6507_v54, %v9594_v5  ;;  %v6520_v13 = vrot.slane %v6517_v26, 4  ;;  %v6524_v16 = vpack.c.bf16 %v6517_v26, %v6517_v26 }
0x1d2a   : > { %v6518_v8 = vrot.slane %v6513_v28, 4  ;;  %v6522_v17 = vpack.c.bf16 %v6513_v28, %v6513_v28  ;;  %v6521_v61 = vsel %vm691_vm9, 0.0, %v6520_v13 }
0x1d2b   : > { %v6525_v11 = vpack.c.bf16 %v6521_v61, %v6521_v61 }
0x1d2c   : > { %v6519_v27 = vsel %vm691_vm9, 0.0, %v6518_v8 }
0x1d2d   : > { %v6523_v30 = vpack.c.bf16 %v6519_v27, %v6519_v27 }
0x1d2f   : > { %8944 = vxpose.binary.xlu2.c.b16.start.end [1/2] (short) (narrow) %v6523_v30, %v6522_v17, 16 }
0x1d3f   : > { %8947 = vxpose.binary.xlu2.c.b16.start.end [1/2] (short) (narrow) %v6525_v11, %v6524_v16, 16 }
0x1d88   : > { %v10770_v39 = vpop.f32.mrf.mxu2 }
0x1d89   : > { %v7174_v31 = vsel %vm3324_vm14, %v10770_v39, -inf }
0x1d8a   : > { %7175 = vmax.xlane.f32.xlu1 %v7174_v31  ;;  %v10774_v34 = vpop.f32.mrf.mxu3 }
0x1d8b   : > { %v7180_v55 = vsel %vm3324_vm14, %v10774_v34, -inf }
0x1d90   : > { %v10778_v32 = vpop.f32.mrf.mxu2 }
0x1d91   : > { %v7177_v35 = vsel %vm3324_vm14, %v10778_v32, -inf }
0x1d92   : > { %v10782_v12 = vpop.f32.mrf.mxu3 }
0x1d93   : > { %v7183_v50 = vsel %vm3324_vm14, %v10782_v12, -inf }
0x1db0   : > { %7181 = vmax.xlane.f32.xlu2 %v7180_v55 }
0x1db8   : > { %7178 = vmax.xlane.f32.xlu2 %v7177_v35 }
0x1dc0   : > { %7184 = vmax.xlane.f32.xlu2 %v7183_v50 }
0x1dd0   : > { %v8945_v19 = vpop.trf.xlu2 }
0x1dd1   : > { %v7342_v53 = vshrl.u32 %v8945_v19, 16 }
0x1dd8   : > { %v8946_v18 = vpop.trf.xlu2 }
0x1dd9   : > { %v7343_v38 = vshrl.u32 %v8946_v18, 16  ;;  %v7340_v3 = vpack.i.b16 %v8946_v18, %v8945_v19 }
0x1ddb   : > { %v7344_v62 = vpack.i.b16 %v7343_v38, %v7342_v53  ;;  %v7354_v43 = vrot.slane %v7340_v3, 4  ;;  %v7359_v37 = vperm.slane %v7340_v3, %v9586_v60 }
0x1ddd   : > { %v7406_v45 = vrot.slane %v7344_v62, 4  ;;  %v7355_v56 = vsel %vm691_vm9, %v9891_v7, %v7354_v43  ;;  %v7376_v59 = vrot.slane %v7359_v37, 4  ;;  %v7411_v0 = vperm.slane %v7344_v62, %v9586_v60 }
0x1dde   : > { %v7363_v1 = vperm.slane %v7355_v56, %v9586_v60 }
0x1ddf   : > { %v7407_v2 = vsel %vm691_vm9, %v9891_v7, %v7406_v45  ;;  %v7428_v14 = vrot.slane %v7411_v0, 4 }
0x1de0   : > { %v8948_v21 = vpop.trf.xlu2  ;;  %v7415_v22 = vperm.slane %v7407_v2, %v9586_v60  ;;  %v7388_v51 = vrot.slane %v7363_v1, 4 }
0x1de1   : > { %v7350_v36 = vshrl.u32 %v8948_v21, 16 }
0x1de2   : > { %v7440_v42 = vrot.slane %v7415_v22, 4 }
0x1de8   : > { %v8949_v24 = vpop.trf.xlu2 }
0x1de9   : > { %v7348_v47 = vpack.i.b16 %v8949_v24, %v8948_v21  ;;  %v7351_v46 = vshrl.u32 %v8949_v24, 16 }
0x1deb   : > { %v7352_v58 = vpack.i.b16 %v7351_v46, %v7350_v36  ;;  %v7364_v20 = vrot.slane %v7348_v47, 4  ;;  %v7369_v41 = vperm.slane %v7348_v47, %v9586_v60 }
0x1ded   : > { %v7365_v33 = vsel %vm691_vm9, %v9891_v7, %v7364_v20  ;;  %v7377_v6 = vsel %vm691_vm9, %v7369_v41, %v7376_v59  ;;  %v7416_v10 = vrot.slane %v7352_v58, 4  ;;  %v7421_v15 = vperm.slane %v7352_v58, %v9586_v60 }
0x1dee   : > { %v7373_v40 = vperm.slane %v7365_v33, %v9586_v60  ;;  %v7385_v25 = vperm.slane %v7377_v6, %v9594_v5  ;;  %v7374_v53 = vrot.slane %v7369_v41, 4 }
0x1def   : > { %v7417_v48 = vsel %vm691_vm9, %v9891_v7, %v7416_v10  ;;  %v7429_v63 = vsel %vm691_vm9, %v7421_v15, %v7428_v14  ;;  %v7426_v3 = vrot.slane %v7421_v15, 4 }
0x1df0   : > { %v7425_v9 = vperm.slane %v7417_v48, %v9586_v60  ;;  %v7400_v57 = vrot.slane %v7385_v25, 4  ;;  %v7437_v4 = vperm.slane %v7429_v63, %v9594_v5  ;;  %v7389_v54 = vsel %vm691_vm9, %v7373_v40, %v7388_v51 }
0x1df1   : > { %v7397_v28 = vperm.slane %v7389_v54, %v9594_v5  ;;  %v7386_v61 = vrot.slane %v7373_v40, 4  ;;  %v7375_v21 = vsel %vm691_vm9, %v7374_v53, %v7359_v37  ;;  %v7427_v62 = vsel %vm691_vm9, %v7426_v3, %v7411_v0 }
0x1df2   : > { %v7441_v8 = vsel %vm691_vm9, %v7425_v9, %v7440_v42  ;;  %v7452_v27 = vrot.slane %v7437_v4, 4  ;;  %v7401_v7 = vsel %vm691_vm9, 0, %v7400_v57  ;;  %v7438_v16 = vrot.slane %v7425_v9, 4 }
0x1df3   : > { %v7449_v29 = vperm.slane %v7441_v8, %v9594_v5  ;;  %v7404_v17 = vrot.slane %v7397_v28, 4  ;;  %v7387_v11 = vsel %vm691_vm9, %v7386_v61, %v7363_v1  ;;  %v7381_v43 = vperm.slane %v7375_v21, %v9594_v5 }
0x1df4   : > { %v7453_v30 = vsel %vm691_vm9, 0, %v7452_v27  ;;  %v7439_v31 = vsel %vm691_vm9, %v7438_v16, %v7415_v22  ;;  %v7393_v55 = vperm.slane %v7387_v11, %v9594_v5  ;;  %v7433_v45 = vperm.slane %v7427_v62, %v9594_v5 }
0x1df5   : > { %v7456_v49 = vrot.slane %v7449_v29, 4  ;;  %8953 = vxpose.binary.xlu1.c.b16.start.end [1/2] (short) (narrow) %v7453_v30, %v7401_v7, 16  ;;  %v7405_v26 = vsel %vm691_vm9, 0, %v7404_v17  ;;  %v7445_v35 = vperm.slane %v7439_v31, %v9594_v5  ;;  %v7398_v56 = vrot.slane %v7381_v43, 4 }
0x1df6   : > { %v7402_v50 = vrot.slane %v7393_v55, 4  ;;  %v7450_v24 = vrot.slane %v7433_v45, 4 }
0x1df7   : > { %v7457_v13 = vsel %vm691_vm9, 0, %v7456_v49  ;;  %v7454_v19 = vrot.slane %v7445_v35, 4  ;;  %v7399_v2 = vsel %vm691_vm9, 0, %v7398_v56 }
0x1df8   : > { %8950 = vxpose.binary.xlu2.c.b16.start.end [1/2] (short) (narrow) %v7457_v13, %v7405_v26, 16  ;;  %v7403_v18 = vsel %vm691_vm9, 0, %v7402_v50  ;;  %v7451_v36 = vsel %vm691_vm9, 0, %v7450_v24 }
0x1df9   : > { %v7455_v38 = vsel %vm691_vm9, 0, %v7454_v19 }
0x1dfd   : > { %v7176_v58 = vpop.xlane.xlu1 %7175 }
0x1dfe   : > { %v7186_v20 = vsub.f32 %v10770_v39, %v7176_v58 }
0x1e00   : > { %v7190_v41 = vmul.f32 1.442695, %v7186_v20 }
0x1e08   : > { %8956 = vxpose.binary.xlu2.c.b16.start.end [1/2] (short) (narrow) %v7455_v38, %v7403_v18, 16 }
0x1e18   : > { %8962 = vxpose.binary.xlu2.c.b16.start.end [1/2] (short) (narrow) %v7451_v36, %v7399_v2, 16 }
0x1e23   : > { %v7182_v47 = vpop.xlane.xlu2 %7181 }
0x1e24   : > { %v7188_v22 = vsub.f32 %v10774_v34, %v7182_v47 }
0x1e26   : > { %v7194_v33 = vmul.f32 1.442695, %v7188_v22 }
0x1e28   : > { %8965 = vxpose.binary.xlu2.c.b16.start.end [1/2] (short) (narrow) %v7437_v4, %v7385_v25, 16 }
0x1e2b   : > { %v7179_v46 = vpop.xlane.xlu2 %7178 }
0x1e2c   : > { %v7187_v59 = vsub.f32 %v10778_v32, %v7179_v46 }
0x1e2e   : > { %v7192_v1 = vmul.f32 1.442695, %v7187_v59 }
0x1e30   : > { %9043 = vpow2.f32 %v7192_v1 }
0x1e31   : > { %9045 = vpow2.f32 %v7190_v41 }
0x1e32   : > { %9047 = vpow2.f32 %v7194_v33 }
0x1e33   : > { %v7185_v6 = vpop.xlane.xlu2 %7184 }
0x1e34   : > { %v7189_v32 = vsub.f32 %v10782_v12, %v7185_v6 }
0x1e36   : > { %v9044_v37 = vpop.eup %9043  ;;  %v7196_v40 = vmul.f32 1.442695, %v7189_v32 }
0x1e37   : > { %v7201_v0 = vsel %vm3324_vm14, %v9044_v37, 0.0  ;;  %v9046_v10 = vpop.eup %9045 }
0x1e38   : > { %8971 = vxpose.binary.xlu2.c.b16.start.end [1/2] (short) (narrow) %v7433_v45, %v7381_v43, 16  ;;  %v7198_v14 = vsel %vm3324_vm14, %v9046_v10, 0.0  ;;  %v10832_v25 = vpop.eup %9047  ;;  %9049 = vpow2.f32 %v7196_v40 }
0x1e39   : > { %7202 = vadd.xlane.f32.xlu0 %v7201_v0  ;;  %v7204_v39 = vsel %vm3324_vm14, %v10832_v25, 0.0 }
0x1e3e   : > { %v10836_v15 = vpop.eup %9049 }
0x1e3f   : > { %v7207_v34 = vsel %vm3324_vm14, %v10836_v15, 0.0 }
0x1e55   : > { %7199 = vadd.xlane.f32.xlu1 %v7198_v14 }
0x1e5d   : > { %7205 = vadd.xlane.f32.xlu1 %v7204_v39 }
0x1e62   : > { %8959 = vxpose.binary.xlu0.c.b16.start.end [1/2] (short) (narrow) %v7449_v29, %v7397_v28, 16 }
0x1e65   : > { %7208 = vadd.xlane.f32.xlu1 %v7207_v34 }
0x1e9f   : > { %8968 = vxpose.binary.xlu1.c.b16.start.end [1/2] (short) (narrow) %v7445_v35, %v7393_v55, 16 }
0x1ea1   : > { %v10840_v12 = vpop.trf.xlu1 }
0x1ea9   : > { %v10842_v42 = vpop.trf.xlu1 }
0x1eac   : > { %v7203_v51 = vpop.xlane.xlu0 %7202 }
0x1ead   : > { %9051 = vrcp.f32 %v7203_v51  ;;  %v7236_v28 = vand.u32 2147483648, %v7203_v51  ;;  %vm7230_vm12 = vweird.f32 %v7203_v51  ;;  %v7234_v27 = vand.u32 2147483647, %v7203_v51 }
0x1eaf   : > { %v7237_v30 = vor.u32 1.1754944e-38, %v7236_v28  ;;  %vm7235_vm2 = vcmp.eq.f32.partialorder %v7234_v27, 8.507059e+37 }
0x1eb3   : > { %v9052_v48 = vpop.eup %9051 }
0x1eb4   : > { %v7226_v9 = vmul.f32 %v9052_v48, %v7203_v51  ;;  %vm7231_vm0 = vweird.f32 %v9052_v48 }
0x1eb5   : > { %vm7232_vm11 = vmor %vm7230_vm12, %vm7231_vm0 }
0x1eb6   : > { %v7227_v63 = vsub.f32 1.0, %v7226_v9 }
0x1eb8   : > { %v7228_v4 = vmul.f32 %v9052_v48, %v7227_v63 }
0x1eba   : > { %v7229_v54 = vadd.f32 %v9052_v48, %v7228_v4  ;;  %v8951_v4 = vpop.trf.xlu2 }
0x1ebc   : > { %v7233_v7 = vsel %vm7232_vm11, %v9052_v48, %v7229_v54 }
0x1ebd   : > { %v7238_v61 = vsel %vm7235_vm2, %v7237_v30, %v7233_v7  ;;  %v7720_v7 = vrot.slane %v10840_v12, 4  ;;  %v7732_v30 = vrot.slane %v8951_v4, 4 }
0x1ebe   : > { %v7239_v55 = vmul.f32 %v9044_v37, %v7238_v61 }
0x1ec0   : > { %v7271_v21 = vpack.c.bf16 %v7239_v55, %v7239_v55 }
0x1ec2   : > { %v7799_v47 = vunpack.c.l.b16 %v7271_v21  ;;  %v8952_v54 = vpop.trf.xlu2 }
0x1ec8   : > { %v7200_v57 = vpop.xlane.xlu1 %7199 }
0x1ec9   : > { %9053 = vrcp.f32 %v7200_v57  ;;  %v7221_v13 = vand.u32 2147483648, %v7200_v57  ;;  %v7219_v16 = vand.u32 2147483647, %v7200_v57  ;;  %vm7215_vm4 = vweird.f32 %v7200_v57 }
0x1eca   : > { %v8957_v28 = vpop.trf.xlu2 }
0x1ecb   : > { %v7222_v35 = vor.u32 1.1754944e-38, %v7221_v13  ;;  %vm7220_vm7 = vcmp.eq.f32.partialorder %v7219_v16, 8.507059e+37  ;;  %v7733_v61 = vsel %vm691_vm9, %v7732_v30, %v8957_v28 }
0x1ecf   : > { %v9054_v8 = vpop.eup %9053 }
0x1ed0   : > { %v7211_v29 = vmul.f32 %v9054_v8, %v7200_v57  ;;  %v7206_v17 = vpop.xlane.xlu1 %7205  ;;  %vm7216_vm3 = vweird.f32 %v9054_v8 }
0x1ed1   : > { %9055 = vrcp.f32 %v7206_v17  ;;  %vm7217_vm5 = vmor %vm7215_vm4, %vm7216_vm3  ;;  %v7251_v43 = vand.u32 2147483648, %v7206_v17  ;;  %vm7245_vm8 = vweird.f32 %v7206_v17  ;;  %v7249_v24 = vand.u32 2147483647, %v7206_v17 }
0x1ed2   : > { %v7212_v49 = vsub.f32 1.0, %v7211_v29 }
0x1ed3   : > { %v7252_v1 = vor.u32 1.1754944e-38, %v7251_v43  ;;  %vm7250_vm15 = vcmp.eq.f32.partialorder %v7249_v24, 8.507059e+37 }
0x1ed4   : > { %v7213_v26 = vmul.f32 %v9054_v8, %v7212_v49 }
0x1ed6   : > { %v7214_v11 = vadd.f32 %v9054_v8, %v7213_v26 }
0x1ed7   : > { %v9056_v31 = vpop.eup %9055 }
0x1ed8   : > { %v7241_v50 = vmul.f32 %v9056_v31, %v7206_v17  ;;  %v7209_v19 = vpop.xlane.xlu1 %7208  ;;  %v7218_v18 = vsel %vm7217_vm5, %v9054_v8, %v7214_v11  ;;  %vm7246_vm6 = vweird.f32 %v9056_v31  ;;  %v8958_v8 = vpop.trf.xlu2  ;;  %v7758_v11 = vrot.slane %v10842_v42, 4 }
0x1ed9   : > { %9057 = vrcp.f32 %v7209_v19  ;;  %v7223_v53 = vsel %vm7220_vm7, %v7222_v35, %v7218_v18  ;;  %vm7247_vm13 = vmor %vm7245_vm8, %vm7246_vm6  ;;  %v7266_v58 = vand.u32 2147483648, %v7209_v19  ;;  %v7264_v33 = vand.u32 2147483647, %v7209_v19 }
0x1eda   : > { %v7242_v38 = vsub.f32 1.0, %v7241_v50  ;;  %v7224_v3 = vmul.f32 %v9046_v10, %v7223_v53  ;;  %vm7260_vm12 = vweird.f32 %v7209_v19  ;;  %v7737_v35 = vperm.slane %v7733_v61, %v9586_v60 }
0x1edb   : > { %v7267_v32 = vor.u32 1.1754944e-38, %v7266_v58  ;;  %vm7265_vm2 = vcmp.eq.f32.partialorder %v7264_v33, 8.507059e+37  ;;  %v7770_v50 = vrot.slane %v8952_v54, 4 }
0x1edc   : > { %v7243_v62 = vmul.f32 %v9056_v31, %v7242_v38  ;;  %v7270_v45 = vpack.c.bf16 %v7224_v3, %v7224_v3  ;;  %v7744_v21 = vrot.slane %v7737_v35, 4 }
0x1ede   : > { %v7244_v56 = vadd.f32 %v9056_v31, %v7243_v62  ;;  %v7798_v36 = vunpack.c.l.b16 %v7270_v45  ;;  %v7771_v45 = vsel %vm691_vm9, %v7770_v50, %v8958_v8 }
0x1edf   : > { %v9058_v2 = vpop.eup %9057 }
0x1ee0   : > { %v7256_v46 = vmul.f32 %v9058_v2, %v7209_v19  ;;  %v7248_v59 = vsel %vm7247_vm13, %v9056_v31, %v7244_v56  ;;  %v7800_v37 = vpack.c.b16 %v7799_v47, %v7798_v36  ;;  %vm7261_vm0 = vweird.f32 %v9058_v2 }
0x1ee1   : > { %v7253_v41 = vsel %vm7250_vm15, %v7252_v1, %v7248_v59  ;;  %vm7262_vm11 = vmor %vm7260_vm12, %vm7261_vm0  ;;  %v7775_v59 = vperm.slane %v7771_v45, %v9586_v60 }
0x1ee2   : > { %v7257_v0 = vsub.f32 1.0, %v7256_v46  ;;  %v7805_v20 = vsel %vm3324_vm14, %v7800_v37, 0  ;;  %v7254_v10 = vmul.f32 %v10832_v25, %v7253_v41  ;;  %v8963_v25 = vpop.trf.xlu2 }
0x1ee3   : > { %7814 = vmatpush.bf16.xpose.msrb.mxu0 %v7805_v20  ;;  %v7721_v26 = vsel %vm691_vm9, %v7720_v7, %v8963_v25  ;;  %v7782_v33 = vrot.slane %v7775_v59, 4 }
0x1ee4   : > { %v7258_v22 = vmul.f32 %v9058_v2, %v7257_v0  ;;  %v7272_v34 = vpack.c.bf16 %v7254_v10, %v7254_v10  ;;  %v7725_v16 = vperm.slane %v7721_v26, %v9586_v60 }
0x1ee6   : > { %v7259_v6 = vadd.f32 %v9058_v2, %v7258_v22  ;;  %v7823_v48 = vunpack.c.l.b16 %v7272_v34  ;;  %v7738_v19 = vrot.slane %v7725_v16, 4 }
0x1ee8   : > { %v7263_v14 = vsel %vm7262_vm11, %v9058_v2, %v7259_v6 }
0x1ee9   : > { %v7268_v40 = vsel %vm7265_vm2, %v7267_v32, %v7263_v14 }
0x1eea   : > { %v7269_v39 = vmul.f32 %v10836_v15, %v7268_v40  ;;  %v8964_v27 = vpop.trf.xlu2 }
0x1eeb   : > { %v7759_v38 = vsel %vm691_vm9, %v7758_v11, %v8964_v27 }
0x1eec   : > { %v7273_v51 = vpack.c.bf16 %v7269_v39, %v7269_v39  ;;  %v7763_v56 = vperm.slane %v7759_v38, %v9586_v60 }
0x1eee   : > { %v7824_v9 = vunpack.c.l.b16 %v7273_v51  ;;  %v7776_v0 = vrot.slane %v7763_v56, 4 }
0x1ef0   : > { %v7825_v63 = vpack.c.b16 %v7824_v9, %v7823_v48 }
0x1ef2   : > { %v7830_v57 = vsel %vm3324_vm14, %v7825_v63, 0  ;;  %v8966_v29 = vpop.trf.xlu2 }
0x1ef3   : > { %7839 = vmatpush.bf16.xpose.msrb.mxu1 %v7830_v57  ;;  %v7714_v13 = vrot.slane %v8966_v29, 4 }
0x1efa   : > { %v8967_v17 = vpop.trf.xlu2 }
0x1efb   : > { %v7752_v53 = vrot.slane %v8967_v17, 4 }
0x1f02   : > { %v8972_v15 = vpop.trf.xlu2 }
0x1f03   : > { %v7715_v31 = vsel %vm691_vm9, %v7714_v13, %v8972_v15 }
0x1f04   : > { %v7719_v12 = vperm.slane %v7715_v31, %v9586_v60 }
0x1f06   : > { %v7739_v24 = vsel %vm691_vm9, %v7738_v19, %v7719_v12 }
0x1f07   : > { %v7743_v1 = vperm.slane %v7739_v24, %v9594_v5 }
0x1f0a   : > { %v8973_v62 = vpop.trf.xlu2 }
0x1f0b   : > { %v7753_v36 = vsel %vm691_vm9, %v7752_v53, %v8973_v62  ;;  %v8539_v53 = vld [vmem:[#allocation10 + $0x38] sm:$0xff] }
0x1f0c   : > { %v7757_v58 = vperm.slane %v7753_v36, %v9586_v60  ;;  %8122 = vmatpush.bf16.msrb.mxu2 %v8539_v53 }
0x1f0e   : > { %v8960_v49 = vpop.trf.xlu0  ;;  %v7777_v10 = vsel %vm691_vm9, %v7776_v0, %v7757_v58 }
0x1f0f   : > { %v7726_v55 = vrot.slane %v8960_v49, 4  ;;  %v7781_v40 = vperm.slane %v7777_v10, %v9594_v5 }
0x1f16   : > { %v8961_v42 = vpop.trf.xlu0 }
0x1f17   : > { %v7764_v46 = vrot.slane %v8961_v42, 4 }
0x1f4b   : > { %v8969_v18 = vpop.trf.xlu1 }
0x1f4c   : > { %v7727_v3 = vsel %vm691_vm9, %v7726_v55, %v8969_v18 }
0x1f4d   : > { %v7731_v43 = vperm.slane %v7727_v3, %v9586_v60 }
0x1f4f   : > { %v7745_v2 = vsel %vm691_vm9, %v7744_v21, %v7731_v43 }
0x1f50   : > { %v7749_v47 = vperm.slane %v7745_v2, %v9594_v5 }
0x1f52   : > { %v7750_v37 = vrot.slane %v7749_v47, 4 }
0x1f53   : > { %v8970_v20 = vpop.trf.xlu1 }
0x1f54   : > { %v7765_v41 = vsel %vm691_vm9, %v7764_v46, %v8970_v20  ;;  %v7751_v22 = vsel %vm691_vm9, %v7750_v37, %v7743_v1 }
0x1f55   : > { %v7769_v6 = vperm.slane %v7765_v41, %v9586_v60  ;;  %v7793_v48 = vshrl.u32 %v7751_v22, 16 }
0x1f57   : > { %v7783_v32 = vsel %vm691_vm9, %v7782_v33, %v7769_v6 }
0x1f58   : > { %v7787_v14 = vperm.slane %v7783_v32, %v9594_v5 }
0x1f5a   : > { %v7788_v39 = vrot.slane %v7787_v14, 4 }
0x1f5c   : > { %v7789_v34 = vsel %vm691_vm9, %v7788_v39, %v7781_v40 }
0x1f5d   : > { %v7792_v51 = vpack.i.b16 %v7789_v34, %v7751_v22  ;;  %v7794_v9 = vshrl.u32 %v7789_v34, 16 }
0x1f5f   : > { %8491 = vmatmul.msk.bf16.vlgmr.msrb.gmra.mxu0 %vm3324_vm14, %v7792_v51  ;;  %v7795_v63 = vpack.i.b16 %v7794_v9, %v7793_v48 }
0x1f61   : > { %8492 = vmatmul.msk.bf16.vlgmr.msrb.gmra.mxu1 %vm3324_vm14, %v7795_v63 }
0x1fdc   : > { %v7816_v57 = vpop.f32.mrf.mxu0 }
0x1fde   : > { %v7841_v4 = vpop.f32.mrf.mxu1 }
0x1fdf   : > { %v8974_v54 = vpack.i.bf16 %v7841_v4, %v7816_v57 }
0x1fe1   : > { %8975 = vxpose.xlu0.b32.start [1/2] (short) (narrow) %v8974_v54, 16 }
0x1fe4   : > { %v7818_v28 = vpop.f32.mrf.mxu0 }
0x1fe6   : > { %v7843_v8 = vpop.f32.mrf.mxu1 }
0x1fe7   : > { %v8976_v25 = vpack.i.bf16 %v7843_v8, %v7818_v28 }
0x1fe9   : > { %8977 = vxpose.xlu0.b32.end [2/2] (short) (narrow) %v8976_v25, 16 }
0x2085   : > { %v8978_v27 = vpop.trf.xlu0 }
0x2086   : > { %v8982_v29 = vunpack.i.h.bf16 %v8978_v27  ;;  %v8979_v17 = vunpack.i.l.bf16 %v8978_v27 }
0x2088   : > { %v7920_v7 = vrot.slane %v8982_v29, 4  ;;  %v7925_v30 = vperm.slane %v8982_v29, %v9586_v60  ;;  %v7910_v15 = vrot.slane %v8979_v17, 4  ;;  %v7915_v49 = vperm.slane %v8979_v17, %v9586_v60 }
0x208a   : > { %v7921_v26 = vsel %vm691_vm9, 0.0, %v7920_v7  ;;  %v7930_v13 = vrot.slane %v7925_v30, 4  ;;  %v7911_v61 = vsel %vm691_vm9, 0.0, %v7910_v15  ;;  %v7932_v16 = vrot.slane %v7915_v49, 4 }
0x208b   : > { %v7929_v11 = vperm.slane %v7921_v26, %v9586_v60  ;;  %v7919_v31 = vperm.slane %v7911_v61, %v9586_v60 }
0x208c   : > { %v7931_v55 = vsel %vm691_vm9, %v7930_v13, %v7915_v49  ;;  %v7933_v35 = vsel %vm691_vm9, %v7925_v30, %v7932_v16 }
0x208d   : > { %v7942_v50 = vrot.slane %v7929_v11, 4  ;;  %v7937_v19 = vperm.slane %v7931_v55, %v9594_v5  ;;  %v7941_v12 = vperm.slane %v7933_v35, %v9594_v5  ;;  %v7944_v18 = vrot.slane %v7919_v31, 4  ;;  %v8983_v38 = vpop.trf.xlu0 }
0x208e   : > { %v8987_v3 = vunpack.i.h.bf16 %v8983_v38  ;;  %v8984_v21 = vunpack.i.l.bf16 %v8983_v38 }
0x208f   : > { %v7943_v62 = vsel %vm691_vm9, %v7942_v50, %v7919_v31  ;;  %v7945_v43 = vsel %vm691_vm9, %v7929_v11, %v7944_v18  ;;  %v7954_v42 = vrot.slane %v7937_v19, 4  ;;  %v7956_v45 = vrot.slane %v7941_v12, 4 }
0x2090   : > { %v7949_v56 = vperm.slane %v7943_v62, %v9594_v5  ;;  %v7953_v24 = vperm.slane %v7945_v43, %v9594_v5  ;;  %v7972_v2 = vrot.slane %v8987_v3, 4  ;;  %v7977_v36 = vperm.slane %v8987_v3, %v9586_v60 }
0x2091   : > { %v7957_v47 = vsel %vm691_vm9, 0.0, %v7956_v45  ;;  %v7962_v46 = vrot.slane %v8984_v21, 4  ;;  %v7955_v59 = vsel %vm691_vm9, 0.0, %v7954_v42  ;;  %v7967_v22 = vperm.slane %v8984_v21, %v9586_v60 }
0x2092   : > { %v7958_v1 = vrot.slane %v7949_v56, 4  ;;  %v7960_v37 = vrot.slane %v7953_v24, 4  ;;  %v8019_v0 = vrot.slane %v7957_v47, 4  ;;  %v7973_v58 = vsel %vm691_vm9, 0.0, %v7972_v2 }
0x2093   : > { %v7982_v20 = vrot.slane %v7977_v36, 4  ;;  %v7963_v41 = vsel %vm691_vm9, 0.0, %v7962_v46  ;;  %v7981_v10 = vperm.slane %v7973_v58, %v9586_v60  ;;  %v8014_v51 = vsel %vm691_vm9, %v7956_v45, %v7937_v19 }
0x2094   : > { %v7961_v33 = vsel %vm691_vm9, 0.0, %v7960_v37  ;;  %v8020_v6 = vsel %vm691_vm9, %v8019_v0, %v7955_v59  ;;  %v7971_v40 = vperm.slane %v7963_v41, %v9586_v60  ;;  %v7959_v34 = vsel %vm691_vm9, 0.0, %v7958_v1 }
0x2095   : > { %v8024_v32 = vperm.slane %v8020_v6, %v9586_v60  ;;  %v8030_v14 = vrot.slane %v7961_v33, 4  ;;  %v7983_v39 = vsel %vm691_vm9, %v7982_v20, %v7967_v22  ;;  %v7994_v48 = vrot.slane %v7981_v10, 4 }
0x2096   : > { %v7984_v9 = vrot.slane %v7967_v22, 4  ;;  %v7989_v63 = vperm.slane %v7983_v39, %v9594_v5  ;;  %v7996_v57 = vrot.slane %v7971_v40, 4  ;;  %v8025_v4 = vsel %vm691_vm9, %v7960_v37, %v7949_v56 }
0x2097   : > { %v8031_v54 = vsel %vm691_vm9, %v8030_v14, %v7959_v34  ;;  %v7995_v8 = vsel %vm691_vm9, %v7994_v48, %v7971_v40  ;;  %v8036_v27 = vrot.slane %v8024_v32, 4  ;;  %v8018_v30 = vperm.slane %v8014_v51, %v9586_v60 }
0x2098   : > { %v7985_v28 = vsel %vm691_vm9, %v7977_v36, %v7984_v9  ;;  %v8035_v25 = vperm.slane %v8031_v54, %v9586_v60  ;;  %v7997_v17 = vsel %vm691_vm9, %v7981_v10, %v7996_v57  ;;  %v8001_v7 = vperm.slane %v7995_v8, %v9594_v5 }
0x2099   : > { %v7993_v29 = vperm.slane %v7985_v28, %v9594_v5  ;;  %v8005_v15 = vperm.slane %v7997_v17, %v9594_v5  ;;  %v8029_v49 = vperm.slane %v8025_v4, %v9586_v60  ;;  %v8006_v13 = vrot.slane %v7989_v63, 4 }
0x209a   : > { %v8042_v26 = vrot.slane %v8035_v25, 4  ;;  %v8010_v16 = vrot.slane %v8001_v7, 4  ;;  %v8037_v31 = vsel %vm691_vm9, %v8036_v27, %v8018_v30 }
0x209b   : > { %v8008_v61 = vrot.slane %v7993_v29, 4  ;;  %v8012_v11 = vrot.slane %v8005_v15, 4  ;;  %v8007_v18 = vsel %vm691_vm9, 0.0, %v8006_v13  ;;  %v8041_v53 = vperm.slane %v8037_v31, %v9594_v5 }
0x209c   : > { %v8043_v55 = vsel %vm691_vm9, %v8042_v26, %v8029_v49  ;;  %v8011_v21 = vsel %vm691_vm9, 0.0, %v8010_v16 }
0x209d   : > { %v8009_v35 = vsel %vm691_vm9, 0.0, %v8008_v61  ;;  %v8047_v50 = vperm.slane %v8043_v55, %v9594_v5  ;;  %v8013_v19 = vsel %vm691_vm9, 0.0, %v8012_v11  ;;  %v8052_v62 = vsel %vm691_vm9, %v8008_v61, %v7989_v63 }
0x209e   : > { %v8057_v12 = vrot.slane %v8009_v35, 4  ;;  %v8068_v38 = vrot.slane %v8013_v19, 4  ;;  %v8063_v45 = vsel %vm691_vm9, %v8012_v11, %v8001_v7  ;;  %v8056_v36 = vperm.slane %v8052_v62, %v9586_v60 }
0x209f   : > { %v8048_v3 = vrot.slane %v8047_v50, 4  ;;  %v8067_v46 = vperm.slane %v8063_v45, %v9586_v60  ;;  %v8050_v37 = vrot.slane %v8041_v53, 4 }
0x20a0   : > { %v8058_v43 = vsel %vm691_vm9, %v8057_v12, %v8007_v18  ;;  %v8069_v56 = vsel %vm691_vm9, %v8068_v38, %v8011_v21  ;;  %v8999_v38 = vld [vmem:[%s11001_s5 + $0x3] ss:$0 sm:$0xff] }
0x20a1   : > { %v8062_v42 = vperm.slane %v8058_v43, %v9586_v60  ;;  %v8049_v24 = vsel %vm691_vm9, %v8048_v3, %v8041_v53  ;;  %v8073_v2 = vperm.slane %v8069_v56, %v9586_v60  ;;  %v8051_v33 = vsel %vm691_vm9, %v8047_v50, %v8050_v37  ;;  %v8538_v60 = vld [vmem:[#allocation10 + $0x30] sm:$0xff]  ;;  %v9000_v3 = vld [vmem:[#allocation11 + $0x3] ss:$0 sm:$0xff] }
0x20a2   : > { %8123 = vmatpush.bf16.msrb.mxu2 %v8538_v60 }
0x20a3   : > { %v8074_v47 = vrot.slane %v8062_v42, 4  ;;  %v8080_v59 = vrot.slane %v8073_v2, 4 }
0x20a5   : > { %v8075_v1 = vsel %vm691_vm9, %v8074_v47, %v8056_v36  ;;  %v8081_v58 = vsel %vm691_vm9, %v8080_v59, %v8067_v46 }
0x20a6   : > { %v8079_v0 = vperm.slane %v8075_v1, %v9594_v5  ;;  %v8085_v20 = vperm.slane %v8081_v58, %v9594_v5 }
0x20a8   : > { %v8088_v41 = vrot.slane %v8079_v0, 4  ;;  %v8086_v22 = vrot.slane %v8085_v20, 4 }
0x20aa   : > { %v8089_v6 = vsel %vm691_vm9, %v8085_v20, %v8088_v41  ;;  %v8087_v32 = vsel %vm691_vm9, %v8086_v22, %v8079_v0 }
0x20ab   : > { %v8988_v10 = vpack.i.bf16 %v8089_v6, %v8051_v33 }
0x20ad   : > { %8989 = vrot.lane.b32.xlu1 %v8988_v10, %s9341_s15  ;;  %s8199_s15 = sshll.u32 %s381_s9, 4  ;;  %s8200_s15 = int_to_ptr.vmem [resolvable:$true] %s8199_s15 }
0x211f   : > { %v8990_v14 = vpop.permute.xlu1 %8989 }
0x2120   : > { %v8992_v40 = vunpack.i.h.bf16 %v8990_v14  ;;  %v8991_v39 = vunpack.i.l.bf16 %v8990_v14 }
0x2122   : > { %v8099_v34 = vsel %vm1470_vm10, %v8087_v32, %v8992_v40  ;;  %v8098_v5 = vsel %vm1470_vm10, %v8049_v24, %v8991_v39 }
0x2123   : > { %v8100_v51 = vpack.c.bf16 %v8099_v34, %v8098_v5 }
0x2125   : > { %8501 = vmatmul.msk.bf16.vlgmr.msrb.gmra.mxu2 %vm528_vm1, %v8100_v51 }
0x21a8   : > { %v8125_v48 = vpop.f32.mrf.mxu2 }
0x21a9   : > { %v8126_v9 = vadd.f32 %v8125_v48, %v10261_v52 }
0x21ab   : > { %v8130_v63 = vsel %vm528_vm1, %v8126_v9, 0.0 }
0x21ac   : > { %8131 = vadd.xlane.f32.xlu2 %v8130_v63 }
0x21b0   : > { %v8127_v57 = vpop.f32.mrf.mxu2 }
0x21b1   : > { %v8128_v4 = vadd.f32 %v8127_v57, %v10271_v23 }
0x21b3   : > { %v8133_v54 = vsel %vm528_vm1, %v8128_v4, 0.0 }
0x21b4   : > { %8134 = vadd.xlane.f32.xlu0 %v8133_v54 }
0x221f   : > { %v8132_v28 = vpop.xlane.xlu2 %8131 }
0x2220   : > { %v8136_v8 = vmul.f32 %v8132_v28, %v9846_v44 }
0x2222   : > { %v8138_v25 = vsub.f32 %v8126_v9, %v8136_v8 }
0x2224   : > { %v8140_v27 = vmul.f32 %v8138_v25, %v8138_v25 }
0x2226   : > { %v8142_v29 = vsel %vm528_vm1, %v8140_v27, 0.0 }
0x2227   : > { %v8135_v17 = vpop.xlane.xlu0 %8134  ;;  %8143 = vadd.xlane.f32.xlu1 %v8142_v29 }
0x2228   : > { %v8137_v52 = vmul.f32 %v8135_v17, %v9846_v44 }
0x222a   : > { %v8139_v7 = vsub.f32 %v8128_v4, %v8137_v52 }
0x222c   : > { %v8141_v30 = vmul.f32 %v8139_v7, %v8139_v7 }
0x222e   : > { %v8145_v15 = vsel %vm528_vm1, %v8141_v30, 0.0 }
0x222f   : > { %8146 = vadd.xlane.f32.xlu2 %v8145_v15 }
0x229a   : > { %v8144_v23 = vpop.xlane.xlu1 %8143 }
0x229b   : > { %v8148_v49 = vmul.f32 %v8144_v23, %v9846_v44 }
0x229d   : > { %v8150_v26 = vadd.f32 1e-06, %v8148_v49 }
0x229f   : > { %9059 = vrsqrt.f32 %v8150_v26  ;;  %vm8158_vm10 = vweird.f32 %v8150_v26 }
0x22a2   : > { %v8147_v13 = vpop.xlane.xlu2 %8146 }
0x22a3   : > { %v8149_v61 = vmul.f32 %v8147_v13, %v9846_v44 }
0x22a5   : > { %v9060_v16 = vpop.eup %9059  ;;  %v8151_v11 = vadd.f32 1e-06, %v8149_v61 }
0x22a6   : > { %v8153_v31 = vmul.f32 %v9060_v16, %v8150_v26  ;;  %vm8159_vm9 = vweird.f32 %v9060_v16 }
0x22a7   : > { %9061 = vrsqrt.f32 %v8151_v11  ;;  %vm8160_vm14 = vmor %vm8158_vm10, %vm8159_vm9  ;;  %vm8168_vm4 = vweird.f32 %v8151_v11 }
0x22a8   : > { %v8154_v55 = vmul.f32 %v9060_v16, %v8153_v31 }
0x22aa   : > { %v8155_v35 = vmul.f32 0.5, %v8154_v55 }
0x22ac   : > { %v8156_v50 = vsub.f32 1.5, %v8155_v35 }
0x22ad   : > { %v9062_v19 = vpop.eup %9061 }
0x22ae   : > { %v8157_v12 = vmul.f32 %v9060_v16, %v8156_v50  ;;  %v8163_v18 = vmul.f32 %v9062_v19, %v8151_v11  ;;  %vm8169_vm3 = vweird.f32 %v9062_v19 }
0x22af   : > { %vm8170_vm5 = vmor %vm8168_vm4, %vm8169_vm3 }
0x22b0   : > { %v8161_v44 = vsel %vm8160_vm14, %v9060_v16, %v8157_v12  ;;  %v8164_v53 = vmul.f32 %v9062_v19, %v8163_v18 }
0x22b1   : > { %v8172_v21 = vmul.f32 %v8161_v44, %v8138_v25 }
0x22b2   : > { %v8165_v62 = vmul.f32 0.5, %v8164_v53 }
0x22b3   : > { %v8177_v43 = vmul.f32 %v8999_v38, %v8172_v21 }
0x22b4   : > { %v8166_v42 = vsub.f32 1.5, %v8165_v62 }
0x22b5   : > { %v8182_v45 = vadd.f32 %v9000_v3, %v8177_v43 }
0x22b6   : > { %v8167_v56 = vmul.f32 %v9062_v19, %v8166_v42 }
0x22b7   : > { %8184 = vst.msk [vmem:[%s381_s9] sm:$0xff] %vm528_vm1, %v8182_v45 }
0x22b8   : > { %v8171_v24 = vsel %vm8170_vm5, %v9062_v19, %v8167_v56 }
0x22b9   : > { %v8173_v2 = vmul.f32 %v8171_v24, %v8139_v7 }
0x22bb   : > { %v8178_v36 = vmul.f32 %v8999_v38, %v8173_v2 }
0x22bd   : > { %v8183_v47 = vadd.f32 %v9000_v3, %v8178_v36 }
0x22bf   : > { %8185 = vst.msk [vmem:[%s381_s9 + $0x8] sm:$0xff] %vm528_vm1, %v8183_v47 }
0x22c0   : > { %9274 = shalt.err (!%p9271_p9)
}
0x22c1   : > { %s9344_s20 = smov 128   ;;  %s9345_s22 = smov 8  }
0x22c2   : > { %8563 = dma.vmem_to_hbm [thread:$0]  (%p9476_p0), %s8200_s15, 256, %s8202_s8, %s8187_s19, %s9344_s20, %s9344_s20, %s9345_s22  }
0x22c3 PF: > { %s8216_s30 = sand.u32 1, %s9313_s24   ;;  %p11034_p10 = scmp.ge.s32.totalorder %s9325_s27, 2 }
0x22c4   : > { %s8217_s18 = scalar_lea.sflag [#allocation4], %s8216_s30 }
0x22c5   : > { %p8586_p11 = pnand %p11034_p10, %p9482_p6 }
0x22c7   : > { %p8587_p12 = pneg %p8586_p11 }
0x22c9   : > { %9308 = dma.done.wait (%p8587_p12), %s8217_s18, 256  }
0x22ca   : > { %9310 = vsyncadd (%p8587_p12), %s8217_s18, 4294967040  ;;  %p23_p2 = scmp.ge.s32.totalorder %s9452_s28, 4   ;;  %s11035_s24 = smov %s9317_s25 }
0x22cb   : > { %s11036_s25 = smov %s9321_s26  ;;  %s11037_s26 = smov %s9464_s21 }
0x22cc   : > { %s11038_s27 = smov %s9452_s28  ;;  %25 = sbr.rel (!%p23_p2) target bundleno = 11 (0xb), region = 113 }
0x22d1   :  { %8223 = vsyncpa [#allocation3], 1 }
0x22d2   :  { %8225 = vsyncpa [#allocation3 + $0x1], 1 }
0x22d3   :  { %8226 = vsyncpa [#allocation6], 1 }
0x22d4   :  { %8227 = vsyncpa [#allocation9], 1 }
0x22d5   :  { %8228 = vsyncpa [#allocation12], 1 }
0x22d6   :  { %8229 = vsyncpa [#allocation4], 1 }
0x22d7   :  { %8231 = vsyncpa [#allocation4 + $0x1], 1 }

</bundles_post_ra>
